<compile_context>
chip_gen: v7x
topology: tpu7x:2x2x1
jax: 0.10.0
libtpu: 0.0.40
codegen_flags: <defaults>
</compile_context>

<pallas_src>
import functools
import math

import jax
import jax.numpy as jnp
from jax.experimental import pallas as pl
from jax.experimental.pallas import tpu as pltpu

LANE = 128                           # lane width (feature-dim padding)
ROW_TILE = 256                       # adj row-slab height; matches v6e/v7x MXU
VMEM_LIMIT = 48 * 1024 * 1024        # headroom under v7x's 64 MiB/TC
FUSED_VMEM_BUDGET = 40 * 1024 * 1024 # use the fused kernel below this estimate


def _round_up(v, m):
    return ((v + m - 1) // m) * m


def _pad_last(a, target):
    pad = target - a.shape[-1]
    if pad == 0:
        return a
    cfg = [(0, 0)] * (a.ndim - 1) + [(0, pad)]
    return jnp.pad(a, cfg)


# ---------------------------------------------------------------------------
# Fused whole-network kernel: all layers for one batch element per grid step.
# adj, weights and intermediate activations stay resident in VMEM.
# ---------------------------------------------------------------------------
def _gcn_fused_kernel(*refs, num_layers, adj_first):
    x_ref = refs[0]                                   # (1, N, C0)   bf16
    adj_ref = refs[1]                                 # (N, N)       bf16
    w_refs = refs[2:2 + num_layers]                   # (Cin, Cout)  bf16
    c_refs = refs[2 + num_layers:2 + 2 * num_layers]  # (1, Cout)    f32
    o_ref = refs[2 + 2 * num_layers]                  # (1, N, Clast) f32

    a = x_ref[0]
    adj = adj_ref[...]
    out = a
    for i in range(num_layers):
        w = w_refs[i][...]
        c = c_refs[i][...]
        if adj_first[i]:
            # (adj @ a) @ W   -- N^2 matmul at width Cin (< Cout)
            t = jnp.dot(adj, a, preferred_element_type=jnp.float32)
            out = jnp.dot(t.astype(jnp.bfloat16), w,
                          preferred_element_type=jnp.float32)
        else:
            # adj @ (a @ W)   -- N^2 matmul at width Cout (<= Cin)
            s = jnp.dot(a, w, preferred_element_type=jnp.float32)
            out = jnp.dot(adj, s.astype(jnp.bfloat16),
                          preferred_element_type=jnp.float32)
        out = out + c                       # BN scale pre-folded into W
        if i < num_layers - 1:
            out = jnp.maximum(out, 0.0)
            a = out.astype(jnp.bfloat16)    # bf16 inter-layer activation
    o_ref[0] = out.astype(o_ref.dtype)


def gcn_forward_fused(x_bf, adj_bf, weights_bf, shifts):
    B, N, C0 = x_bf.shape
    L = len(weights_bf)
    Cl = weights_bf[-1].shape[1]
    adj_first = tuple(w.shape[0] < w.shape[1] for w in weights_bf)

    in_specs = [
        pl.BlockSpec((1, N, C0), lambda b: (b, 0, 0)),   # x, per batch element
        pl.BlockSpec((N, N), lambda b: (0, 0)),          # adj, resident
    ]
    for w in weights_bf:
        in_specs.append(pl.BlockSpec(w.shape, lambda b: (0, 0)))
    for c in shifts:
        in_specs.append(pl.BlockSpec((1, c.shape[1]), lambda b: (0, 0)))
    out_specs = pl.BlockSpec((1, N, Cl), lambda b: (b, 0, 0))

    kernel = functools.partial(_gcn_fused_kernel, num_layers=L,
                               adj_first=adj_first)
    return pl.pallas_call(
        kernel,
        out_shape=jax.ShapeDtypeStruct((B, N, Cl), jnp.float32),
        grid_spec=pltpu.PrefetchScalarGridSpec(
            num_scalar_prefetch=0,
            grid=(B,),
            in_specs=in_specs,
            out_specs=out_specs,
        ),
        compiler_params=pltpu.CompilerParams(
            dimension_semantics=("parallel",),
            vmem_limit_bytes=VMEM_LIMIT,
        ),
    )(x_bf, adj_bf, *weights_bf, *shifts)


# ---------------------------------------------------------------------------
# Streaming per-layer kernels (large-N fallback).
# Grid = (n_row_tiles, B): batch is the innermost axis, so the (tm, N) adj
# row slab's block index is unchanged across b and is NOT re-DMA'd -> adj HBM
# traffic is N^2 instead of B*N^2.
# ---------------------------------------------------------------------------
def _gc_adj_first_kernel(x_ref, w_ref, adj_ref, c_ref, o_ref, *, apply_relu):
    """out_rows = (adj_rows @ x) @ W + c   (used when Cin < Cout)."""
    ax = jnp.dot(adj_ref[...], x_ref[0], preferred_element_type=jnp.float32)
    out = jnp.dot(ax.astype(w_ref.dtype), w_ref[...],
                  preferred_element_type=jnp.float32)
    out = out + c_ref[...]
    if apply_relu:
        out = jnp.maximum(out, 0.0)
    o_ref[0] = out.astype(o_ref.dtype)


def _gc_xw_first_kernel(x_ref, w_ref, adj_ref, c_ref, o_ref, support_ref, *,
                        apply_relu):
    """out_rows = adj_rows @ (x @ W) + c   (used when Cout <= Cin).

    support = x @ W for the whole batch is computed at the first row tile
    (r == 0, which visits every b since b is the inner grid axis) and kept
    resident in a persistent (B, N, Cout) bf16 VMEM scratch.
    """
    b = pl.program_id(1)

    @pl.when(pl.program_id(0) == 0)
    def _():
        s = jnp.dot(x_ref[0], w_ref[...], preferred_element_type=jnp.float32)
        support_ref[b] = s.astype(support_ref.dtype)

    out = jnp.dot(adj_ref[...], support_ref[b],
                  preferred_element_type=jnp.float32)
    out = out + c_ref[...]
    if apply_relu:
        out = jnp.maximum(out, 0.0)
    o_ref[0] = out.astype(o_ref.dtype)


def graph_conv_stream(x_bf, w_bf, adj_bf, shift, *, apply_relu, out_dtype):
    """Pallas-backed GraphConvolution (+ fused folded-BN/ReLU), streamed."""
    B, N, Cin = x_bf.shape
    Cin_w, Cout = w_bf.shape
    assert Cin == Cin_w and adj_bf.shape == (N, N)
    tm = min(ROW_TILE, N)
    assert N % tm == 0, "N must be padded to a multiple of the row tile"
    n_row = N // tm
    adj_first = Cin < Cout

    in_specs = [
        pl.BlockSpec((1, N, Cin), lambda r, b: (b, 0, 0)),   # x (per batch)
        pl.BlockSpec((Cin, Cout), lambda r, b: (0, 0)),      # W (folded BN)
        pl.BlockSpec((tm, N), lambda r, b: (r, 0)),          # adj row slab
        pl.BlockSpec((1, Cout), lambda r, b: (0, 0)),        # bias*scale+shift
    ]
    out_specs = pl.BlockSpec((1, tm, Cout), lambda r, b: (b, r, 0))

    if adj_first:
        kernel = functools.partial(_gc_adj_first_kernel, apply_relu=apply_relu)
        scratch_shapes = []
        dims = ("parallel", "parallel")      # row tiles fully independent
    else:
        kernel = functools.partial(_gc_xw_first_kernel, apply_relu=apply_relu)
        scratch_shapes = [pltpu.VMEM((B, N, Cout), jnp.bfloat16)]
        dims = ("arbitrary", "parallel")     # support carried across row axis

    return pl.pallas_call(
        kernel,
        out_shape=jax.ShapeDtypeStruct((B, N, Cout), out_dtype),
        grid_spec=pltpu.PrefetchScalarGridSpec(
            num_scalar_prefetch=0,
            grid=(n_row, B),
            in_specs=in_specs,
            out_specs=out_specs,
            scratch_shapes=scratch_shapes,
        ),
        compiler_params=pltpu.CompilerParams(
            dimension_semantics=dims,
            vmem_limit_bytes=VMEM_LIMIT,
        ),
    )(x_bf, w_bf, adj_bf, shift)


# ---------------------------------------------------------------------------
# Model wrapper (eval mode), matching the PyTorch GCN module.
# ---------------------------------------------------------------------------
class GCNPallas:
    """JAX/Pallas port of the PyTorch GCN module (eval mode)."""

    def __init__(self, nfeat, nhid, nout, adj, dropout=0.3, num_layers=1,
                 key=None):
        assert num_layers > 0
        if key is None:
            key = jax.random.PRNGKey(0)
        self.dropout = dropout            # eval mode -> dropout is identity
        self.num_layers = num_layers
        self.nout = nout

        N = adj.shape[0]
        assert adj.shape == (N, N)
        self.n_nodes = N
        self.adj_f32 = adj.astype(jnp.float32)          # returned / reference

        # Node count padded to the row tile; adj gets zero rows+cols, x gets
        # zero rows -- padded rows never influence valid rows.
        Np = _round_up(N, ROW_TILE)
        self.n_pad = Np
        adj_p = jnp.zeros((Np, Np), jnp.float32).at[:N, :N].set(self.adj_f32)
        self.adj_bf = adj_p.astype(jnp.bfloat16)        # cast ONCE, reused

        dims = [nfeat] + [nhid] * (num_layers - 1) + [nout]
        self.dims = dims
        self.pdims = [_round_up(d, LANE) for d in dims]  # lane-padded widths

        # Unpadded f32 params (for the pure-JAX reference) and lane-padded
        # bf16 copies with eval-mode BatchNorm folded in (for the kernels).
        self.weights, self.biases = [], []
        self.bn_scales, self.bn_shifts = [], []
        self.pweights_bf, self.pshifts = [], []
        eps = 1e-5
        for i in range(num_layers):
            in_f, out_f = dims[i], dims[i + 1]
            pin, pout = self.pdims[i], self.pdims[i + 1]
            stdv = 1.0 / math.sqrt(out_f)
            key, kw, kb = jax.random.split(key, 3)
            w = jax.random.uniform(kw, (in_f, out_f), jnp.float32, -stdv, stdv)
            b = jax.random.uniform(kb, (out_f,), jnp.float32, -stdv, stdv)
            self.weights.append(w)
            self.biases.append(b)

            if i < num_layers - 1:
                # Freshly-initialized BatchNorm1d in eval mode:
                # mean=0, var=1, gamma=1, beta=0 -> scale/shift fold.
                gamma = jnp.ones((out_f,), jnp.float32)
                beta = jnp.zeros((out_f,), jnp.float32)
                running_mean = jnp.zeros((out_f,), jnp.float32)
                running_var = jnp.ones((out_f,), jnp.float32)
                scale = gamma / jnp.sqrt(running_var + eps)
                shift = beta - running_mean * scale
                self.bn_scales.append(scale)
                self.bn_shifts.append(shift)
            else:
                scale = jnp.ones((out_f,), jnp.float32)
                shift = jnp.zeros((out_f,), jnp.float32)

            # Fold BN: out*scale + (bias*scale + shift) == (adj@(x@(W*scale)))
            # + combined shift.  Padded columns stay exactly zero.
            w_folded = w * scale[None, :]
            c_folded = b * scale + shift
            wp = jnp.zeros((pin, pout), jnp.float32)
            wp = wp.at[:in_f, :out_f].set(w_folded)
            self.pweights_bf.append(wp.astype(jnp.bfloat16))   # cast ONCE
            self.pshifts.append(
                _pad_last(c_folded, pout).reshape(1, pout).astype(jnp.float32))

    def _fused_vmem_bytes(self):
        Np = self.n_pad
        bts = 2 * Np * Np * 2                          # adj (double-buffered)
        bts += 2 * Np * self.pdims[0] * 2              # x block
        bts += 2 * Np * self.pdims[-1] * 4             # out block (f32)
        for i in range(self.num_layers):
            bts += 2 * self.pdims[i] * self.pdims[i + 1] * 2
        bts += 3 * Np * max(self.pdims) * 4            # in-kernel intermediates
        return bts

    def __call__(self, x, force_streaming=False):
        B, N, C = x.shape
        assert N == self.n_nodes and C == self.dims[0]
        Np = self.n_pad

        xp = jnp.zeros((B, Np, self.pdims[0]), jnp.float32)
        xp = xp.at[:, :N, :C].set(x.astype(jnp.float32))
        xb = xp.astype(jnp.bfloat16)

        if (not force_streaming) and self._fused_vmem_bytes() <= FUSED_VMEM_BUDGET:
            out = gcn_forward_fused(xb, self.adj_bf, self.pweights_bf,
                                    self.pshifts)
        else:
            a = xb
            for i in range(self.num_layers):
                last = i == self.num_layers - 1
                a = graph_conv_stream(
                    a, self.pweights_bf[i], self.adj_bf, self.pshifts[i],
                    apply_relu=not last,
                    # bf16 intermediates feed the next layer directly.
                    out_dtype=jnp.float32 if last else jnp.bfloat16,
                )
                # F.dropout with training=False is identity (eval mode).
            out = a
        return out[:, :N, : self.nout], self.adj_f32


def _reference_forward(model, x):
    """Pure-JAX (f32, unpadded) reference for a sanity check."""
    x = x.astype(jnp.float32)
    adj = model.adj_f32
    for i in range(model.num_layers):
        last = i == model.num_layers - 1
        support = jnp.einsum("bnc,cf->bnf", x, model.weights[i])
        out = jnp.einsum("nm,bmf->bnf", adj, support) + model.biases[i]
        if not last:
            out = out * model.bn_scales[i] + model.bn_shifts[i]
            out = jnp.maximum(out, 0.0)
        x = out
    return x


if __name__ == "__main__":
    key = jax.random.PRNGKey(0)
    B, N = 2, 512                 # batch, number of graph nodes
    nfeat, nhid, nout = 32, 192, 64
    num_layers = 3                # exercises BN+ReLU path and both orders

    kx, kadj, kparams = jax.random.split(key, 3)
    x = jax.random.normal(kx, (B, N, nfeat), jnp.float32)

    # Deterministic, symmetric, row-normalized adjacency (stand-in for the
    # .npy buffer the PyTorch module loads).
    a = jax.random.uniform(kadj, (N, N), jnp.float32)
    a = (a + a.T) * 0.5 + jnp.eye(N, dtype=jnp.float32)
    adj = a / jnp.sum(a, axis=1, keepdims=True)

    model = GCNPallas(nfeat, nhid, nout, adj, dropout=0.3,
                      num_layers=num_layers, key=kparams)

    ref = _reference_forward(model, x)

    # Fused whole-network path (used automatically at this size).
    out_fused, adj_out = model(x)
    out_fused = jax.block_until_ready(out_fused)
    assert out_fused.shape == (B, N, nout)
    assert adj_out.shape == (N, N)
    err_f = float(jnp.max(jnp.abs(out_fused - ref)))
    # bf16 matmul inputs (f32 accumulation) -> looser tolerance than all-f32.
    assert jnp.allclose(out_fused, ref, atol=3e-2, rtol=3e-2), (
        "fused max abs err = %f" % err_f)

    # Streaming per-layer path (large-N fallback) checked as well.
    out_stream, _ = model(x, force_streaming=True)
    out_stream = jax.block_until_ready(out_stream)
    err_s = float(jnp.max(jnp.abs(out_stream - ref)))
    assert jnp.allclose(out_stream, ref, atol=3e-2, rtol=3e-2), (
        "streaming max abs err = %f" % err_s)

    print("KERNEL_OK")
</pallas_src>

<mosaic_0001>
module attributes {stable_mosaic.version = 11 : i64} {
  func.func @_gcn_fused_kernel(%arg0: i32, %arg1: memref<1x512x128xbf16, #tpu.memory_space<vmem>>, %arg2: memref<512x512xbf16, #tpu.memory_space<vmem>>, %arg3: memref<128x256xbf16, #tpu.memory_space<vmem>>, %arg4: memref<256x256xbf16, #tpu.memory_space<vmem>>, %arg5: memref<256x128xbf16, #tpu.memory_space<vmem>>, %arg6: memref<1x256xf32, #tpu.memory_space<vmem>>, %arg7: memref<1x256xf32, #tpu.memory_space<vmem>>, %arg8: memref<1x128xf32, #tpu.memory_space<vmem>>, %arg9: memref<1x512x128xf32, #tpu.memory_space<vmem>>) attributes {dimension_semantics = [#tpu.dimension_semantics<parallel>], iteration_bounds = array<i64: 2>, scalar_prefetch = 0 : i64, scratch_operands = 0 : i64, tpu.core_type = #tpu.core_type<tc>, window_params = [{transform_indices = @transform_0, window_bounds = array<i64: 1, 512, 128>}, {pipeline_mode = #tpu.pipeline_mode<synchronous>, transform_indices = @transform_1, window_bounds = array<i64: 512, 512>}, {pipeline_mode = #tpu.pipeline_mode<synchronous>, transform_indices = @transform_2, window_bounds = array<i64: 128, 256>}, {pipeline_mode = #tpu.pipeline_mode<synchronous>, transform_indices = @transform_3, window_bounds = array<i64: 256, 256>}, {pipeline_mode = #tpu.pipeline_mode<synchronous>, transform_indices = @transform_4, window_bounds = array<i64: 256, 128>}, {pipeline_mode = #tpu.pipeline_mode<synchronous>, transform_indices = @transform_5, window_bounds = array<i64: 1, 256>}, {pipeline_mode = #tpu.pipeline_mode<synchronous>, transform_indices = @transform_6, window_bounds = array<i64: 1, 256>}, {pipeline_mode = #tpu.pipeline_mode<synchronous>, transform_indices = @transform_7, window_bounds = array<i64: 1, 128>}, {transform_indices = @transform_8, window_bounds = array<i64: 1, 512, 128>}]} {
    %c0 = arith.constant 0 : index
    %c0_0 = arith.constant 0 : index
    %c0_1 = arith.constant 0 : index
    %0 = vector.load %arg1[%c0, %c0_0, %c0_1] : memref<1x512x128xbf16, #tpu.memory_space<vmem>>, vector<1x512x128xbf16>
    %1 = vector.shape_cast %0 : vector<1x512x128xbf16> to vector<512x128xbf16>
    %c0_2 = arith.constant 0 : index
    %c0_3 = arith.constant 0 : index
    %2 = vector.load %arg2[%c0_2, %c0_3] : memref<512x512xbf16, #tpu.memory_space<vmem>>, vector<512x512xbf16>
    %c0_4 = arith.constant 0 : index
    %c0_5 = arith.constant 0 : index
    %3 = vector.load %arg3[%c0_4, %c0_5] : memref<128x256xbf16, #tpu.memory_space<vmem>>, vector<128x256xbf16>
    %c0_6 = arith.constant 0 : index
    %c0_7 = arith.constant 0 : index
    %4 = vector.load %arg6[%c0_6, %c0_7] : memref<1x256xf32, #tpu.memory_space<vmem>>, vector<1x256xf32>
    %cst = arith.constant dense<0.000000e+00> : vector<512x128xf32>
    %5 = tpu.matmul %2, %1, %cst {dimension_numbers = #tpu.dot_dimension_numbers<[1], [0], [0], [1], [0, 0, 1, 1], [], []>} : vector<512x512xbf16>, vector<512x128xbf16>, vector<512x128xf32> -> vector<512x128xf32>
    %6 = arith.truncf %5 : vector<512x128xf32> to vector<512x128xbf16>
    %cst_8 = arith.constant dense<0.000000e+00> : vector<512x256xf32>
    %7 = tpu.matmul %6, %3, %cst_8 {dimension_numbers = #tpu.dot_dimension_numbers<[1], [0], [0], [1], [0, 0, 1, 1], [], []>} : vector<512x128xbf16>, vector<128x256xbf16>, vector<512x256xf32> -> vector<512x256xf32>
    %8 = vector.broadcast %4 : vector<1x256xf32> to vector<512x256xf32>
    %9 = arith.addf %7, %8 : vector<512x256xf32>
    %cst_9 = arith.constant 0.000000e+00 : f32
    %10 = vector.broadcast %cst_9 : f32 to vector<512x256xf32>
    %11 = arith.maximumf %9, %10 : vector<512x256xf32>
    %12 = arith.truncf %11 : vector<512x256xf32> to vector<512x256xbf16>
    %c0_10 = arith.constant 0 : index
    %c0_11 = arith.constant 0 : index
    %13 = vector.load %arg4[%c0_10, %c0_11] : memref<256x256xbf16, #tpu.memory_space<vmem>>, vector<256x256xbf16>
    %c0_12 = arith.constant 0 : index
    %c0_13 = arith.constant 0 : index
    %14 = vector.load %arg7[%c0_12, %c0_13] : memref<1x256xf32, #tpu.memory_space<vmem>>, vector<1x256xf32>
    %cst_14 = arith.constant dense<0.000000e+00> : vector<512x256xf32>
    %15 = tpu.matmul %12, %13, %cst_14 {dimension_numbers = #tpu.dot_dimension_numbers<[1], [0], [0], [1], [0, 0, 1, 1], [], []>} : vector<512x256xbf16>, vector<256x256xbf16>, vector<512x256xf32> -> vector<512x256xf32>
    %16 = arith.truncf %15 : vector<512x256xf32> to vector<512x256xbf16>
    %cst_15 = arith.constant dense<0.000000e+00> : vector<512x256xf32>
    %17 = tpu.matmul %2, %16, %cst_15 {dimension_numbers = #tpu.dot_dimension_numbers<[1], [0], [0], [1], [0, 0, 1, 1], [], []>} : vector<512x512xbf16>, vector<512x256xbf16>, vector<512x256xf32> -> vector<512x256xf32>
    %18 = vector.broadcast %14 : vector<1x256xf32> to vector<512x256xf32>
    %19 = arith.addf %17, %18 : vector<512x256xf32>
    %cst_16 = arith.constant 0.000000e+00 : f32
    %20 = vector.broadcast %cst_16 : f32 to vector<512x256xf32>
    %21 = arith.maximumf %19, %20 : vector<512x256xf32>
    %22 = arith.truncf %21 : vector<512x256xf32> to vector<512x256xbf16>
    %c0_17 = arith.constant 0 : index
    %c0_18 = arith.constant 0 : index
    %23 = vector.load %arg5[%c0_17, %c0_18] : memref<256x128xbf16, #tpu.memory_space<vmem>>, vector<256x128xbf16>
    %c0_19 = arith.constant 0 : index
    %c0_20 = arith.constant 0 : index
    %24 = vector.load %arg8[%c0_19, %c0_20] : memref<1x128xf32, #tpu.memory_space<vmem>>, vector<1x128xf32>
    %cst_21 = arith.constant dense<0.000000e+00> : vector<512x128xf32>
    %25 = tpu.matmul %22, %23, %cst_21 {dimension_numbers = #tpu.dot_dimension_numbers<[1], [0], [0], [1], [0, 0, 1, 1], [], []>} : vector<512x256xbf16>, vector<256x128xbf16>, vector<512x128xf32> -> vector<512x128xf32>
    %26 = arith.truncf %25 : vector<512x128xf32> to vector<512x128xbf16>
    %cst_22 = arith.constant dense<0.000000e+00> : vector<512x128xf32>
    %27 = tpu.matmul %2, %26, %cst_22 {dimension_numbers = #tpu.dot_dimension_numbers<[1], [0], [0], [1], [0, 0, 1, 1], [], []>} : vector<512x512xbf16>, vector<512x128xbf16>, vector<512x128xf32> -> vector<512x128xf32>
    %28 = vector.broadcast %24 : vector<1x128xf32> to vector<512x128xf32>
    %29 = arith.addf %27, %28 : vector<512x128xf32>
    %c0_23 = arith.constant 0 : index
    %c0_24 = arith.constant 0 : index
    %c0_25 = arith.constant 0 : index
    %30 = vector.load %arg9[%c0_23, %c0_24, %c0_25] : memref<1x512x128xf32, #tpu.memory_space<vmem>>, vector<1x512x128xf32>
    %31 = vector.shape_cast %30 : vector<1x512x128xf32> to vector<512x128xf32>
    %32 = vector.shape_cast %29 : vector<512x128xf32> to vector<1x512x128xf32>
    tpu.vector_store %arg9[%c0_23, %c0_24, %c0_25], %32 {strides = array<i32>} : memref<1x512x128xf32, #tpu.memory_space<vmem>>, vector<1x512x128xf32>,
    return
  }
  func.func @transform_0(%arg0: i32) -> (i32, i32, i32) {
    %c0_i32 = arith.constant 0 : i32
    %c0_i32_0 = arith.constant 0 : i32
    %c0_i32_1 = arith.constant 0 : i32
    return %arg0, %c0_i32, %c0_i32_0 : i32, i32, i32
  }
  func.func @transform_1(%arg0: i32) -> (i32, i32) {
    %c0_i32 = arith.constant 0 : i32
    %c0_i32_0 = arith.constant 0 : i32
    %c0_i32_1 = arith.constant 0 : i32
    return %c0_i32, %c0_i32_0 : i32, i32
  }
  func.func @transform_2(%arg0: i32) -> (i32, i32) {
    %c0_i32 = arith.constant 0 : i32
    %c0_i32_0 = arith.constant 0 : i32
    %c0_i32_1 = arith.constant 0 : i32
    return %c0_i32, %c0_i32_0 : i32, i32
  }
  func.func @transform_3(%arg0: i32) -> (i32, i32) {
    %c0_i32 = arith.constant 0 : i32
    %c0_i32_0 = arith.constant 0 : i32
    %c0_i32_1 = arith.constant 0 : i32
    return %c0_i32, %c0_i32_0 : i32, i32
  }
  func.func @transform_4(%arg0: i32) -> (i32, i32) {
    %c0_i32 = arith.constant 0 : i32
    %c0_i32_0 = arith.constant 0 : i32
    %c0_i32_1 = arith.constant 0 : i32
    return %c0_i32, %c0_i32_0 : i32, i32
  }
  func.func @transform_5(%arg0: i32) -> (i32, i32) {
    %c0_i32 = arith.constant 0 : i32
    %c0_i32_0 = arith.constant 0 : i32
    %c0_i32_1 = arith.constant 0 : i32
    return %c0_i32, %c0_i32_0 : i32, i32
  }
  func.func @transform_6(%arg0: i32) -> (i32, i32) {
    %c0_i32 = arith.constant 0 : i32
    %c0_i32_0 = arith.constant 0 : i32
    %c0_i32_1 = arith.constant 0 : i32
    return %c0_i32, %c0_i32_0 : i32, i32
  }
  func.func @transform_7(%arg0: i32) -> (i32, i32) {
    %c0_i32 = arith.constant 0 : i32
    %c0_i32_0 = arith.constant 0 : i32
    %c0_i32_1 = arith.constant 0 : i32
    return %c0_i32, %c0_i32_0 : i32, i32
  }
  func.func @transform_8(%arg0: i32) -> (i32, i32, i32) {
    %c0_i32 = arith.constant 0 : i32
    %c0_i32_0 = arith.constant 0 : i32
    %c0_i32_1 = arith.constant 0 : i32
    return %arg0, %c0_i32, %c0_i32_0 : i32, i32, i32
  }
}

</mosaic_0001>

<bundles_post_ra>
// kernel: tpu_custom_call.1
= control target key start
LH: loop header
LB: loop body
LE: loop exit
PB: predicated region body
PF: predicated region fallthrough
CT: control target
= control target key end

     0   :  { %s8154_s0 = inlined_call_operand.hbm [shape: bf16[2,512,128], index: 0, kind: input, shape index: {}]   ;;  %s8155_s1 = inlined_call_operand.hbm [shape: bf16[512,512], index: 1, kind: input, shape index: {}]   ;;  %s8156_s2 = inlined_call_operand.hbm [shape: bf16[128,256], index: 2, kind: input, shape index: {}]   ;;  %s8157_s3 = inlined_call_operand.hbm [shape: bf16[256,256], index: 3, kind: input, shape index: {}]   ;;  %s8158_s4 = inlined_call_operand.hbm [shape: bf16[256,128], index: 4, kind: input, shape index: {}]   ;;  %s8159_s5 = inlined_call_operand.vmem [shape: f32[1,256], index: 5, kind: input, shape index: {}]   ;;  %s8160_s6 = inlined_call_operand.vmem [shape: f32[1,256], index: 6, kind: input, shape index: {}]   ;;  %s8161_s7 = inlined_call_operand.vmem [shape: f32[1,128], index: 7, kind: input, shape index: {}]   ;;  %s8162_s8 = inlined_call_operand.hbm [shape: f32[2,512,128], index: 8, kind: output, shape index: {}]  }
   0x1   :  { %8169 = sst [smem:[#allocation18_spill]] %s8162_s8 }
   0x2   :  { %13 = vsyncpa [#allocation3], 0 }
   0x3   :  { %15 = vsyncpa [#allocation3 + $0x1], 0 }
   0x4   :  { %16 = vsyncpa [#allocation6], 0 }
   0x5   :  { %17 = vsyncpa [#allocation9], 0 }
   0x6   :  { %18 = vsyncpa [#allocation4], 0 }
   0x7   :  { %20 = vsyncpa [#allocation4 + $0x1], 0  ;;  %s7211_s27 = smov 0   ;;  %s7213_s28 = smov 0  }
   0x8   :  { %s7215_s29 = smov 0   ;;  %s7217_s30 = smov 0  }
   0x9 LB: > { %8170 = sst [smem:[#allocation16_spill]] %s7137_s27  ;;  %s7232_s9 = sadd.s32 4294967295, %s7149_s30   ;;  %s7149_s30 = sphi %s7217_s30, %s8195_s30   ;;  %s7145_s29 = sphi %s7215_s29, %s8194_s29   ;;  %s7141_s28 = sphi %s7213_s28, %s8193_s28   ;;  %s7137_s27 = sphi %s7211_s27, %s8192_s27  }
   0xa   : > { %s5412_s10 = sadd.s32 4294967294, %s7149_s30   ;;  %p46_p0 = scmp.ne.s32.totalorder %s7141_s28, %s7137_s27 }
   0xb   : > { %p8163_p1 = scmp.eq.s32.totalorder %s7232_s9, 0  ;;  %p223_p3 = scmp.eq.s32.totalorder %s5412_s10, 1 }
   0xc   : > { %p5413_p5 = scmp.ge.s32.totalorder %s7149_s30, 1  ;;  %p230_p7 = scmp.lt.s32.totalorder %s7149_s30, 3 }
   0xd   : > { %p7241_p4 = por %p8163_p1, %p46_p0  ;;  %p7246_p6 = por %p223_p3, %p46_p0 }
   0xe   : > { %p7251_p8 = pnand %p5413_p5, %p230_p7  ;;  %s7151_s14 = smov [#allocation5]  }
   0xf   : > { %s8171_s11 = scalar_select %p7241_p4, 1, 0 }
  0x10   : > { %s8172_s12 = scalar_select %p7246_p6, 1, 0 }
  0x11   : > { %s8174_s13 = scalar_select %p7251_p8, 1, 0 }
  0x12   : > { %8173 = sst [smem:[#allocation17_spill]] %s8172_s12  ;;  %s242_s15 = sshll.u32 %s7151_s14, 4  ;;  %s243_s15 = int_to_ptr.vmem [resolvable:$true] %s242_s15 }
  0x13   : > { %p6289_p9 = pneg %p7251_p8  ;;  %s7152_s17 = smov [#allocation8]  }
  0x14   : > { %s268_s18 = sshll.u32 %s7152_s17, 4  ;;  %s6933_s21 = scalar_lea.hbm %s8155_s1, 16384  ;;  %s269_s18 = int_to_ptr.vmem [resolvable:$true] %s268_s18 }
  0x15   : > { %p7260_p11 = pnand %p6289_p9, %p8163_p1  ;;  %p6934_p12 = scmp.ne.s32.totalorder %s8155_s1, %s6933_s21 }
  0x16   : > { %p6940_p5 = scmp.lt.u32.totalorder %s6933_s21, %s8155_s1 }
  0x17   : > { %p7272_p13 = pneg %p7260_p11 }
  0x19   : > { %p6936_p0 = pnand %p7272_p13, %p6934_p12 }
  0x1b   : > { %p6937_p3 = pneg %p6936_p0 }
  0x1d   : > { %p6942_p7 = pnand %p6940_p5, %p6937_p3 }
  0x1f   : > { %6945 = shalt.err (!%p6942_p7)
}
  0x20   : > { %s6946_s10 = scalar_lea.vmem %s243_s15, 16384  ;;  %p6954_p2 = scmp.lt.s32.totalorder %s243_s15, %s243_s15 }
  0x21   : > { %p6947_p9 = scmp.ne.s32.totalorder %s243_s15, %s6946_s10  ;;  %p6955_p6 = scmp.lt.s32.totalorder %s6946_s10, %s6946_s10 }
  0x23   : > { %p6949_p10 = pnand %p6947_p9, %p7272_p13  ;;  %p6956_p4 = por %p6955_p6, %p6954_p2 }
  0x25   : > { %p6950_p1 = pneg %p6949_p10 }
  0x27   : > { %p6957_p8 = pnand %p6956_p4, %p6950_p1 }
  0x29   : > { %6960 = shalt.err (!%p6957_p8)
}
  0x2a   : > { %s7153_s14 = smov 256   ;;  %s7154_s17 = smov 16  }
  0x2b   : > { %6292 = dma.hbm_to_vmem [thread:$0]  (!%p7260_p11), %s8155_s1, 16384, %s243_s15, [#allocation6], %s7153_s14, %s7153_s14, %s7154_s17  }
  0x2c   : > { %s7155_s21 = smov [#allocation7]   ;;  %s6961_s26 = scalar_lea.hbm %s8157_s3, 4096 }
  0x2d   : > { %s255_s22 = sshll.u32 %s7155_s21, 4  ;;  %p6962_p1 = scmp.ne.s32.totalorder %s8157_s3, %s6961_s26  ;;  %s256_s22 = int_to_ptr.vmem [resolvable:$true] %s255_s22 }
  0x2e   : > { %p6968_p6 = scmp.lt.u32.totalorder %s6961_s26, %s8157_s3 }
  0x2f   : > { %p6964_p2 = pnand %p6962_p1, %p7272_p13 }
  0x31   : > { %p6965_p4 = pneg %p6964_p2 }
  0x33   : > { %p6970_p8 = pnand %p6968_p6, %p6965_p4 }
  0x35   : > { %6973 = shalt.err (!%p6970_p8)
}
  0x36   : > { %s6974_s15 = scalar_lea.vmem %s269_s18, 4096  ;;  %p6982_p3 = scmp.lt.s32.totalorder %s269_s18, %s269_s18 }
  0x37   : > { %p6975_p10 = scmp.ne.s32.totalorder %s269_s18, %s6974_s15  ;;  %p6983_p5 = scmp.lt.s32.totalorder %s6974_s15, %s6974_s15 }
  0x39   : > { %p6977_p12 = pnand %p6975_p10, %p7272_p13  ;;  %p6984_p7 = por %p6983_p5, %p6982_p3 }
  0x3b   : > { %p6978_p0 = pneg %p6977_p12 }
  0x3d   : > { %p6985_p9 = pnand %p6984_p7, %p6978_p0 }
  0x3f   : > { %6988 = shalt.err (!%p6985_p9)
}
  0x40   : > { %s7156_s12 = smov 128   ;;  %s7157_s14 = smov 8  }
  0x41   : > { %6298 = dma.hbm_to_vmem [thread:$0]  (!%p7260_p11), %s8157_s3, 4096, %s269_s18, [#allocation9], %s7156_s12, %s7156_s12, %s7157_s14  }
  0x42   : > { %s6989_s20 = scalar_lea.hbm %s8156_s2, 2048 }
  0x43   : > { %p6990_p1 = scmp.ne.s32.totalorder %s8156_s2, %s6989_s20  ;;  %p6996_p6 = scmp.lt.u32.totalorder %s6989_s20, %s8156_s2 }
  0x45   : > { %p6992_p2 = pnand %p6990_p1, %p7272_p13 }
  0x47   : > { %p6993_p4 = pneg %p6992_p2 }
  0x49   : > { %p6998_p8 = pnand %p6996_p6, %p6993_p4 }
  0x4b   : > { %7001 = shalt.err (!%p6998_p8)
}
  0x4c   : > { %s7002_s10 = scalar_lea.vmem %s256_s22, 2048  ;;  %p7010_p3 = scmp.lt.s32.totalorder %s256_s22, %s256_s22 }
  0x4d   : > { %p7003_p10 = scmp.ne.s32.totalorder %s256_s22, %s7002_s10  ;;  %p7011_p5 = scmp.lt.s32.totalorder %s7002_s10, %s7002_s10 }
  0x4f   : > { %p7005_p12 = pnand %p7003_p10, %p7272_p13  ;;  %p7012_p7 = por %p7011_p5, %p7010_p3 }
  0x51   : > { %p7006_p0 = pneg %p7005_p12 }
  0x53   : > { %p7013_p9 = pnand %p7012_p7, %p7006_p0 }
  0x55   : > { %7016 = shalt.err (!%p7013_p9)
}
  0x56   : > { %6295 = dma.hbm_to_vmem [thread:$0]  (!%p7260_p11), %s8156_s2, 2048, %s256_s22, [#allocation6], %s7156_s12, %s7156_s12, %s7157_s14  }
  0x57   : > { %s7158_s8 = smov [#allocation10]   ;;  %s7017_s20 = scalar_lea.hbm %s8158_s4, 2048 }
  0x58   : > { %s281_s27 = sshll.u32 %s7158_s8, 4  ;;  %p7018_p1 = scmp.ne.s32.totalorder %s8158_s4, %s7017_s20  ;;  %s282_s27 = int_to_ptr.vmem [resolvable:$true] %s281_s27 }
  0x59   : > { %p7024_p6 = scmp.lt.u32.totalorder %s7017_s20, %s8158_s4 }
  0x5a   : > { %p7020_p2 = pnand %p7018_p1, %p7272_p13 }
  0x5c   : > { %p7021_p4 = pneg %p7020_p2 }
  0x5e   : > { %p7026_p8 = pnand %p7024_p6, %p7021_p4 }
  0x60   : > { %7029 = shalt.err (!%p7026_p8)
}
  0x61   : > { %s7030_s22 = scalar_lea.vmem %s282_s27, 2048  ;;  %p7038_p3 = scmp.lt.s32.totalorder %s282_s27, %s282_s27 }
  0x62   : > { %p7031_p10 = scmp.ne.s32.totalorder %s282_s27, %s7030_s22  ;;  %p7039_p5 = scmp.lt.s32.totalorder %s7030_s22, %s7030_s22 }
  0x64   : > { %p7033_p12 = pnand %p7031_p10, %p7272_p13  ;;  %p7040_p7 = por %p7039_p5, %p7038_p3 }
  0x66   : > { %p7034_p0 = pneg %p7033_p12 }
  0x68   : > { %p7041_p9 = pnand %p7040_p7, %p7034_p0 }
  0x6a   : > { %7044 = shalt.err (!%p7041_p9)
}
  0x6b   : > { %s7159_s12 = smov 64   ;;  %s7160_s24 = smov 4  }
  0x6c   : > { %6301 = dma.hbm_to_vmem [thread:$0]  (!%p7260_p11), %s8158_s4, 2048, %s282_s27, [#allocation9], %s7159_s12, %s7159_s12, %s7160_s24  }
  0x6d   : > { %s7346_s18 = sadd.s32 1, %s7149_s30   ;;  %s33_s8 = sadd.s32 1, %s7145_s29 }
  0x6e   : > { %s30_s15 = ssub.s32 %s7149_s30, %s7346_s18  ;;  %p40_p1 = scmp.ne.s32.totalorder %s7145_s29, %s7141_s28 }
  0x6f   : > { %p31_p13 = scmp.eq.s32.totalorder %s30_s15, 0  ;;  %p41_p2 = scmp.eq.s32.totalorder %s7149_s30, 0 }
  0x70   : > { %p8177_p6 = scmp.eq.s32.totalorder %s7232_s9, 1  ;;  %p6314_p10 = scmp.lt.s32.totalorder %s7149_s30, 2 }
  0x71   : > { %s7355_s17 = scalar_select %p31_p13, %s7145_s29, %s33_s8  }
  0x72   : > { %p42_p4 = por %p41_p2, %p40_p1  ;;  %p7359_p8 = por %p8177_p6, %p40_p1 }
  0x73   : > { %s304_s19 = sand.u32 1, %s7145_s29   ;;  %s5659_s27 = sshll.u32 %s7149_s30, 12 }
  0x74   : > { %s5419_s20 = sshll.u32 %s304_s19, 8  ;;  %s7369_s25 = scalar_lea.hbm %s8154_s0, %s5659_s27 }
  0x75   : > { %s308_s26 = scalar_lea.vmem [#allocation2], %s5419_s20  ;;  %p7373_p11 = pnand %p6314_p10, %p42_p4 }
  0x76   : > { %s315_s22 = sshll.u32 %s308_s26, 4  ;;  %s7377_s10 = scalar_lea.sflag [#allocation3], %s304_s19  ;;  %s7371_s22 = int_to_ptr.vmem [resolvable:$true] %s315_s22 }
  0x77   : > { %s7045_s15 = scalar_lea.hbm %s7369_s25, 4096  ;;  %p7047_p0 = pneg %p7373_p11 }
  0x78   : > { %p7046_p12 = scmp.ne.s32.totalorder %s7369_s25, %s7045_s15  ;;  %s7050_s27 = scalar_lea.hbm %s8154_s0, 8192 }
  0x79   : > { %p7051_p7 = scmp.lt.u32.totalorder %s7369_s25, %s8154_s0  ;;  %p7052_p9 = scmp.lt.u32.totalorder %s7050_s27, %s7045_s15 }
  0x7a   : > { %p7048_p3 = pnand %p7047_p0, %p7046_p12  ;;  %p7054_p1 = scmp.lt.u32.totalorder %s7045_s15, %s7369_s25 }
  0x7b   : > { %p7053_p13 = por %p7052_p9, %p7051_p7 }
  0x7c   : > { %p7049_p5 = pneg %p7048_p3 }
  0x7d   : > { %p7055_p2 = por %p7054_p1, %p7053_p13 }
  0x7f   : > { %p7056_p4 = pnand %p7055_p2, %p7049_p5 }
  0x81   : > { %7059 = shalt.err (!%p7056_p4)
}
  0x82   : > { %s7060_s19 = scalar_lea.vmem %s7371_s22, 4096  ;;  %s7161_s26 = smov [#allocation2]  }
  0x83   : > { %p7061_p6 = scmp.ne.s32.totalorder %s7371_s22, %s7060_s19  ;;  %s7065_s8 = sshll.u32 %s7161_s26, 4  ;;  %s7066_s8 = int_to_ptr.vmem [resolvable:$false] %s7065_s8 }
  0x84   : > { %s7067_s20 = scalar_lea.vmem %s7066_s8, 8192  ;;  %p7068_p3 = scmp.lt.s32.totalorder %s7371_s22, %s7066_s8 }
  0x85   : > { %p7063_p10 = pnand %p7061_p6, %p7047_p0  ;;  %p7069_p7 = scmp.lt.s32.totalorder %s7067_s20, %s7060_s19 }
  0x87   : > { %p7064_p12 = pneg %p7063_p10  ;;  %p7070_p9 = por %p7069_p7, %p7068_p3 }
  0x89   : > { %p7071_p13 = pnand %p7070_p9, %p7064_p12 }
  0x8b   : > { %7074 = shalt.err (!%p7071_p13)
}
  0x8c   : > { %6305 = dma.hbm_to_vmem [thread:$0]  (!%p7373_p11), %s7369_s25, 4096, %s7371_s22, %s7377_s10, %s7159_s12, %s7159_s12, %s7160_s24  }
  0x8d   : > { %p8180_p0 = scmp.ne.s32.totalorder %s8174_s13, 0 }
  0x8e   : > { %s7411_s15 = sand.u32 (!%p8180_p0), 1, %s7141_s28   ;;  %p8181_p5 = scmp.ne.s32.totalorder (!%p8180_p0), %s8171_s11, 0 }
  0x8f   : > { %327 = sbr.rel (%p8180_p0) target bundleno = 2844 (0xb1c), region = 52  ;;  %s5423_s27 = sshll.u32 (!%p8180_p0), %s7411_s15, 8 }
  0x90   : > { %s330_s21 = scalar_lea.sflag (!%p8180_p0), [#allocation3], %s7411_s15  ;;  %s7415_s23 = scalar_lea.vmem (!%p8180_p0), [#allocation2], %s5423_s27 }
  0x96   : > { %7120 = dma.done.wait (%p8181_p5), %s330_s21, 4096  }
  0x97   : > { %7122 = vsyncadd (%p8181_p5), %s330_s21, 4294963200  ;;  %p8182_p11 = scmp.eq.s32.totalorder %s7232_s9, 0 }
  0x99   : > { %7124 = dma.done.wait (%p8182_p11), [#allocation6], 18432   ;;  %p8183_p1 = pmov %p8182_p11 }
  0x9b   : > { %7126 = vsyncadd (%p8183_p1), [#allocation6], 4294948864  ;;  %p8184_p2 = pmov %p8183_p1 }
  0x9c   : > { %p8185_p4 = pmov %p8183_p1 }
  0x9d   : > { %7128 = dma.done.wait (%p8184_p2), [#allocation9], 6144  }
  0x9e   : > { %7130 = vsyncadd (%p8185_p4), [#allocation9], 4294961152  ;;  %v7162_v0 = vmov 0   ;;  %v6365_v1 = vld [vmem:[%s7415_s23] sm:$0xff]   ;;  %v6366_v2 = vld [vmem:[%s7415_s23 + $0x8] sm:$0xff]   ;;  %s5428_s25 = sshll.u32 %s7411_s15, 9 }
  0x9f   : > { %1424 = vmatprep.subr.bf16.mxu0 %v7162_v0  ;;  %2157 = vmatprep.mubr.bf16.mxu1 %v7162_v0  ;;  %v6367_v3 = vld [vmem:[%s7415_s23 + $0x10] sm:$0xff]   ;;  %v6368_v4 = vld [vmem:[%s7415_s23 + $0x18] sm:$0xff]   ;;  %v6369_v5 = vld [vmem:[%s7415_s23 + $0x20] sm:$0xff]   ;;  %s7974_s10 = scalar_lea.vmem [#allocation11], %s5428_s25  ;;  %s5660_s19 = sshll.u32 %s7232_s9, 13 }
  0xa0   : > { %1425 = vmatpush1.bf16.msra.mxu0 %v6365_v1  ;;  %v6381_v6 = vld [vmem:[#allocation5 + $0x4] ss:$16 sps:$4 sm:$0xff]   ;;  %v6370_v7 = vld [vmem:[%s7415_s23 + $0x28] sm:$0xff]   ;;  %v6372_v9 = vld [vmem:[%s7415_s23 + $0x38] sm:$0xff]   ;;  %s5301_s26 = sshll.u32 %s7974_s10, 4  ;;  %s8186_s27 = sld [smem:[#allocation18_spill]]  ;;  %s8107_s26 = int_to_ptr.vmem [resolvable:$true] %s5301_s26 }
  0xa1   : > { %1426 = vmatprep.subr.bf16.mxu0 %v7162_v0  ;;  %1456 = vmatprep.mubr.bf16.mxu0 %v6381_v6  ;;  %v6371_v8 = vld [vmem:[%s7415_s23 + $0x30] sm:$0xff]   ;;  %v6373_v10 = vld [vmem:[%s7415_s23 + $0x40] sm:$0xff]   ;;  %v6374_v11 = vld [vmem:[%s7415_s23 + $0x48] sm:$0xff]   ;;  %s5288_s9 = scalar_lea.sflag [#allocation4], %s7411_s15  ;;  %s7075_s11 = scalar_lea.vmem %s8107_s26, 8192 }
  0xa2   : > { %v6375_v12 = vld [vmem:[%s7415_s23 + $0x50] sm:$0xff]   ;;  %v6376_v13 = vld [vmem:[%s7415_s23 + $0x58] sm:$0xff]   ;;  %v6377_v14 = vld [vmem:[%s7415_s23 + $0x60] sm:$0xff]   ;;  %p7076_p6 = scmp.ne.s32.totalorder %s8107_s26, %s7075_s11  ;;  %s7163_s13 = smov [#allocation11]  }
  0xa3   : > { %v6378_v15 = vld [vmem:[%s7415_s23 + $0x68] sm:$0xff]   ;;  %v6379_v16 = vld [vmem:[%s7415_s23 + $0x70] sm:$0xff]   ;;  %v6380_v17 = vld [vmem:[%s7415_s23 + $0x78] sm:$0xff]   ;;  %s7079_s12 = sshll.u32 %s7163_s13, 4  ;;  %s7080_s12 = int_to_ptr.vmem [resolvable:$false] %s7079_s12 }
  0xa4   : > { %1427 = vmatpush1.bf16.msra.mxu0 %v6366_v2  ;;  %v6383_v18 = vld [vmem:[#allocation5] ss:$16 sps:$4 sm:$0xff]   ;;  %v6384_v19 = vld [vmem:[#allocation5 + $0x24] ss:$16 sps:$4 sm:$0xff]   ;;  %v6439_v25 = vld [vmem:[%s7415_s23 + $0x88] sm:$0xff]   ;;  %p7077_p10 = pnand %p7076_p6, %p7359_p8  ;;  %s7081_s24 = scalar_lea.vmem %s7080_s12, 16384 }
  0xa5   : > { %1428 = vmatprep.subr.bf16.mxu0 %v7162_v0  ;;  %v6432_v20 = vld [vmem:[%s7415_s23 + $0x80] sm:$0xff]   ;;  %v6446_v30 = vld [vmem:[%s7415_s23 + $0x90] sm:$0xff]   ;;  %v6453_v35 = vld [vmem:[%s7415_s23 + $0x98] sm:$0xff]   ;;  %p7082_p3 = scmp.lt.s32.totalorder %s8107_s26, %s7080_s12  ;;  %p7083_p7 = scmp.lt.s32.totalorder %s7081_s24, %s7075_s11 }
  0xa6   : > { %v6386_v21 = vld [vmem:[#allocation5 + $0x20] ss:$16 sps:$4 sm:$0xff]   ;;  %v6387_v22 = vld [vmem:[#allocation5 + $0x44] ss:$16 sps:$4 sm:$0xff]   ;;  %v6467_v45 = vld [vmem:[%s7415_s23 + $0xa8] sm:$0xff]   ;;  %s8187_s21 = smov %s8186_s27  ;;  %p7078_p12 = pneg %p7077_p10 }
  0xa7   : > { %v6389_v23 = vld [vmem:[#allocation5 + $0x40] ss:$16 sps:$4 sm:$0xff]   ;;  %v6390_v24 = vld [vmem:[#allocation5 + $0x64] ss:$16 sps:$4 sm:$0xff]   ;;  %v6472_v49 = vld [vmem:[%s7415_s23 + $0xb8] sm:$0xff]   ;;  %p7084_p9 = por %p7083_p7, %p7082_p3 }
  0xa8   : > { %1429 = vmatpush1.bf16.msra.mxu0 %v6367_v3  ;;  %v6392_v26 = vld [vmem:[#allocation5 + $0x60] ss:$16 sps:$4 sm:$0xff]   ;;  %v6393_v27 = vld [vmem:[#allocation5 + $0x84] ss:$16 sps:$4 sm:$0xff]   ;;  %v6477_v53 = vld [vmem:[%s7415_s23 + $0xc8] sm:$0xff]  }
  0xa9   : > { %1430 = vmatprep.subr.bf16.mxu0 %v7162_v0  ;;  %v6395_v28 = vld [vmem:[#allocation5 + $0x80] ss:$16 sps:$4 sm:$0xff]   ;;  %v6396_v29 = vld [vmem:[#allocation5 + $0xa4] ss:$16 sps:$4 sm:$0xff]   ;;  %v6482_v57 = vld [vmem:[%s7415_s23 + $0xd8] sm:$0xff]   ;;  %p7085_p13 = pnand %p7084_p9, %p7078_p12 }
  0xaa   : > { %v6398_v31 = vld [vmem:[#allocation5 + $0xa0] ss:$16 sps:$4 sm:$0xff]   ;;  %v6399_v32 = vld [vmem:[#allocation5 + $0xc4] ss:$16 sps:$4 sm:$0xff]   ;;  %v6487_v61 = vld [vmem:[%s7415_s23 + $0xe8] sm:$0xff]  }
  0xab   : > { %v6401_v33 = vld [vmem:[#allocation5 + $0xc0] ss:$16 sps:$4 sm:$0xff]   ;;  %v6402_v34 = vld [vmem:[#allocation5 + $0xe4] ss:$16 sps:$4 sm:$0xff]   ;;  %v6492_v2 = vld [vmem:[%s7415_s23 + $0xf8] sm:$0xff]  }
  0xac   : > { %1431 = vmatpush1.bf16.msra.mxu0 %v6368_v4  ;;  %v6404_v36 = vld [vmem:[#allocation5 + $0xe0] ss:$16 sps:$4 sm:$0xff]   ;;  %v6405_v37 = vld [vmem:[#allocation5 + $0x104] ss:$16 sps:$4 sm:$0xff]  }
  0xad   : > { %1432 = vmatprep.subr.bf16.mxu0 %v7162_v0  ;;  %v6407_v38 = vld [vmem:[#allocation5 + $0x100] ss:$16 sps:$4 sm:$0xff]   ;;  %v6408_v39 = vld [vmem:[#allocation5 + $0x124] ss:$16 sps:$4 sm:$0xff]  }
  0xae   : > { %v6460_v40 = vld [vmem:[%s7415_s23 + $0xa0] sm:$0xff]   ;;  %v6471_v48 = vld [vmem:[%s7415_s23 + $0xb0] sm:$0xff]  }
  0xaf   : > { %v6410_v41 = vld [vmem:[#allocation5 + $0x120] ss:$16 sps:$4 sm:$0xff]   ;;  %v6411_v42 = vld [vmem:[#allocation5 + $0x144] ss:$16 sps:$4 sm:$0xff]  }
  0xb0   : > { %1433 = vmatpush1.bf16.msra.mxu0 %v6369_v5  ;;  %v6413_v43 = vld [vmem:[#allocation5 + $0x140] ss:$16 sps:$4 sm:$0xff]   ;;  %v6414_v44 = vld [vmem:[#allocation5 + $0x164] ss:$16 sps:$4 sm:$0xff]  }
  0xb1   : > { %1434 = vmatprep.subr.bf16.mxu0 %v7162_v0  ;;  %v6416_v46 = vld [vmem:[#allocation5 + $0x160] ss:$16 sps:$4 sm:$0xff]   ;;  %v6417_v47 = vld [vmem:[#allocation5 + $0x184] ss:$16 sps:$4 sm:$0xff]  }
  0xb2   : > { %v6419_v50 = vld [vmem:[#allocation5 + $0x180] ss:$16 sps:$4 sm:$0xff]   ;;  %v6420_v51 = vld [vmem:[#allocation5 + $0x1a4] ss:$16 sps:$4 sm:$0xff]  }
  0xb3   : > { %v6476_v52 = vld [vmem:[%s7415_s23 + $0xc0] sm:$0xff]   ;;  %v6481_v56 = vld [vmem:[%s7415_s23 + $0xd0] sm:$0xff]  }
  0xb4   : > { %1435 = vmatpush1.bf16.msra.mxu0 %v6370_v7  ;;  %v6422_v54 = vld [vmem:[#allocation5 + $0x1a0] ss:$16 sps:$4 sm:$0xff]   ;;  %v6423_v55 = vld [vmem:[#allocation5 + $0x1c4] ss:$16 sps:$4 sm:$0xff]  }
  0xb5   : > { %1436 = vmatprep.subr.bf16.mxu0 %v7162_v0  ;;  %v6425_v58 = vld [vmem:[#allocation5 + $0x1c0] ss:$16 sps:$4 sm:$0xff]   ;;  %v6426_v59 = vld [vmem:[#allocation5 + $0x1e4] ss:$16 sps:$4 sm:$0xff]  }
  0xb6   : > { %v6486_v60 = vld [vmem:[%s7415_s23 + $0xe0] sm:$0xff]   ;;  %v6491_v1 = vld [vmem:[%s7415_s23 + $0xf0] sm:$0xff]   ;;  %s8105_s23 = scalar_lea.hbm %s8186_s27, %s5660_s19 }
  0xb7   : > { %v6428_v62 = vld [vmem:[#allocation5 + $0x1e0] ss:$16 sps:$4 sm:$0xff]   ;;  %v6429_v63 = vld [vmem:[#allocation5 + $0x204] ss:$16 sps:$4 sm:$0xff]  }
  0xb8   : > { %1437 = vmatpush1.bf16.msra.mxu0 %v6371_v8  ;;  %v6431_v3 = vld [vmem:[#allocation5 + $0x200] ss:$16 sps:$4 sm:$0xff]   ;;  %v6433_v4 = vld [vmem:[#allocation5 + $0x224] ss:$16 sps:$4 sm:$0xff]  }
  0xb9   : > { %1438 = vmatprep.subr.bf16.mxu0 %v7162_v0  ;;  %v6435_v5 = vld [vmem:[#allocation5 + $0x220] ss:$16 sps:$4 sm:$0xff]   ;;  %v6436_v6 = vld [vmem:[#allocation5 + $0x244] ss:$16 sps:$4 sm:$0xff]  }
  0xba   : > { %v6438_v7 = vld [vmem:[#allocation5 + $0x240] ss:$16 sps:$4 sm:$0xff]   ;;  %v6440_v8 = vld [vmem:[#allocation5 + $0x264] ss:$16 sps:$4 sm:$0xff]  }
  0xbc   : > { %1439 = vmatpush1.bf16.msra.mxu0 %v6372_v9  ;;  %v6442_v9 = vld [vmem:[#allocation5 + $0x260] ss:$16 sps:$4 sm:$0xff]  }
  0xbd   : > { %1440 = vmatprep.subr.bf16.mxu0 %v7162_v0 }
  0xc0   : > { %1441 = vmatpush1.bf16.msra.mxu0 %v6373_v10  ;;  %v6443_v10 = vld [vmem:[#allocation5 + $0x284] ss:$16 sps:$4 sm:$0xff]  }
  0xc1   : > { %1442 = vmatprep.subr.bf16.mxu0 %v7162_v0 }
  0xc4   : > { %1443 = vmatpush1.bf16.msra.mxu0 %v6374_v11  ;;  %v6445_v11 = vld [vmem:[#allocation5 + $0x280] ss:$16 sps:$4 sm:$0xff]  }
  0xc5   : > { %1444 = vmatprep.subr.bf16.mxu0 %v7162_v0 }
  0xc8   : > { %1445 = vmatpush1.bf16.msra.mxu0 %v6375_v12  ;;  %v6447_v12 = vld [vmem:[#allocation5 + $0x2a4] ss:$16 sps:$4 sm:$0xff]  }
  0xc9   : > { %1446 = vmatprep.subr.bf16.mxu0 %v7162_v0 }
  0xcc   : > { %1447 = vmatpush1.bf16.msra.mxu0 %v6376_v13  ;;  %v6449_v13 = vld [vmem:[#allocation5 + $0x2a0] ss:$16 sps:$4 sm:$0xff]  }
  0xcd   : > { %1448 = vmatprep.subr.bf16.mxu0 %v7162_v0 }
  0xd0   : > { %1449 = vmatpush1.bf16.msra.mxu0 %v6377_v14  ;;  %v6450_v14 = vld [vmem:[#allocation5 + $0x2c4] ss:$16 sps:$4 sm:$0xff]  }
  0xd1   : > { %1450 = vmatprep.subr.bf16.mxu0 %v7162_v0 }
  0xd4   : > { %1451 = vmatpush1.bf16.msra.mxu0 %v6378_v15  ;;  %v6452_v15 = vld [vmem:[#allocation5 + $0x2c0] ss:$16 sps:$4 sm:$0xff]  }
  0xd5   : > { %1452 = vmatprep.subr.bf16.mxu0 %v7162_v0 }
  0xd8   : > { %1453 = vmatpush1.bf16.msra.mxu0 %v6379_v16  ;;  %v6454_v16 = vld [vmem:[#allocation5 + $0x2e4] ss:$16 sps:$4 sm:$0xff]  }
  0xd9   : > { %1454 = vmatprep.subr.bf16.mxu0 %v7162_v0 }
  0xdc   : > { %1455 = vmatpush1.bf16.msra.mxu0 %v6380_v17  ;;  %v6456_v17 = vld [vmem:[#allocation5 + $0x2e0] ss:$16 sps:$4 sm:$0xff]  }
  0xdd   : > { %1713 = vmatprep.subr.bf16.mxu0 %v7162_v0 }
  0xdf   : > { %1457 = vmatmul.mubr.bf16.vlgmr.msra.gmra.mrb[0].mxu0 %v6383_v18  ;;  %v6457_v18 = vld [vmem:[#allocation5 + $0x304] ss:$16 sps:$4 sm:$0xff]  }
  0xe0   : > { %1464 = vmatprep.mubr.bf16.mxu0 %v6384_v19  ;;  %1714 = vmatpush1.bf16.msra.mxu0 %v6432_v20  ;;  %v6459_v19 = vld [vmem:[#allocation5 + $0x300] ss:$16 sps:$4 sm:$0xff]   ;;  %v6461_v20 = vld [vmem:[#allocation5 + $0x324] ss:$16 sps:$4 sm:$0xff]  }
  0xe1   : > { %1715 = vmatprep.subr.bf16.mxu0 %v7162_v0 }
  0xe4   : > { %1716 = vmatpush1.bf16.msra.mxu0 %v6439_v25  ;;  %v6470_v25 = vld [vmem:[#allocation5 + $0x360] ss:$16 sps:$4 sm:$0xff]  }
  0xe5   : > { %1717 = vmatprep.subr.bf16.mxu0 %v7162_v0 }
  0xe7   : > { %1465 = vmatmul.mubr.bf16.gmra.mrb[4].mxu0 %v6386_v21  ;;  %v6463_v21 = vld [vmem:[#allocation5 + $0x320] ss:$16 sps:$4 sm:$0xff]  }
  0xe8   : > { %1472 = vmatprep.mubr.bf16.mxu0 %v6387_v22  ;;  %1718 = vmatpush1.bf16.msra.mxu0 %v6446_v30  ;;  %v6464_v22 = vld [vmem:[#allocation5 + $0x344] ss:$16 sps:$4 sm:$0xff]  }
  0xe9   : > { %1719 = vmatprep.subr.bf16.mxu0 %v7162_v0  ;;  %v6483_v30 = vld [vmem:[#allocation5 + $0x3c4] ss:$16 sps:$4 sm:$0xff]  }
  0xec   : > { %1720 = vmatpush1.bf16.msra.mxu0 %v6453_v35  ;;  %v6493_v35 = vld [vmem:[#allocation5 + $0x8] ss:$16 sps:$4 sm:$0xff]  }
  0xed   : > { %1721 = vmatprep.subr.bf16.mxu0 %v7162_v0 }
  0xef   : > { %1473 = vmatmul.mubr.bf16.gmra.mrb[8].mxu0 %v6389_v23  ;;  %v6466_v23 = vld [vmem:[#allocation5 + $0x340] ss:$16 sps:$4 sm:$0xff]  }
  0xf0   : > { %1480 = vmatprep.mubr.bf16.mxu0 %v6390_v24  ;;  %1722 = vmatpush1.bf16.msra.mxu0 %v6460_v40  ;;  %v6468_v24 = vld [vmem:[#allocation5 + $0x364] ss:$16 sps:$4 sm:$0xff]   ;;  %v6502_v40 = vld [vmem:[#allocation5 + $0x6c] ss:$16 sps:$4 sm:$0xff]  }
  0xf1   : > { %1723 = vmatprep.subr.bf16.mxu0 %v7162_v0 }
  0xf4   : > { %1724 = vmatpush1.bf16.msra.mxu0 %v6467_v45  ;;  %v6510_v45 = vld [vmem:[#allocation5 + $0xa8] ss:$16 sps:$4 sm:$0xff]  }
  0xf5   : > { %1725 = vmatprep.subr.bf16.mxu0 %v7162_v0 }
  0xf7   : > { %1481 = vmatmul.mubr.bf16.gmra.mrb[12].mxu0 %v6392_v26  ;;  %v6473_v26 = vld [vmem:[#allocation5 + $0x384] ss:$16 sps:$4 sm:$0xff]  }
  0xf8   : > { %1488 = vmatprep.mubr.bf16.mxu0 %v6393_v27  ;;  %1726 = vmatpush1.bf16.msra.mxu0 %v6471_v48  ;;  %v6475_v27 = vld [vmem:[#allocation5 + $0x380] ss:$16 sps:$4 sm:$0xff]   ;;  %v6514_v48 = vld [vmem:[#allocation5 + $0xec] ss:$16 sps:$4 sm:$0xff]  }
  0xf9   : > { %1727 = vmatprep.subr.bf16.mxu0 %v7162_v0 }
  0xfc   : > { %1728 = vmatpush1.bf16.msra.mxu0 %v6472_v49  ;;  %v6516_v49 = vld [vmem:[#allocation5 + $0xe8] ss:$16 sps:$4 sm:$0xff]  }
  0xfd   : > { %1729 = vmatprep.subr.bf16.mxu0 %v7162_v0 }
  0xff   : > { %1489 = vmatmul.mubr.bf16.gmra.mrb[16].mxu0 %v6395_v28  ;;  %v6478_v28 = vld [vmem:[#allocation5 + $0x3a4] ss:$16 sps:$4 sm:$0xff]  }
 0x100   : > { %1496 = vmatprep.mubr.bf16.mxu0 %v6396_v29  ;;  %1730 = vmatpush1.bf16.msra.mxu0 %v6476_v52  ;;  %v6480_v29 = vld [vmem:[#allocation5 + $0x3a0] ss:$16 sps:$4 sm:$0xff]  }
 0x101   : > { %1731 = vmatprep.subr.bf16.mxu0 %v7162_v0  ;;  %v6567_v52 = vld [vmem:[#allocation7] ss:$8 sps:$4 sm:$0xff]  }
 0x104   : > { %1732 = vmatpush1.bf16.msra.mxu0 %v6477_v53  ;;  %v6568_v53 = vld [vmem:[#allocation7 + $0x14] ss:$8 sps:$4 sm:$0xff]  }
 0x105   : > { %1733 = vmatprep.subr.bf16.mxu0 %v7162_v0 }
 0x107   : > { %1497 = vmatmul.mubr.bf16.gmra.mrb[20].mxu0 %v6398_v31  ;;  %v6485_v31 = vld [vmem:[#allocation5 + $0x3c0] ss:$16 sps:$4 sm:$0xff]  }
 0x108   : > { %1504 = vmatprep.mubr.bf16.mxu0 %v6399_v32  ;;  %1734 = vmatpush1.bf16.msra.mxu0 %v6481_v56  ;;  %v6488_v32 = vld [vmem:[#allocation5 + $0x3e4] ss:$16 sps:$4 sm:$0xff]   ;;  %v6520_v56 = vld [vmem:[#allocation5 + $0x12c] ss:$16 sps:$4 sm:$0xff]  }
 0x109   : > { %1735 = vmatprep.subr.bf16.mxu0 %v7162_v0 }
 0x10c   : > { %1736 = vmatpush1.bf16.msra.mxu0 %v6482_v57  ;;  %v6574_v57 = vld [vmem:[#allocation7 + $0x24] ss:$8 sps:$4 sm:$0xff]  }
 0x10d   : > { %1737 = vmatprep.subr.bf16.mxu0 %v7162_v0 }
 0x10f   : > { %1505 = vmatmul.mubr.bf16.gmra.mrb[24].mxu0 %v6401_v33  ;;  %v6490_v33 = vld [vmem:[#allocation5 + $0x3e0] ss:$16 sps:$4 sm:$0xff]  }
 0x110   : > { %1512 = vmatprep.mubr.bf16.mxu0 %v6402_v34  ;;  %1738 = vmatpush1.bf16.msra.mxu0 %v6486_v60  ;;  %v6495_v34 = vld [vmem:[#allocation5 + $0xc] ss:$16 sps:$4 sm:$0xff]   ;;  %v6579_v60 = vld [vmem:[#allocation7 + $0x30] ss:$8 sps:$4 sm:$0xff]  }
 0x111   : > { %1739 = vmatprep.subr.bf16.mxu0 %v7162_v0 }
 0x114   : > { %1740 = vmatpush1.bf16.msra.mxu0 %v6487_v61  ;;  %v6522_v61 = vld [vmem:[#allocation5 + $0x128] ss:$16 sps:$4 sm:$0xff]  }
 0x115   : > { %1741 = vmatprep.subr.bf16.mxu0 %v7162_v0 }
 0x117   : > { %1513 = vmatmul.mubr.bf16.gmra.mrb[28].mxu0 %v6404_v36  ;;  %v6496_v36 = vld [vmem:[#allocation5 + $0x2c] ss:$16 sps:$4 sm:$0xff]  }
 0x118   : > { %1520 = vmatprep.mubr.bf16.mxu0 %v6405_v37  ;;  %1742 = vmatpush1.bf16.msra.mxu0 %v6491_v1  ;;  %v6498_v37 = vld [vmem:[#allocation5 + $0x28] ss:$16 sps:$4 sm:$0xff]  }
 0x119   : > { %1743 = vmatprep.subr.bf16.mxu0 %v7162_v0  ;;  %v6585_v1 = vld [vmem:[#allocation7 + $0x40] ss:$8 sps:$4 sm:$0xff]  }
 0x11c   : > { %1744 = vmatpush1.bf16.msra.mxu0 %v6492_v2  ;;  %v6586_v2 = vld [vmem:[#allocation7 + $0x54] ss:$8 sps:$4 sm:$0xff]  }
 0x11d   : > { %4318 = vmatprep.subr.bf16.mxu0 %v7162_v0 }
 0x11f   : > { %1521 = vmatmul.mubr.bf16.gmra.mrb[32].mxu0 %v6407_v38  ;;  %v6499_v38 = vld [vmem:[#allocation5 + $0x4c] ss:$16 sps:$4 sm:$0xff]  }
 0x120   : > { %1528 = vmatprep.mubr.bf16.mxu0 %v6408_v39  ;;  %v6501_v39 = vld [vmem:[#allocation5 + $0x48] ss:$16 sps:$4 sm:$0xff]  }
 0x127   : > { %1529 = vmatmul.mubr.bf16.gmra.mrb[36].mxu0 %v6410_v41  ;;  %v6504_v41 = vld [vmem:[#allocation5 + $0x68] ss:$16 sps:$4 sm:$0xff]  }
 0x128   : > { %1536 = vmatprep.mubr.bf16.mxu0 %v6411_v42  ;;  %v6505_v42 = vld [vmem:[#allocation5 + $0x8c] ss:$16 sps:$4 sm:$0xff]  }
 0x12f   : > { %1537 = vmatmul.mubr.bf16.gmra.mrb[40].mxu0 %v6413_v43  ;;  %v6507_v43 = vld [vmem:[#allocation5 + $0x88] ss:$16 sps:$4 sm:$0xff]  }
 0x130   : > { %1544 = vmatprep.mubr.bf16.mxu0 %v6414_v44  ;;  %v6508_v44 = vld [vmem:[#allocation5 + $0xac] ss:$16 sps:$4 sm:$0xff]  }
 0x137   : > { %1545 = vmatmul.mubr.bf16.gmra.mrb[44].mxu0 %v6416_v46  ;;  %v6511_v46 = vld [vmem:[#allocation5 + $0xcc] ss:$16 sps:$4 sm:$0xff]  }
 0x138   : > { %1552 = vmatprep.mubr.bf16.mxu0 %v6417_v47  ;;  %v6513_v47 = vld [vmem:[#allocation5 + $0xc8] ss:$16 sps:$4 sm:$0xff]  }
 0x13f   : > { %1553 = vmatmul.mubr.bf16.gmra.mrb[48].mxu0 %v6419_v50  ;;  %v6517_v50 = vld [vmem:[#allocation5 + $0x10c] ss:$16 sps:$4 sm:$0xff]  }
 0x140   : > { %1560 = vmatprep.mubr.bf16.mxu0 %v6420_v51  ;;  %v6565_v51 = vld [vmem:[#allocation7 + $0x4] ss:$8 sps:$4 sm:$0xff]  }
 0x141   : > { %2125 = vmatprep.subr.bf16.mxu1 %v6565_v51 }
 0x142   : > { %2126 = vmatpush1.bf16.msra.mxu1 %v6567_v52  ;;  %v6613_v52 = vld [vmem:[#allocation8] ss:$8 sps:$4 sm:$0xff]  }
 0x143   : > { %2127 = vmatprep.subr.bf16.mxu1 %v6568_v53  ;;  %v6615_v53 = vld [vmem:[#allocation8 + $0x4] ss:$8 sps:$4 sm:$0xff]  }
 0x147   : > { %1561 = vmatmul.mubr.bf16.gmra.mrb[52].mxu0 %v6422_v54  ;;  %v6570_v54 = vld [vmem:[#allocation7 + $0x10] ss:$8 sps:$4 sm:$0xff]  }
 0x148   : > { %1568 = vmatprep.mubr.bf16.mxu0 %v6423_v55  ;;  %v6519_v55 = vld [vmem:[#allocation5 + $0x108] ss:$16 sps:$4 sm:$0xff]   ;;  %2128 = vmatpush1.bf16.msra.mxu1 %v6570_v54 }
 0x149   : > { %2129 = vmatprep.subr.bf16.mxu1 %v6574_v57 }
 0x14f   : > { %1569 = vmatmul.mubr.bf16.gmra.mrb[56].mxu0 %v6425_v58  ;;  %v6576_v58 = vld [vmem:[#allocation7 + $0x20] ss:$8 sps:$4 sm:$0xff]  }
 0x150   : > { %1576 = vmatprep.mubr.bf16.mxu0 %v6426_v59  ;;  %v6577_v59 = vld [vmem:[#allocation7 + $0x34] ss:$8 sps:$4 sm:$0xff]   ;;  %2130 = vmatpush1.bf16.msra.mxu1 %v6576_v58 }
 0x151   : > { %2131 = vmatprep.subr.bf16.mxu1 %v6577_v59 }
 0x154   : > { %2132 = vmatpush1.bf16.msra.mxu1 %v6579_v60  ;;  %v6606_v60 = vld [vmem:[#allocation5 + $0x3a8] ss:$16 sps:$4 sm:$0xff]  }
 0x157   : > { %1577 = vmatmul.mubr.bf16.gmra.mrb[60].mxu0 %v6428_v62  ;;  %v6523_v62 = vld [vmem:[#allocation5 + $0x14c] ss:$16 sps:$4 sm:$0xff]  }
 0x158   : > { %1584 = vmatprep.mubr.bf16.mxu0 %v6429_v63  ;;  %v6583_v63 = vld [vmem:[#allocation7 + $0x44] ss:$8 sps:$4 sm:$0xff]  }
 0x159   : > { %2133 = vmatprep.subr.bf16.mxu1 %v6583_v63 }
 0x15a   : > { %2134 = vmatpush1.bf16.msra.mxu1 %v6585_v1 }
 0x15b   : > { %2135 = vmatprep.subr.bf16.mxu1 %v6586_v2 }
 0x15f   : > { %1585 = vmatmul.mubr.bf16.gmra.mrb[64].mxu0 %v6431_v3  ;;  %v6588_v3 = vld [vmem:[#allocation7 + $0x50] ss:$8 sps:$4 sm:$0xff]  }
 0x160   : > { %1592 = vmatprep.mubr.bf16.mxu0 %v6433_v4  ;;  %v6525_v4 = vld [vmem:[#allocation5 + $0x148] ss:$16 sps:$4 sm:$0xff]   ;;  %2136 = vmatpush1.bf16.msra.mxu1 %v6588_v3 }
 0x161   : > { %v6609_v3 = vld [vmem:[#allocation5 + $0x3c8] ss:$16 sps:$4 sm:$0xff]  }
 0x167   : > { %1593 = vmatmul.mubr.bf16.gmra.mrb[68].mxu0 %v6435_v5  ;;  %v6526_v5 = vld [vmem:[#allocation5 + $0x16c] ss:$16 sps:$4 sm:$0xff]  }
 0x168   : > { %1600 = vmatprep.mubr.bf16.mxu0 %v6436_v6  ;;  %v6592_v6 = vld [vmem:[#allocation7 + $0x64] ss:$8 sps:$4 sm:$0xff]  }
 0x169   : > { %2137 = vmatprep.subr.bf16.mxu1 %v6592_v6  ;;  %v6618_v6 = vld [vmem:[#allocation8 + $0x14] ss:$8 sps:$4 sm:$0xff]  }
 0x16f   : > { %1601 = vmatmul.mubr.bf16.gmra.mrb[72].mxu0 %v6438_v7  ;;  %v6594_v7 = vld [vmem:[#allocation7 + $0x60] ss:$8 sps:$4 sm:$0xff]  }
 0x170   : > { %1608 = vmatprep.mubr.bf16.mxu0 %v6440_v8  ;;  %2138 = vmatpush1.bf16.msra.mxu1 %v6594_v7  ;;  %v6595_v8 = vld [vmem:[#allocation7 + $0x74] ss:$8 sps:$4 sm:$0xff]  }
 0x171   : > { %2139 = vmatprep.subr.bf16.mxu1 %v6595_v8  ;;  %v6610_v8 = vld [vmem:[#allocation5 + $0x3ec] ss:$16 sps:$4 sm:$0xff]  }
 0x177   : > { %1609 = vmatmul.mubr.bf16.gmra.mrb[76].mxu0 %v6442_v9  ;;  %v6597_v9 = vld [vmem:[#allocation7 + $0x70] ss:$8 sps:$4 sm:$0xff]  }
 0x178   : > { %1616 = vmatprep.mubr.bf16.mxu0 %v6443_v10  ;;  %v6528_v10 = vld [vmem:[#allocation5 + $0x168] ss:$16 sps:$4 sm:$0xff]   ;;  %2140 = vmatpush1.bf16.msra.mxu1 %v6597_v9 }
 0x179   : > { %2863 = vmatprep.subr.bf16.mxu1 %v6615_v53  ;;  %v6630_v53 = vld [vmem:[#allocation8 + $0x54] ss:$8 sps:$4 sm:$0xff]  }
 0x17f   : > { %1617 = vmatmul.mubr.bf16.gmra.mrb[80].mxu0 %v6445_v11  ;;  %v6529_v11 = vld [vmem:[#allocation5 + $0x18c] ss:$16 sps:$4 sm:$0xff]  }
 0x180   : > { %1624 = vmatprep.mubr.bf16.mxu0 %v6447_v12  ;;  %v6531_v12 = vld [vmem:[#allocation5 + $0x188] ss:$16 sps:$4 sm:$0xff]  }
 0x187   : > { %1625 = vmatmul.mubr.bf16.gmra.mrb[84].mxu0 %v6449_v13  ;;  %v6532_v13 = vld [vmem:[#allocation5 + $0x1ac] ss:$16 sps:$4 sm:$0xff]  }
 0x188   : > { %1632 = vmatprep.mubr.bf16.mxu0 %v6450_v14  ;;  %v6534_v14 = vld [vmem:[#allocation5 + $0x1a8] ss:$16 sps:$4 sm:$0xff]  }
 0x18f   : > { %1633 = vmatmul.mubr.bf16.gmra.mrb[88].mxu0 %v6452_v15  ;;  %v6535_v15 = vld [vmem:[#allocation5 + $0x1cc] ss:$16 sps:$4 sm:$0xff]  }
 0x190   : > { %1640 = vmatprep.mubr.bf16.mxu0 %v6454_v16  ;;  %v6537_v16 = vld [vmem:[#allocation5 + $0x1c8] ss:$16 sps:$4 sm:$0xff]  }
 0x197   : > { %1641 = vmatmul.mubr.bf16.gmra.mrb[92].mxu0 %v6456_v17  ;;  %v6538_v17 = vld [vmem:[#allocation5 + $0x1ec] ss:$16 sps:$4 sm:$0xff]  }
 0x198   : > { %1648 = vmatprep.mubr.bf16.mxu0 %v6457_v18  ;;  %v6540_v18 = vld [vmem:[#allocation5 + $0x1e8] ss:$16 sps:$4 sm:$0xff]  }
 0x19f   : > { %1649 = vmatmul.mubr.bf16.gmra.mrb[96].mxu0 %v6459_v19  ;;  %v6541_v19 = vld [vmem:[#allocation5 + $0x20c] ss:$16 sps:$4 sm:$0xff]  }
 0x1a0   : > { %1656 = vmatprep.mubr.bf16.mxu0 %v6461_v20  ;;  %v6543_v20 = vld [vmem:[#allocation5 + $0x208] ss:$16 sps:$4 sm:$0xff]  }
 0x1a7   : > { %1657 = vmatmul.mubr.bf16.gmra.mrb[100].mxu0 %v6463_v21  ;;  %v6544_v21 = vld [vmem:[#allocation5 + $0x22c] ss:$16 sps:$4 sm:$0xff]  }
 0x1a8   : > { %1664 = vmatprep.mubr.bf16.mxu0 %v6464_v22  ;;  %v6546_v22 = vld [vmem:[#allocation5 + $0x228] ss:$16 sps:$4 sm:$0xff]  }
 0x1af   : > { %1665 = vmatmul.mubr.bf16.gmra.mrb[104].mxu0 %v6466_v23  ;;  %v6547_v23 = vld [vmem:[#allocation5 + $0x24c] ss:$16 sps:$4 sm:$0xff]  }
 0x1b0   : > { %1672 = vmatprep.mubr.bf16.mxu0 %v6468_v24  ;;  %v6549_v24 = vld [vmem:[#allocation5 + $0x248] ss:$16 sps:$4 sm:$0xff]  }
 0x1b7   : > { %1673 = vmatmul.mubr.bf16.gmra.mrb[108].mxu0 %v6470_v25  ;;  %v6550_v25 = vld [vmem:[#allocation5 + $0x26c] ss:$16 sps:$4 sm:$0xff]  }
 0x1b8   : > { %1680 = vmatprep.mubr.bf16.mxu0 %v6473_v26  ;;  %v6552_v26 = vld [vmem:[#allocation5 + $0x268] ss:$16 sps:$4 sm:$0xff]  }
 0x1bf   : > { %1681 = vmatmul.mubr.bf16.gmra.mrb[112].mxu0 %v6475_v27  ;;  %v6553_v27 = vld [vmem:[#allocation5 + $0x28c] ss:$16 sps:$4 sm:$0xff]  }
 0x1c0   : > { %1688 = vmatprep.mubr.bf16.mxu0 %v6478_v28  ;;  %v6555_v28 = vld [vmem:[#allocation5 + $0x288] ss:$16 sps:$4 sm:$0xff]  }
 0x1c7   : > { %1689 = vmatmul.mubr.bf16.gmra.mrb[116].mxu0 %v6480_v29  ;;  %v6556_v29 = vld [vmem:[#allocation5 + $0x2ac] ss:$16 sps:$4 sm:$0xff]  }
 0x1c8   : > { %1696 = vmatprep.mubr.bf16.mxu0 %v6483_v30  ;;  %v6558_v30 = vld [vmem:[#allocation5 + $0x2a8] ss:$16 sps:$4 sm:$0xff]  }
 0x1cf   : > { %1697 = vmatmul.mubr.bf16.gmra.mrb[120].mxu0 %v6485_v31  ;;  %v6559_v31 = vld [vmem:[#allocation5 + $0x2cc] ss:$16 sps:$4 sm:$0xff]  }
 0x1d0   : > { %1704 = vmatprep.mubr.bf16.mxu0 %v6488_v32  ;;  %v6561_v32 = vld [vmem:[#allocation5 + $0x2c8] ss:$16 sps:$4 sm:$0xff]  }
 0x1d7   : > { %1705 = vmatmul.mubr.bf16.gmra.mrb[124].mxu0 %v6490_v33  ;;  %v6562_v33 = vld [vmem:[#allocation5 + $0x2ec] ss:$16 sps:$4 sm:$0xff]  }
 0x1d8   : > { %1745 = vmatprep.mubr.bf16.mxu0 %v6495_v34  ;;  %v6564_v34 = vld [vmem:[#allocation5 + $0x2e8] ss:$16 sps:$4 sm:$0xff]  }
 0x1df   : > { %1746 = vmatmul.mubr.bf16.vlgmr.msra.gmra.mrb[0].mxu0 %v6493_v35  ;;  %v6571_v35 = vld [vmem:[#allocation5 + $0x30c] ss:$16 sps:$4 sm:$0xff]  }
 0x1e0   : > { %1753 = vmatprep.mubr.bf16.mxu0 %v6496_v36  ;;  %v6573_v36 = vld [vmem:[#allocation5 + $0x308] ss:$16 sps:$4 sm:$0xff]  }
 0x1e7   : > { %1754 = vmatmul.mubr.bf16.gmra.mrb[4].mxu0 %v6498_v37  ;;  %v6580_v37 = vld [vmem:[#allocation5 + $0x32c] ss:$16 sps:$4 sm:$0xff]  }
 0x1e8   : > { %1761 = vmatprep.mubr.bf16.mxu0 %v6499_v38  ;;  %v6582_v38 = vld [vmem:[#allocation5 + $0x328] ss:$16 sps:$4 sm:$0xff]  }
 0x1ef   : > { %1762 = vmatmul.mubr.bf16.gmra.mrb[8].mxu0 %v6501_v39  ;;  %v6589_v39 = vld [vmem:[#allocation5 + $0x34c] ss:$16 sps:$4 sm:$0xff]  }
 0x1f0   : > { %1769 = vmatprep.mubr.bf16.mxu0 %v6502_v40  ;;  %v6591_v40 = vld [vmem:[#allocation5 + $0x348] ss:$16 sps:$4 sm:$0xff]  }
 0x1f7   : > { %1770 = vmatmul.mubr.bf16.gmra.mrb[12].mxu0 %v6504_v41  ;;  %v6598_v41 = vld [vmem:[#allocation5 + $0x36c] ss:$16 sps:$4 sm:$0xff]  }
 0x1f8   : > { %1777 = vmatprep.mubr.bf16.mxu0 %v6505_v42 }
 0x1ff   : > { %1778 = vmatmul.mubr.bf16.gmra.mrb[16].mxu0 %v6507_v43 }
 0x200   : > { %1785 = vmatprep.mubr.bf16.mxu0 %v6508_v44  ;;  %v6600_v44 = vld [vmem:[#allocation5 + $0x368] ss:$16 sps:$4 sm:$0xff]  }
 0x207   : > { %1786 = vmatmul.mubr.bf16.gmra.mrb[20].mxu0 %v6510_v45 }
 0x208   : > { %1793 = vmatprep.mubr.bf16.mxu0 %v6511_v46  ;;  %v6601_v46 = vld [vmem:[#allocation5 + $0x38c] ss:$16 sps:$4 sm:$0xff]  }
 0x20f   : > { %1794 = vmatmul.mubr.bf16.gmra.mrb[24].mxu0 %v6513_v47 }
 0x210   : > { %1801 = vmatprep.mubr.bf16.mxu0 %v6514_v48 }
 0x217   : > { %1802 = vmatmul.mubr.bf16.gmra.mrb[28].mxu0 %v6516_v49 }
 0x218   : > { %1809 = vmatprep.mubr.bf16.mxu0 %v6517_v50  ;;  %v6603_v50 = vld [vmem:[#allocation5 + $0x388] ss:$16 sps:$4 sm:$0xff]  }
 0x21f   : > { %1810 = vmatmul.mubr.bf16.gmra.mrb[32].mxu0 %v6519_v55  ;;  %v6604_v55 = vld [vmem:[#allocation5 + $0x3ac] ss:$16 sps:$4 sm:$0xff]  }
 0x220   : > { %1817 = vmatprep.mubr.bf16.mxu0 %v6520_v56 }
 0x227   : > { %1818 = vmatmul.mubr.bf16.gmra.mrb[36].mxu0 %v6522_v61 }
 0x228   : > { %1825 = vmatprep.mubr.bf16.mxu0 %v6523_v62  ;;  %v6607_v62 = vld [vmem:[#allocation5 + $0x3cc] ss:$16 sps:$4 sm:$0xff]  }
 0x22f   : > { %1826 = vmatmul.mubr.bf16.gmra.mrb[40].mxu0 %v6525_v4 }
 0x230   : > { %1833 = vmatprep.mubr.bf16.mxu0 %v6526_v5  ;;  %v6616_v5 = vld [vmem:[#allocation8 + $0x10] ss:$8 sps:$4 sm:$0xff]  }
 0x237   : > { %1834 = vmatmul.mubr.bf16.gmra.mrb[44].mxu0 %v6528_v10 }
 0x238   : > { %1841 = vmatprep.mubr.bf16.mxu0 %v6529_v11 }
 0x23f   : > { %1842 = vmatmul.mubr.bf16.gmra.mrb[48].mxu0 %v6531_v12 }
 0x240   : > { %1849 = vmatprep.mubr.bf16.mxu0 %v6532_v13  ;;  %v6612_v13 = vld [vmem:[#allocation5 + $0x3e8] ss:$16 sps:$4 sm:$0xff]  }
 0x247   : > { %1850 = vmatmul.mubr.bf16.gmra.mrb[52].mxu0 %v6534_v14 }
 0x248   : > { %1857 = vmatprep.mubr.bf16.mxu0 %v6535_v15 }
 0x24f   : > { %1858 = vmatmul.mubr.bf16.gmra.mrb[56].mxu0 %v6537_v16 }
 0x250   : > { %1865 = vmatprep.mubr.bf16.mxu0 %v6538_v17 }
 0x257   : > { %1866 = vmatmul.mubr.bf16.gmra.mrb[60].mxu0 %v6540_v18 }
 0x258   : > { %1873 = vmatprep.mubr.bf16.mxu0 %v6541_v19  ;;  %v6619_v19 = vld [vmem:[#allocation8 + $0x20] ss:$8 sps:$4 sm:$0xff]  }
 0x25f   : > { %1874 = vmatmul.mubr.bf16.gmra.mrb[64].mxu0 %v6543_v20  ;;  %v6621_v20 = vld [vmem:[#allocation8 + $0x24] ss:$8 sps:$4 sm:$0xff]  }
 0x260   : > { %1881 = vmatprep.mubr.bf16.mxu0 %v6544_v21 }
 0x267   : > { %1882 = vmatmul.mubr.bf16.gmra.mrb[68].mxu0 %v6546_v22 }
 0x268   : > { %1889 = vmatprep.mubr.bf16.mxu0 %v6547_v23 }
 0x26f   : > { %1890 = vmatmul.mubr.bf16.gmra.mrb[72].mxu0 %v6549_v24 }
 0x270   : > { %1897 = vmatprep.mubr.bf16.mxu0 %v6550_v25 }
 0x277   : > { %1898 = vmatmul.mubr.bf16.gmra.mrb[76].mxu0 %v6552_v26 }
 0x278   : > { %1905 = vmatprep.mubr.bf16.mxu0 %v6553_v27 }
 0x27f   : > { %1906 = vmatmul.mubr.bf16.gmra.mrb[80].mxu0 %v6555_v28 }
 0x280   : > { %1913 = vmatprep.mubr.bf16.mxu0 %v6556_v29 }
 0x287   : > { %1914 = vmatmul.mubr.bf16.gmra.mrb[84].mxu0 %v6558_v30 }
 0x288   : > { %1921 = vmatprep.mubr.bf16.mxu0 %v6559_v31  ;;  %v6622_v31 = vld [vmem:[#allocation8 + $0x30] ss:$8 sps:$4 sm:$0xff]  }
 0x28f   : > { %1922 = vmatmul.mubr.bf16.gmra.mrb[88].mxu0 %v6561_v32  ;;  %v6624_v32 = vld [vmem:[#allocation8 + $0x34] ss:$8 sps:$4 sm:$0xff]  }
 0x290   : > { %1929 = vmatprep.mubr.bf16.mxu0 %v6562_v33 }
 0x297   : > { %1930 = vmatmul.mubr.bf16.gmra.mrb[92].mxu0 %v6564_v34 }
 0x298   : > { %1937 = vmatprep.mubr.bf16.mxu0 %v6571_v35 }
 0x29f   : > { %1938 = vmatmul.mubr.bf16.gmra.mrb[96].mxu0 %v6573_v36 }
 0x2a0   : > { %1945 = vmatprep.mubr.bf16.mxu0 %v6580_v37 }
 0x2a7   : > { %1946 = vmatmul.mubr.bf16.gmra.mrb[100].mxu0 %v6582_v38 }
 0x2a8   : > { %1953 = vmatprep.mubr.bf16.mxu0 %v6589_v39 }
 0x2af   : > { %1954 = vmatmul.mubr.bf16.gmra.mrb[104].mxu0 %v6591_v40 }
 0x2b0   : > { %1961 = vmatprep.mubr.bf16.mxu0 %v6598_v41 }
 0x2b2   : > { %v1747_v42 = vpop.f32.mrb[0].mxu0 }
 0x2b3   : > { %v1749_v43 = vpop.f32.mrb[1].mxu0 }
 0x2b4   : > { %v1750_v45 = vpop.f32.mrb[2].mxu0  ;;  %v6625_v43 = vld [vmem:[#allocation8 + $0x40] ss:$8 sps:$4 sm:$0xff]  }
 0x2b5   : > { %v1752_v47 = vpop.f32.mrb[3].mxu0  ;;  %v2002_v48 = vpack.c.bf16 %v1750_v45, %v1747_v42 }
 0x2b7   : > { %1962 = vmatmul.mubr.bf16.gmra.mrb[108].mxu0 %v6600_v44  ;;  %2158 = vmatmul.mubr.bf16.vlgmr.msra.gmra.mrb[0].mxu1 %v2002_v48  ;;  %v6627_v44 = vld [vmem:[#allocation8 + $0x44] ss:$8 sps:$4 sm:$0xff]  }
 0x2b8   : > { %1969 = vmatprep.mubr.bf16.mxu0 %v6601_v46  ;;  %2167 = vmatprep.mubr.bf16.mxu1 %v7162_v0 }
 0x2b9   : > { %2864 = vmatpush1.bf16.msra.mxu1 %v6613_v52 }
 0x2ba   : > { %v1755_v49 = vpop.f32.mrb[4].mxu0  ;;  %2865 = vmatprep.subr.bf16.mxu1 %v6618_v6  ;;  %v6639_v6 = vld [vmem:[#allocation8 + $0x84] ss:$8 sps:$4 sm:$0xff]  }
 0x2bb   : > { %v1757_v51 = vpop.f32.mrb[5].mxu0 }
 0x2bc   : > { %v1758_v54 = vpop.f32.mrb[6].mxu0 }
 0x2bd   : > { %v1760_v56 = vpop.f32.mrb[7].mxu0  ;;  %v2003_v57 = vpack.c.bf16 %v1758_v54, %v1755_v49  ;;  %2866 = vmatpush1.bf16.msra.mxu1 %v6616_v5 }
 0x2be   : > { %2867 = vmatprep.subr.bf16.mxu1 %v6621_v20 }
 0x2bf   : > { %1970 = vmatmul.mubr.bf16.gmra.mrb[112].mxu0 %v6603_v50  ;;  %2168 = vmatmul.mubr.bf16.gmra.mrb[4].mxu1 %v2003_v57 }
 0x2c0   : > { %1977 = vmatprep.mubr.bf16.mxu0 %v6604_v55  ;;  %2177 = vmatprep.mubr.bf16.mxu1 %v7162_v0  ;;  %v6628_v55 = vld [vmem:[#allocation8 + $0x50] ss:$8 sps:$4 sm:$0xff]  }
 0x2c1   : > { %2868 = vmatpush1.bf16.msra.mxu1 %v6619_v19  ;;  %v6646_v19 = vld [vmem:[#allocation8 + $0xb0] ss:$8 sps:$4 sm:$0xff]  }
 0x2c2   : > { %v1763_v58 = vpop.f32.mrb[8].mxu0  ;;  %2869 = vmatprep.subr.bf16.mxu1 %v6624_v32 }
 0x2c3   : > { %v1765_v59 = vpop.f32.mrb[9].mxu0 }
 0x2c4   : > { %v1766_v61 = vpop.f32.mrb[10].mxu0 }
 0x2c5   : > { %v1768_v63 = vpop.f32.mrb[11].mxu0  ;;  %v2004_v1 = vpack.c.bf16 %v1766_v61, %v1763_v58  ;;  %2870 = vmatpush1.bf16.msra.mxu1 %v6622_v31  ;;  %v6631_v61 = vld [vmem:[#allocation8 + $0x60] ss:$8 sps:$4 sm:$0xff]  }
 0x2c6   : > { %2871 = vmatprep.subr.bf16.mxu1 %v6627_v44 }
 0x2c7   : > { %1978 = vmatmul.mubr.bf16.gmra.mrb[116].mxu0 %v6606_v60  ;;  %2178 = vmatmul.mubr.bf16.gmra.mrb[8].mxu1 %v2004_v1  ;;  %v6633_v60 = vld [vmem:[#allocation8 + $0x64] ss:$8 sps:$4 sm:$0xff]   ;;  %v6634_v1 = vld [vmem:[#allocation8 + $0x70] ss:$8 sps:$4 sm:$0xff]  }
 0x2c8   : > { %1985 = vmatprep.mubr.bf16.mxu0 %v6607_v62  ;;  %2187 = vmatprep.mubr.bf16.mxu1 %v7162_v0  ;;  %v6636_v62 = vld [vmem:[#allocation8 + $0x74] ss:$8 sps:$4 sm:$0xff]  }
 0x2c9   : > { %2872 = vmatpush1.bf16.msra.mxu1 %v6625_v43 }
 0x2ca   : > { %v1771_v2 = vpop.f32.mrb[12].mxu0  ;;  %2873 = vmatprep.subr.bf16.mxu1 %v6630_v53 }
 0x2cb   : > { %v1773_v4 = vpop.f32.mrb[13].mxu0 }
 0x2cc   : > { %v1774_v7 = vpop.f32.mrb[14].mxu0 }
 0x2cd   : > { %v1776_v9 = vpop.f32.mrb[15].mxu0  ;;  %v2005_v10 = vpack.c.bf16 %v1774_v7, %v1771_v2  ;;  %2874 = vmatpush1.bf16.msra.mxu1 %v6628_v55  ;;  %v6637_v7 = vld [vmem:[#allocation8 + $0x80] ss:$8 sps:$4 sm:$0xff]  }
 0x2ce   : > { %2875 = vmatprep.subr.bf16.mxu1 %v6633_v60 }
 0x2cf   : > { %1986 = vmatmul.mubr.bf16.gmra.mrb[120].mxu0 %v6609_v3  ;;  %2188 = vmatmul.mubr.bf16.gmra.mrb[12].mxu1 %v2005_v10  ;;  %v6640_v10 = vld [vmem:[#allocation8 + $0x90] ss:$8 sps:$4 sm:$0xff]  }
 0x2d0   : > { %1993 = vmatprep.mubr.bf16.mxu0 %v6610_v8  ;;  %2197 = vmatprep.mubr.bf16.mxu1 %v7162_v0  ;;  %v6642_v8 = vld [vmem:[#allocation8 + $0x94] ss:$8 sps:$4 sm:$0xff]  }
 0x2d1   : > { %2876 = vmatpush1.bf16.msra.mxu1 %v6631_v61 }
 0x2d2   : > { %v1779_v11 = vpop.f32.mrb[16].mxu0  ;;  %2877 = vmatprep.subr.bf16.mxu1 %v6636_v62 }
 0x2d3   : > { %v1781_v12 = vpop.f32.mrb[17].mxu0 }
 0x2d4   : > { %v1782_v14 = vpop.f32.mrb[18].mxu0 }
 0x2d5   : > { %v1784_v15 = vpop.f32.mrb[19].mxu0  ;;  %v2006_v16 = vpack.c.bf16 %v1782_v14, %v1779_v11  ;;  %2878 = vmatpush1.bf16.msra.mxu1 %v6634_v1 }
 0x2d6   : > { %2879 = vmatprep.subr.bf16.mxu1 %v6639_v6  ;;  %v6645_v15 = vld [vmem:[#allocation8 + $0xa4] ss:$8 sps:$4 sm:$0xff]  }
 0x2d7   : > { %1994 = vmatmul.mubr.bf16.gmra.mrb[124].mxu0 %v6612_v13  ;;  %2198 = vmatmul.mubr.bf16.gmra.mrb[16].mxu1 %v2006_v16  ;;  %v6643_v16 = vld [vmem:[#allocation8 + $0xa0] ss:$8 sps:$4 sm:$0xff]  }
 0x2d8   : > { %2207 = vmatprep.mubr.bf16.mxu1 %v7162_v0 }
 0x2d9   : > { %2880 = vmatpush1.bf16.msra.mxu1 %v6637_v7 }
 0x2da   : > { %v1787_v17 = vpop.f32.mrb[20].mxu0  ;;  %2881 = vmatprep.subr.bf16.mxu1 %v6642_v8 }
 0x2db   : > { %v1789_v18 = vpop.f32.mrb[21].mxu0 }
 0x2dc   : > { %v1790_v21 = vpop.f32.mrb[22].mxu0 }
 0x2dd   : > { %v1792_v22 = vpop.f32.mrb[23].mxu0  ;;  %v2007_v23 = vpack.c.bf16 %v1790_v21, %v1787_v17  ;;  %2882 = vmatpush1.bf16.msra.mxu1 %v6640_v10  ;;  %v6648_v17 = vld [vmem:[#allocation8 + $0xb4] ss:$8 sps:$4 sm:$0xff]  }
 0x2de   : > { %2883 = vmatprep.subr.bf16.mxu1 %v6645_v15 }
 0x2df   : > { %2208 = vmatmul.mubr.bf16.gmra.mrb[20].mxu1 %v2007_v23 }
 0x2e0   : > { %2217 = vmatprep.mubr.bf16.mxu1 %v7162_v0 }
 0x2e1   : > { %2884 = vmatpush1.bf16.msra.mxu1 %v6643_v16 }
 0x2e2   : > { %v1795_v24 = vpop.f32.mrb[24].mxu0  ;;  %2885 = vmatprep.subr.bf16.mxu1 %v6648_v17 }
 0x2e3   : > { %v1797_v25 = vpop.f32.mrb[25].mxu0 }
 0x2e4   : > { %v1798_v26 = vpop.f32.mrb[26].mxu0  ;;  %v6649_v25 = vld [vmem:[#allocation8 + $0xc0] ss:$8 sps:$4 sm:$0xff]  }
 0x2e5   : > { %v1800_v27 = vpop.f32.mrb[27].mxu0  ;;  %v2008_v28 = vpack.c.bf16 %v1798_v26, %v1795_v24  ;;  %2886 = vmatpush1.bf16.msra.mxu1 %v6646_v19  ;;  %v6651_v24 = vld [vmem:[#allocation8 + $0xc4] ss:$8 sps:$4 sm:$0xff]   ;;  %v6654_v26 = vld [vmem:[#allocation8 + $0xd4] ss:$8 sps:$4 sm:$0xff]  }
 0x2e6   : > { %2887 = vmatprep.subr.bf16.mxu1 %v6651_v24 }
 0x2e7   : > { %2218 = vmatmul.mubr.bf16.gmra.mrb[24].mxu1 %v2008_v28  ;;  %v6652_v28 = vld [vmem:[#allocation8 + $0xd0] ss:$8 sps:$4 sm:$0xff]  }
 0x2e8   : > { %2227 = vmatprep.mubr.bf16.mxu1 %v7162_v0 }
 0x2e9   : > { %2888 = vmatpush1.bf16.msra.mxu1 %v6649_v25 }
 0x2ea   : > { %v1803_v29 = vpop.f32.mrb[28].mxu0  ;;  %2889 = vmatprep.subr.bf16.mxu1 %v6654_v26 }
 0x2eb   : > { %v1805_v30 = vpop.f32.mrb[29].mxu0 }
 0x2ec   : > { %v1806_v33 = vpop.f32.mrb[30].mxu0 }
 0x2ed   : > { %v1808_v34 = vpop.f32.mrb[31].mxu0  ;;  %v2009_v35 = vpack.c.bf16 %v1806_v33, %v1803_v29  ;;  %2890 = vmatpush1.bf16.msra.mxu1 %v6652_v28  ;;  %v6657_v33 = vld [vmem:[#allocation8 + $0xe4] ss:$8 sps:$4 sm:$0xff]  }
 0x2ee   : > { %v6655_v34 = vld [vmem:[#allocation8 + $0xe0] ss:$8 sps:$4 sm:$0xff]   ;;  %2891 = vmatprep.subr.bf16.mxu1 %v6657_v33 }
 0x2ef   : > { %2228 = vmatmul.mubr.bf16.gmra.mrb[28].mxu1 %v2009_v35  ;;  %v6660_v35 = vld [vmem:[#allocation8 + $0xf4] ss:$8 sps:$4 sm:$0xff]  }
 0x2f0   : > { %2237 = vmatprep.mubr.bf16.mxu1 %v7162_v0 }
 0x2f1   : > { %2892 = vmatpush1.bf16.msra.mxu1 %v6655_v34 }
 0x2f2   : > { %v1811_v36 = vpop.f32.mrb[32].mxu0  ;;  %2893 = vmatprep.subr.bf16.mxu1 %v6660_v35 }
 0x2f3   : > { %v1813_v37 = vpop.f32.mrb[33].mxu0 }
 0x2f4   : > { %v1814_v38 = vpop.f32.mrb[34].mxu0  ;;  %v6658_v37 = vld [vmem:[#allocation8 + $0xf0] ss:$8 sps:$4 sm:$0xff]  }
 0x2f5   : > { %v1816_v39 = vpop.f32.mrb[35].mxu0  ;;  %v2010_v40 = vpack.c.bf16 %v1814_v38, %v1811_v36  ;;  %2894 = vmatpush1.bf16.msra.mxu1 %v6658_v37 }
 0x2f7   : > { %2238 = vmatmul.mubr.bf16.gmra.mrb[32].mxu1 %v2010_v40 }
 0x2f8   : > { %2247 = vmatprep.mubr.bf16.mxu1 %v7162_v0 }
 0x2fa   : > { %v1819_v41 = vpop.f32.mrb[36].mxu0 }
 0x2fb   : > { %v1821_v42 = vpop.f32.mrb[37].mxu0 }
 0x2fc   : > { %v1822_v45 = vpop.f32.mrb[38].mxu0 }
 0x2fd   : > { %v1824_v46 = vpop.f32.mrb[39].mxu0  ;;  %v2011_v47 = vpack.c.bf16 %v1822_v45, %v1819_v41 }
 0x2ff   : > { %2248 = vmatmul.mubr.bf16.gmra.mrb[36].mxu1 %v2011_v47 }
 0x300   : > { %2257 = vmatprep.mubr.bf16.mxu1 %v7162_v0 }
 0x302   : > { %v1827_v48 = vpop.f32.mrb[40].mxu0 }
 0x303   : > { %v1829_v49 = vpop.f32.mrb[41].mxu0 }
 0x304   : > { %v1830_v50 = vpop.f32.mrb[42].mxu0 }
 0x305   : > { %v1832_v51 = vpop.f32.mrb[43].mxu0  ;;  %v2012_v52 = vpack.c.bf16 %v1830_v50, %v1827_v48 }
 0x307   : > { %2258 = vmatmul.mubr.bf16.gmra.mrb[40].mxu1 %v2012_v52 }
 0x308   : > { %2267 = vmatprep.mubr.bf16.mxu1 %v7162_v0 }
 0x30a   : > { %v1835_v54 = vpop.f32.mrb[44].mxu0 }
 0x30b   : > { %v1837_v56 = vpop.f32.mrb[45].mxu0 }
 0x30c   : > { %v1838_v57 = vpop.f32.mrb[46].mxu0 }
 0x30d   : > { %v1840_v58 = vpop.f32.mrb[47].mxu0  ;;  %v2013_v59 = vpack.c.bf16 %v1838_v57, %v1835_v54 }
 0x30f   : > { %2268 = vmatmul.mubr.bf16.gmra.mrb[44].mxu1 %v2013_v59 }
 0x310   : > { %2277 = vmatprep.mubr.bf16.mxu1 %v7162_v0 }
 0x312   : > { %v1843_v63 = vpop.f32.mrb[48].mxu0 }
 0x313   : > { %v1845_v2 = vpop.f32.mrb[49].mxu0 }
 0x314   : > { %v1846_v3 = vpop.f32.mrb[50].mxu0 }
 0x315   : > { %v1848_v4 = vpop.f32.mrb[51].mxu0  ;;  %v2014_v5 = vpack.c.bf16 %v1846_v3, %v1843_v63 }
 0x317   : > { %2278 = vmatmul.mubr.bf16.gmra.mrb[48].mxu1 %v2014_v5 }
 0x318   : > { %2287 = vmatprep.mubr.bf16.mxu1 %v7162_v0 }
 0x31a   : > { %v1851_v9 = vpop.f32.mrb[52].mxu0 }
 0x31b   : > { %v1853_v11 = vpop.f32.mrb[53].mxu0 }
 0x31c   : > { %v1854_v12 = vpop.f32.mrb[54].mxu0 }
 0x31d   : > { %v1856_v13 = vpop.f32.mrb[55].mxu0  ;;  %v2015_v14 = vpack.c.bf16 %v1854_v12, %v1851_v9 }
 0x31f   : > { %2288 = vmatmul.mubr.bf16.gmra.mrb[52].mxu1 %v2015_v14 }
 0x320   : > { %2297 = vmatprep.mubr.bf16.mxu1 %v7162_v0 }
 0x322   : > { %v1859_v18 = vpop.f32.mrb[56].mxu0 }
 0x323   : > { %v1861_v20 = vpop.f32.mrb[57].mxu0 }
 0x324   : > { %v1862_v21 = vpop.f32.mrb[58].mxu0 }
 0x325   : > { %v2016_v22 = vpack.c.bf16 %v1862_v21, %v1859_v18  ;;  %v1864_v23 = vpop.f32.mrb[59].mxu0  ;;  %v2035_v21 = vlaneseq }
 0x327   : > { %2298 = vmatmul.mubr.bf16.gmra.mrb[56].mxu1 %v2016_v22  ;;  %v7520_v25 = vshrl.u32 %v2035_v21, 7 }
 0x328   : > { %2307 = vmatprep.mubr.bf16.mxu1 %v7162_v0 }
 0x329   : > { %v2037_v28 = vsub.s32 0, %v7520_v25 }
 0x32a   : > { %v1867_v27 = vpop.f32.mrb[60].mxu0 }
 0x32b   : > { %v1869_v29 = vpop.f32.mrb[61].mxu0 }
 0x32c   : > { %v1870_v30 = vpop.f32.mrb[62].mxu0 }
 0x32d   : > { %v2017_v31 = vpack.c.bf16 %v1870_v30, %v1867_v27  ;;  %v1872_v32 = vpop.f32.mrb[63].mxu0  ;;  %v591_v30 = vld [vmem:[%s8159_s5] sm:$0x3] }
 0x32e   : > { %v7530_v34 = vrot.slane %v591_v30, %v2037_v28 }
 0x32f   : > { %2308 = vmatmul.mubr.bf16.gmra.mrb[60].mxu1 %v2017_v31  ;;  %v2041_v31 = vsub.s32 1, %v7520_v25 }
 0x330   : > { %2317 = vmatprep.mubr.bf16.mxu1 %v7162_v0 }
 0x331   : > { %v7534_v35 = vrot.slane %v591_v30, %v2041_v31 }
 0x332   : > { %v1875_v36 = vpop.f32.mrb[64].mxu0 }
 0x333   : > { %v1877_v38 = vpop.f32.mrb[65].mxu0 }
 0x334   : > { %v1878_v39 = vpop.f32.mrb[66].mxu0 }
 0x335   : > { %v2018_v40 = vpack.c.bf16 %v1878_v39, %v1875_v36  ;;  %v1880_v41 = vpop.f32.mrb[67].mxu0 }
 0x337   : > { %2318 = vmatmul.mubr.bf16.gmra.mrb[64].mxu1 %v2018_v40 }
 0x338   : > { %2327 = vmatprep.mubr.bf16.mxu1 %v7162_v0 }
 0x33a   : > { %v1883_v42 = vpop.f32.mrb[68].mxu0 }
 0x33b   : > { %v1885_v43 = vpop.f32.mrb[69].mxu0 }
 0x33c   : > { %v1886_v44 = vpop.f32.mrb[70].mxu0 }
 0x33d   : > { %v2019_v45 = vpack.c.bf16 %v1886_v44, %v1883_v42  ;;  %v1888_v46 = vpop.f32.mrb[71].mxu0 }
 0x33f   : > { %2328 = vmatmul.mubr.bf16.gmra.mrb[68].mxu1 %v2019_v45 }
 0x340   : > { %2337 = vmatprep.mubr.bf16.mxu1 %v7162_v0 }
 0x342   : > { %v1891_v47 = vpop.f32.mrb[72].mxu0 }
 0x343   : > { %v1893_v48 = vpop.f32.mrb[73].mxu0 }
 0x344   : > { %v1894_v49 = vpop.f32.mrb[74].mxu0 }
 0x345   : > { %v2020_v50 = vpack.c.bf16 %v1894_v49, %v1891_v47  ;;  %v1896_v51 = vpop.f32.mrb[75].mxu0 }
 0x347   : > { %2338 = vmatmul.mubr.bf16.gmra.mrb[72].mxu1 %v2020_v50 }
 0x348   : > { %2347 = vmatprep.mubr.bf16.mxu1 %v7162_v0 }
 0x34a   : > { %v1899_v52 = vpop.f32.mrb[76].mxu0 }
 0x34b   : > { %v1901_v53 = vpop.f32.mrb[77].mxu0 }
 0x34c   : > { %v1902_v54 = vpop.f32.mrb[78].mxu0 }
 0x34d   : > { %v2021_v55 = vpack.c.bf16 %v1902_v54, %v1899_v52  ;;  %v1904_v56 = vpop.f32.mrb[79].mxu0 }
 0x34f   : > { %2348 = vmatmul.mubr.bf16.gmra.mrb[76].mxu1 %v2021_v55 }
 0x350   : > { %2357 = vmatprep.mubr.bf16.mxu1 %v7162_v0 }
 0x352   : > { %v1907_v57 = vpop.f32.mrb[80].mxu0 }
 0x353   : > { %v1909_v58 = vpop.f32.mrb[81].mxu0 }
 0x354   : > { %v1910_v59 = vpop.f32.mrb[82].mxu0 }
 0x355   : > { %v2022_v60 = vpack.c.bf16 %v1910_v59, %v1907_v57  ;;  %v1912_v61 = vpop.f32.mrb[83].mxu0 }
 0x357   : > { %2358 = vmatmul.mubr.bf16.gmra.mrb[80].mxu1 %v2022_v60 }
 0x358   : > { %2367 = vmatprep.mubr.bf16.mxu1 %v7162_v0 }
 0x35a   : > { %v1915_v62 = vpop.f32.mrb[84].mxu0 }
 0x35b   : > { %v1917_v63 = vpop.f32.mrb[85].mxu0 }
 0x35c   : > { %v1918_v1 = vpop.f32.mrb[86].mxu0 }
 0x35d   : > { %v2023_v2 = vpack.c.bf16 %v1918_v1, %v1915_v62  ;;  %v1920_v3 = vpop.f32.mrb[87].mxu0 }
 0x35f   : > { %2368 = vmatmul.mubr.bf16.gmra.mrb[84].mxu1 %v2023_v2 }
 0x360   : > { %2377 = vmatprep.mubr.bf16.mxu1 %v7162_v0 }
 0x362   : > { %v1923_v4 = vpop.f32.mrb[88].mxu0 }
 0x363   : > { %v1925_v5 = vpop.f32.mrb[89].mxu0 }
 0x364   : > { %v1926_v6 = vpop.f32.mrb[90].mxu0 }
 0x365   : > { %v2024_v7 = vpack.c.bf16 %v1926_v6, %v1923_v4  ;;  %v1928_v8 = vpop.f32.mrb[91].mxu0 }
 0x367   : > { %2378 = vmatmul.mubr.bf16.gmra.mrb[88].mxu1 %v2024_v7 }
 0x368   : > { %2387 = vmatprep.mubr.bf16.mxu1 %v7162_v0 }
 0x36a   : > { %v1931_v9 = vpop.f32.mrb[92].mxu0 }
 0x36b   : > { %v1933_v10 = vpop.f32.mrb[93].mxu0 }
 0x36c   : > { %v1934_v11 = vpop.f32.mrb[94].mxu0 }
 0x36d   : > { %v2025_v12 = vpack.c.bf16 %v1934_v11, %v1931_v9  ;;  %v1936_v13 = vpop.f32.mrb[95].mxu0 }
 0x36f   : > { %2388 = vmatmul.mubr.bf16.gmra.mrb[92].mxu1 %v2025_v12 }
 0x370   : > { %2397 = vmatprep.mubr.bf16.mxu1 %v7162_v0 }
 0x372   : > { %v1939_v14 = vpop.f32.mrb[96].mxu0 }
 0x373   : > { %v1941_v15 = vpop.f32.mrb[97].mxu0 }
 0x374   : > { %v1942_v16 = vpop.f32.mrb[98].mxu0 }
 0x375   : > { %v2026_v17 = vpack.c.bf16 %v1942_v16, %v1939_v14  ;;  %v1944_v18 = vpop.f32.mrb[99].mxu0 }
 0x377   : > { %2398 = vmatmul.mubr.bf16.gmra.mrb[96].mxu1 %v2026_v17 }
 0x378   : > { %2407 = vmatprep.mubr.bf16.mxu1 %v7162_v0 }
 0x37a   : > { %v1947_v19 = vpop.f32.mrb[100].mxu0 }
 0x37b   : > { %v1949_v20 = vpop.f32.mrb[101].mxu0 }
 0x37c   : > { %v1950_v22 = vpop.f32.mrb[102].mxu0 }
 0x37d   : > { %v2027_v23 = vpack.c.bf16 %v1950_v22, %v1947_v19  ;;  %v1952_v24 = vpop.f32.mrb[103].mxu0 }
 0x37f   : > { %2408 = vmatmul.mubr.bf16.gmra.mrb[100].mxu1 %v2027_v23 }
 0x380   : > { %2417 = vmatprep.mubr.bf16.mxu1 %v7162_v0 }
 0x382   : > { %v1955_v26 = vpop.f32.mrb[104].mxu0 }
 0x383   : > { %v1957_v27 = vpop.f32.mrb[105].mxu0 }
 0x384   : > { %v1958_v29 = vpop.f32.mrb[106].mxu0 }
 0x385   : > { %v2028_v32 = vpack.c.bf16 %v1958_v29, %v1955_v26  ;;  %v1960_v33 = vpop.f32.mrb[107].mxu0 }
 0x387   : > { %2418 = vmatmul.mubr.bf16.gmra.mrb[104].mxu1 %v2028_v32 }
 0x388   : > { %2427 = vmatprep.mubr.bf16.mxu1 %v7162_v0 }
 0x38a   : > { %v1963_v36 = vpop.f32.mrb[108].mxu0  ;;  %v2159_v37 = vpop.f32.mrb[0].mxu1 }
 0x38b   : > { %v2160_v38 = vadd.f32 %v2159_v37, %v7530_v34  ;;  %v1965_v39 = vpop.f32.mrb[109].mxu0  ;;  %v2161_v40 = vpop.f32.mrb[1].mxu1 }
 0x38c   : > { %v2162_v41 = vadd.f32 %v2161_v40, %v7534_v35  ;;  %v1966_v42 = vpop.f32.mrb[110].mxu0  ;;  %v2163_v43 = vpop.f32.mrb[2].mxu1 }
 0x38d   : > { %v2029_v44 = vpack.c.bf16 %v1966_v42, %v1963_v36  ;;  %v2164_v45 = vadd.f32 %v2163_v43, %v7530_v34  ;;  %v1968_v46 = vpop.f32.mrb[111].mxu0  ;;  %v2165_v47 = vpop.f32.mrb[3].mxu1  ;;  %v2478_v49 = vmax.f32 %v2160_v38, 0.0 }
 0x38e   : > { %v2166_v48 = vadd.f32 %v2165_v47, %v7534_v35  ;;  %v2479_v51 = vmax.f32 %v2162_v41, 0.0 }
 0x38f   : > { %v2480_v50 = vmax.f32 %v2164_v45, 0.0  ;;  %2428 = vmatmul.mubr.bf16.gmra.mrb[108].mxu1 %v2029_v44 }
 0x390   : > { %2437 = vmatprep.mubr.bf16.mxu1 %v7162_v0  ;;  %v2481_v52 = vmax.f32 %v2166_v48, 0.0 }
 0x391   : > { %v7542_v53 = vpack.c.bf16 %v2480_v50, %v2478_v49 }
 0x392   : > { %v1971_v54 = vpop.f32.mrb[112].mxu0  ;;  %v2169_v55 = vpop.f32.mrb[4].mxu1  ;;  %v7544_v56 = vpack.c.bf16 %v2481_v52, %v2479_v51 }
 0x393   : > { %v2170_v57 = vadd.f32 %v2169_v55, %v7530_v34  ;;  %v1973_v58 = vpop.f32.mrb[113].mxu0  ;;  %v2171_v59 = vpop.f32.mrb[5].mxu1 }
 0x394   : > { %v2172_v60 = vadd.f32 %v2171_v59, %v7534_v35  ;;  %v1974_v61 = vpop.f32.mrb[114].mxu0  ;;  %v2173_v62 = vpop.f32.mrb[6].mxu1 }
 0x395   : > { %v2030_v63 = vpack.c.bf16 %v1974_v61, %v1971_v54  ;;  %v2174_v1 = vadd.f32 %v2173_v62, %v7530_v34  ;;  %v1976_v2 = vpop.f32.mrb[115].mxu0  ;;  %v2175_v3 = vpop.f32.mrb[7].mxu1  ;;  %v2482_v5 = vmax.f32 %v2170_v57, 0.0 }
 0x396   : > { %v2176_v4 = vadd.f32 %v2175_v3, %v7534_v35  ;;  %v2483_v7 = vmax.f32 %v2172_v60, 0.0 }
 0x397   : > { %2438 = vmatmul.mubr.bf16.gmra.mrb[112].mxu1 %v2030_v63  ;;  %v2484_v6 = vmax.f32 %v2174_v1, 0.0 }
 0x398   : > { %2447 = vmatprep.mubr.bf16.mxu1 %v7162_v0  ;;  %v2485_v8 = vmax.f32 %v2176_v4, 0.0 }
 0x399   : > { %v7551_v9 = vpack.c.bf16 %v2484_v6, %v2482_v5 }
 0x39a   : > { %v1979_v10 = vpop.f32.mrb[116].mxu0  ;;  %v2179_v11 = vpop.f32.mrb[8].mxu1  ;;  %v7553_v12 = vpack.c.bf16 %v2485_v8, %v2483_v7 }
 0x39b   : > { %v2180_v13 = vadd.f32 %v2179_v11, %v7530_v34  ;;  %v1981_v14 = vpop.f32.mrb[117].mxu0  ;;  %v2181_v15 = vpop.f32.mrb[9].mxu1 }
 0x39c   : > { %v2182_v16 = vadd.f32 %v2181_v15, %v7534_v35  ;;  %v1982_v17 = vpop.f32.mrb[118].mxu0  ;;  %v2183_v18 = vpop.f32.mrb[10].mxu1 }
 0x39d   : > { %v2031_v19 = vpack.c.bf16 %v1982_v17, %v1979_v10  ;;  %v2184_v20 = vadd.f32 %v2183_v18, %v7530_v34  ;;  %v1984_v21 = vpop.f32.mrb[119].mxu0  ;;  %v2185_v22 = vpop.f32.mrb[11].mxu1  ;;  %v2486_v24 = vmax.f32 %v2180_v13, 0.0 }
 0x39e   : > { %v2186_v23 = vadd.f32 %v2185_v22, %v7534_v35  ;;  %v2487_v27 = vmax.f32 %v2182_v16, 0.0 }
 0x39f   : > { %2448 = vmatmul.mubr.bf16.gmra.mrb[116].mxu1 %v2031_v19  ;;  %v2488_v26 = vmax.f32 %v2184_v20, 0.0 }
 0x3a0   : > { %2457 = vmatprep.mubr.bf16.mxu1 %v7162_v0  ;;  %v2489_v29 = vmax.f32 %v2186_v23, 0.0 }
 0x3a1   : > { %v7560_v30 = vpack.c.bf16 %v2488_v26, %v2486_v24 }
 0x3a2   : > { %v1987_v32 = vpop.f32.mrb[120].mxu0  ;;  %v2189_v33 = vpop.f32.mrb[12].mxu1  ;;  %v7562_v36 = vpack.c.bf16 %v2489_v29, %v2487_v27 }
 0x3a3   : > { %v2190_v37 = vadd.f32 %v2189_v33, %v7530_v34  ;;  %v1989_v38 = vpop.f32.mrb[121].mxu0  ;;  %v2191_v39 = vpop.f32.mrb[13].mxu1 }
 0x3a4   : > { %v2192_v40 = vadd.f32 %v2191_v39, %v7534_v35  ;;  %v1990_v41 = vpop.f32.mrb[122].mxu0  ;;  %v2193_v42 = vpop.f32.mrb[14].mxu1 }
 0x3a5   : > { %v2032_v43 = vpack.c.bf16 %v1990_v41, %v1987_v32  ;;  %v2194_v44 = vadd.f32 %v2193_v42, %v7530_v34  ;;  %v1992_v45 = vpop.f32.mrb[123].mxu0  ;;  %v2195_v46 = vpop.f32.mrb[15].mxu1  ;;  %v2490_v48 = vmax.f32 %v2190_v37, 0.0 }
 0x3a6   : > { %v2196_v47 = vadd.f32 %v2195_v46, %v7534_v35  ;;  %v2491_v50 = vmax.f32 %v2192_v40, 0.0 }
 0x3a7   : > { %2458 = vmatmul.mubr.bf16.gmra.mrb[120].mxu1 %v2032_v43  ;;  %v2492_v49 = vmax.f32 %v2194_v44, 0.0 }
 0x3a8   : > { %2467 = vmatprep.mubr.bf16.mxu1 %v7162_v0  ;;  %v2493_v51 = vmax.f32 %v2196_v47, 0.0 }
 0x3a9   : > { %v7569_v52 = vpack.c.bf16 %v2492_v49, %v2490_v48 }
 0x3aa   : > { %v1995_v54 = vpop.f32.mrb[124].mxu0  ;;  %v2199_v55 = vpop.f32.mrb[16].mxu1  ;;  %v2613_v57 = vpack.c.bf16 %v2493_v51, %v2491_v50 }
 0x3ab   : > { %v2200_v58 = vadd.f32 %v2199_v55, %v7530_v34  ;;  %v1997_v59 = vpop.f32.mrb[125].mxu0  ;;  %v2201_v60 = vpop.f32.mrb[17].mxu1 }
 0x3ac   : > { %v2202_v61 = vadd.f32 %v2201_v60, %v7534_v35  ;;  %v1998_v62 = vpop.f32.mrb[126].mxu0  ;;  %v2203_v63 = vpop.f32.mrb[18].mxu1 }
 0x3ad   : > { %v2033_v1 = vpack.c.bf16 %v1998_v62, %v1995_v54  ;;  %v2204_v2 = vadd.f32 %v2203_v63, %v7530_v34  ;;  %v2000_v3 = vpop.f32.mrb[127].mxu0  ;;  %v2205_v4 = vpop.f32.mrb[19].mxu1  ;;  %v2494_v6 = vmax.f32 %v2200_v58, 0.0 }
 0x3ae   : > { %v2206_v5 = vadd.f32 %v2205_v4, %v7534_v35  ;;  %v2495_v8 = vmax.f32 %v2202_v61, 0.0 }
 0x3af   : > { %2468 = vmatmul.mubr.bf16.gmra.mrb[124].mxu1 %v2033_v1  ;;  %v2496_v7 = vmax.f32 %v2204_v2, 0.0 }
 0x3b0   : > { %2895 = vmatprep.mubr.bf16.mxu1 %v7544_v56  ;;  %v2497_v10 = vmax.f32 %v2206_v5, 0.0 }
 0x3b1   : > { %v7576_v11 = vpack.c.bf16 %v2496_v7, %v2494_v6 }
 0x3b2   : > { %v2209_v13 = vpop.f32.mrb[20].mxu1  ;;  %v2615_v14 = vpack.c.bf16 %v2497_v10, %v2495_v8 }
 0x3b3   : > { %v2210_v15 = vadd.f32 %v2209_v13, %v7530_v34  ;;  %v2211_v16 = vpop.f32.mrb[21].mxu1 }
 0x3b4   : > { %v2212_v17 = vadd.f32 %v2211_v16, %v7534_v35  ;;  %v2213_v18 = vpop.f32.mrb[22].mxu1 }
 0x3b5   : > { %v2214_v19 = vadd.f32 %v2213_v18, %v7530_v34  ;;  %v2215_v20 = vpop.f32.mrb[23].mxu1  ;;  %v2498_v56 = vmax.f32 %v2210_v15, 0.0 }
 0x3b6   : > { %v2216_v21 = vadd.f32 %v2215_v20, %v7534_v35  ;;  %v2499_v23 = vmax.f32 %v2212_v17, 0.0 }
 0x3b7   : > { %2896 = vmatmul.mubr.bf16.vlgmr.msra.gmra.mrb[128].mxu1 %v7542_v53  ;;  %v2500_v22 = vmax.f32 %v2214_v19, 0.0 }
 0x3b8   : > { %2905 = vmatprep.mubr.bf16.mxu1 %v7553_v12  ;;  %v2501_v24 = vmax.f32 %v2216_v21, 0.0 }
 0x3b9   : > { %v7584_v26 = vpack.c.bf16 %v2500_v22, %v2498_v56 }
 0x3ba   : > { %v2219_v27 = vpop.f32.mrb[24].mxu1  ;;  %v2617_v29 = vpack.c.bf16 %v2501_v24, %v2499_v23 }
 0x3bb   : > { %v2220_v32 = vadd.f32 %v2219_v27, %v7530_v34  ;;  %v2221_v33 = vpop.f32.mrb[25].mxu1 }
 0x3bc   : > { %v2222_v37 = vadd.f32 %v2221_v33, %v7534_v35  ;;  %v2223_v38 = vpop.f32.mrb[26].mxu1 }
 0x3bd   : > { %v2224_v39 = vadd.f32 %v2223_v38, %v7530_v34  ;;  %v2225_v40 = vpop.f32.mrb[27].mxu1  ;;  %v2502_v12 = vmax.f32 %v2220_v32, 0.0 }
 0x3be   : > { %v2226_v53 = vadd.f32 %v2225_v40, %v7534_v35  ;;  %v2503_v42 = vmax.f32 %v2222_v37, 0.0 }
 0x3bf   : > { %2906 = vmatmul.mubr.bf16.gmra.mrb[132].mxu1 %v7551_v9  ;;  %v2504_v41 = vmax.f32 %v2224_v39, 0.0 }
 0x3c0   : > { %2915 = vmatprep.mubr.bf16.mxu1 %v7562_v36  ;;  %v2505_v43 = vmax.f32 %v2226_v53, 0.0 }
 0x3c1   : > { %v7592_v44 = vpack.c.bf16 %v2504_v41, %v2502_v12 }
 0x3c2   : > { %v2229_v45 = vpop.f32.mrb[28].mxu1  ;;  %v2619_v46 = vpack.c.bf16 %v2505_v43, %v2503_v42 }
 0x3c3   : > { %v2230_v47 = vadd.f32 %v2229_v45, %v7530_v34  ;;  %v2231_v48 = vpop.f32.mrb[29].mxu1 }
 0x3c4   : > { %v2232_v49 = vadd.f32 %v2231_v48, %v7534_v35  ;;  %v2233_v50 = vpop.f32.mrb[30].mxu1 }
 0x3c5   : > { %v2234_v51 = vadd.f32 %v2233_v50, %v7530_v34  ;;  %v2235_v54 = vpop.f32.mrb[31].mxu1  ;;  %v2506_v36 = vmax.f32 %v2230_v47, 0.0 }
 0x3c6   : > { %v2236_v9 = vadd.f32 %v2235_v54, %v7534_v35  ;;  %v2507_v58 = vmax.f32 %v2232_v49, 0.0 }
 0x3c7   : > { %2916 = vmatmul.mubr.bf16.gmra.mrb[136].mxu1 %v7560_v30  ;;  %v2508_v55 = vmax.f32 %v2234_v51, 0.0 }
 0x3c8   : > { %2925 = vmatprep.mubr.bf16.mxu1 %v2613_v57  ;;  %v2509_v59 = vmax.f32 %v2236_v9, 0.0 }
 0x3c9   : > { %v7599_v60 = vpack.c.bf16 %v2508_v55, %v2506_v36 }
 0x3ca   : > { %v2239_v61 = vpop.f32.mrb[32].mxu1  ;;  %v2621_v62 = vpack.c.bf16 %v2509_v59, %v2507_v58 }
 0x3cb   : > { %v2240_v63 = vadd.f32 %v2239_v61, %v7530_v34  ;;  %v2241_v1 = vpop.f32.mrb[33].mxu1 }
 0x3cc   : > { %v2242_v2 = vadd.f32 %v2241_v1, %v7534_v35  ;;  %v2243_v3 = vpop.f32.mrb[34].mxu1 }
 0x3cd   : > { %v2244_v4 = vadd.f32 %v2243_v3, %v7530_v34  ;;  %v2245_v5 = vpop.f32.mrb[35].mxu1  ;;  %v2510_v57 = vmax.f32 %v2240_v63, 0.0 }
 0x3ce   : > { %v2246_v30 = vadd.f32 %v2245_v5, %v7534_v35  ;;  %v2511_v7 = vmax.f32 %v2242_v2, 0.0 }
 0x3cf   : > { %2926 = vmatmul.mubr.bf16.gmra.mrb[140].mxu1 %v7569_v52  ;;  %v2512_v6 = vmax.f32 %v2244_v4, 0.0 }
 0x3d0   : > { %2935 = vmatprep.mubr.bf16.mxu1 %v2615_v14  ;;  %v2513_v8 = vmax.f32 %v2246_v30, 0.0 }
 0x3d1   : > { %v7606_v10 = vpack.c.bf16 %v2512_v6, %v2510_v57 }
 0x3d2   : > { %v2249_v13 = vpop.f32.mrb[36].mxu1  ;;  %v2623_v15 = vpack.c.bf16 %v2513_v8, %v2511_v7 }
 0x3d3   : > { %v2250_v16 = vadd.f32 %v2249_v13, %v7530_v34  ;;  %v2251_v17 = vpop.f32.mrb[37].mxu1 }
 0x3d4   : > { %v2252_v18 = vadd.f32 %v2251_v17, %v7534_v35  ;;  %v2253_v19 = vpop.f32.mrb[38].mxu1 }
 0x3d5   : > { %v2254_v20 = vadd.f32 %v2253_v19, %v7530_v34  ;;  %v2255_v21 = vpop.f32.mrb[39].mxu1  ;;  %v2514_v14 = vmax.f32 %v2250_v16, 0.0 }
 0x3d6   : > { %v2256_v52 = vadd.f32 %v2255_v21, %v7534_v35  ;;  %v2515_v22 = vmax.f32 %v2252_v18, 0.0 }
 0x3d7   : > { %2936 = vmatmul.mubr.bf16.gmra.mrb[144].mxu1 %v7576_v11  ;;  %v2516_v56 = vmax.f32 %v2254_v20, 0.0 }
 0x3d8   : > { %2945 = vmatprep.mubr.bf16.mxu1 %v2617_v29  ;;  %v2517_v23 = vmax.f32 %v2256_v52, 0.0 }
 0x3d9   : > { %v7613_v24 = vpack.c.bf16 %v2516_v56, %v2514_v14 }
 0x3da   : > { %v2259_v27 = vpop.f32.mrb[40].mxu1  ;;  %v2625_v32 = vpack.c.bf16 %v2517_v23, %v2515_v22 }
 0x3db   : > { %v2260_v33 = vadd.f32 %v2259_v27, %v7530_v34  ;;  %v2261_v37 = vpop.f32.mrb[41].mxu1 }
 0x3dc   : > { %v2262_v38 = vadd.f32 %v2261_v37, %v7534_v35  ;;  %v2263_v39 = vpop.f32.mrb[42].mxu1 }
 0x3dd   : > { %v2264_v40 = vadd.f32 %v2263_v39, %v7530_v34  ;;  %v2265_v53 = vpop.f32.mrb[43].mxu1  ;;  %v2518_v29 = vmax.f32 %v2260_v33, 0.0 }
 0x3de   : > { %v2266_v11 = vadd.f32 %v2265_v53, %v7534_v35  ;;  %v2519_v41 = vmax.f32 %v2262_v38, 0.0 }
 0x3df   : > { %2946 = vmatmul.mubr.bf16.gmra.mrb[148].mxu1 %v7584_v26  ;;  %v2520_v12 = vmax.f32 %v2264_v40, 0.0 }
 0x3e0   : > { %2955 = vmatprep.mubr.bf16.mxu1 %v2619_v46  ;;  %v2521_v42 = vmax.f32 %v2266_v11, 0.0 }
 0x3e1   : > { %v7620_v43 = vpack.c.bf16 %v2520_v12, %v2518_v29 }
 0x3e2   : > { %v2269_v45 = vpop.f32.mrb[44].mxu1  ;;  %v2627_v47 = vpack.c.bf16 %v2521_v42, %v2519_v41 }
 0x3e3   : > { %v2270_v48 = vadd.f32 %v2269_v45, %v7530_v34  ;;  %v2271_v49 = vpop.f32.mrb[45].mxu1 }
 0x3e4   : > { %v2272_v50 = vadd.f32 %v2271_v49, %v7534_v35  ;;  %v2273_v51 = vpop.f32.mrb[46].mxu1 }
 0x3e5   : > { %v2274_v54 = vadd.f32 %v2273_v51, %v7530_v34  ;;  %v2275_v9 = vpop.f32.mrb[47].mxu1  ;;  %v2522_v46 = vmax.f32 %v2270_v48, 0.0 }
 0x3e6   : > { %v2276_v26 = vadd.f32 %v2275_v9, %v7534_v35  ;;  %v2523_v55 = vmax.f32 %v2272_v50, 0.0 }
 0x3e7   : > { %2956 = vmatmul.mubr.bf16.gmra.mrb[152].mxu1 %v7592_v44  ;;  %v2524_v36 = vmax.f32 %v2274_v54, 0.0 }
 0x3e8   : > { %2965 = vmatprep.mubr.bf16.mxu1 %v2621_v62  ;;  %v2525_v58 = vmax.f32 %v2276_v26, 0.0 }
 0x3e9   : > { %v7627_v59 = vpack.c.bf16 %v2524_v36, %v2522_v46 }
 0x3ea   : > { %v2279_v61 = vpop.f32.mrb[48].mxu1  ;;  %v2629_v63 = vpack.c.bf16 %v2525_v58, %v2523_v55 }
 0x3eb   : > { %v2280_v1 = vadd.f32 %v2279_v61, %v7530_v34  ;;  %v2281_v2 = vpop.f32.mrb[49].mxu1 }
 0x3ec   : > { %v2282_v3 = vadd.f32 %v2281_v2, %v7534_v35  ;;  %v2283_v4 = vpop.f32.mrb[50].mxu1 }
 0x3ed   : > { %v2284_v5 = vadd.f32 %v2283_v4, %v7530_v34  ;;  %v2285_v30 = vpop.f32.mrb[51].mxu1  ;;  %v2526_v62 = vmax.f32 %v2280_v1, 0.0 }
 0x3ee   : > { %v2286_v44 = vadd.f32 %v2285_v30, %v7534_v35  ;;  %v2527_v6 = vmax.f32 %v2282_v3, 0.0 }
 0x3ef   : > { %2966 = vmatmul.mubr.bf16.gmra.mrb[156].mxu1 %v7599_v60  ;;  %v2528_v57 = vmax.f32 %v2284_v5, 0.0 }
 0x3f0   : > { %2975 = vmatprep.mubr.bf16.mxu1 %v2623_v15  ;;  %v2529_v7 = vmax.f32 %v2286_v44, 0.0 }
 0x3f1   : > { %v7634_v8 = vpack.c.bf16 %v2528_v57, %v2526_v62 }
 0x3f2   : > { %v2289_v13 = vpop.f32.mrb[52].mxu1  ;;  %v2631_v16 = vpack.c.bf16 %v2529_v7, %v2527_v6 }
 0x3f3   : > { %v2290_v17 = vadd.f32 %v2289_v13, %v7530_v34  ;;  %v2291_v18 = vpop.f32.mrb[53].mxu1 }
 0x3f4   : > { %v2292_v19 = vadd.f32 %v2291_v18, %v7534_v35  ;;  %v2293_v20 = vpop.f32.mrb[54].mxu1 }
 0x3f5   : > { %v2294_v21 = vadd.f32 %v2293_v20, %v7530_v34  ;;  %v2295_v52 = vpop.f32.mrb[55].mxu1  ;;  %v2530_v15 = vmax.f32 %v2290_v17, 0.0 }
 0x3f6   : > { %v2296_v60 = vadd.f32 %v2295_v52, %v7534_v35  ;;  %v2531_v56 = vmax.f32 %v2292_v19, 0.0 }
 0x3f7   : > { %2976 = vmatmul.mubr.bf16.gmra.mrb[160].mxu1 %v7606_v10  ;;  %v2532_v14 = vmax.f32 %v2294_v21, 0.0 }
 0x3f8   : > { %2985 = vmatprep.mubr.bf16.mxu1 %v2625_v32  ;;  %v2533_v22 = vmax.f32 %v2296_v60, 0.0 }
 0x3f9   : > { %v7641_v23 = vpack.c.bf16 %v2532_v14, %v2530_v15 }
 0x3fa   : > { %v2299_v27 = vpop.f32.mrb[56].mxu1  ;;  %v2633_v33 = vpack.c.bf16 %v2533_v22, %v2531_v56 }
 0x3fb   : > { %v2300_v37 = vadd.f32 %v2299_v27, %v7530_v34  ;;  %v2301_v38 = vpop.f32.mrb[57].mxu1 }
 0x3fc   : > { %v2302_v39 = vadd.f32 %v2301_v38, %v7534_v35  ;;  %v2303_v40 = vpop.f32.mrb[58].mxu1 }
 0x3fd   : > { %v2304_v53 = vadd.f32 %v2303_v40, %v7530_v34  ;;  %v2305_v11 = vpop.f32.mrb[59].mxu1  ;;  %v2534_v32 = vmax.f32 %v2300_v37, 0.0 }
 0x3fe   : > { %v2306_v10 = vadd.f32 %v2305_v11, %v7534_v35  ;;  %v2535_v12 = vmax.f32 %v2302_v39, 0.0 }
 0x3ff   : > { %2986 = vmatmul.mubr.bf16.gmra.mrb[164].mxu1 %v7613_v24  ;;  %v2536_v29 = vmax.f32 %v2304_v53, 0.0 }
 0x400   : > { %2995 = vmatprep.mubr.bf16.mxu1 %v2627_v47  ;;  %v2537_v41 = vmax.f32 %v2306_v10, 0.0 }
 0x401   : > { %v7648_v42 = vpack.c.bf16 %v2536_v29, %v2534_v32 }
 0x402   : > { %v2309_v45 = vpop.f32.mrb[60].mxu1  ;;  %v2635_v48 = vpack.c.bf16 %v2537_v41, %v2535_v12 }
 0x403   : > { %v2310_v49 = vadd.f32 %v2309_v45, %v7530_v34  ;;  %v2311_v50 = vpop.f32.mrb[61].mxu1 }
 0x404   : > { %v2312_v51 = vadd.f32 %v2311_v50, %v7534_v35  ;;  %v2313_v54 = vpop.f32.mrb[62].mxu1 }
 0x405   : > { %v2314_v9 = vadd.f32 %v2313_v54, %v7530_v34  ;;  %v2315_v26 = vpop.f32.mrb[63].mxu1  ;;  %v2538_v47 = vmax.f32 %v2310_v49, 0.0 }
 0x406   : > { %v2316_v24 = vadd.f32 %v2315_v26, %v7534_v35  ;;  %v2539_v36 = vmax.f32 %v2312_v51, 0.0 }
 0x407   : > { %2996 = vmatmul.mubr.bf16.gmra.mrb[168].mxu1 %v7620_v43  ;;  %v2540_v46 = vmax.f32 %v2314_v9, 0.0 }
 0x408   : > { %3005 = vmatprep.mubr.bf16.mxu1 %v2629_v63  ;;  %v2541_v55 = vmax.f32 %v2316_v24, 0.0 }
 0x409   : > { %v7655_v58 = vpack.c.bf16 %v2540_v46, %v2538_v47 }
 0x40a   : > { %v2319_v61 = vpop.f32.mrb[64].mxu1  ;;  %v2637_v1 = vpack.c.bf16 %v2541_v55, %v2539_v36 }
 0x40b   : > { %v2320_v2 = vadd.f32 %v2319_v61, %v7530_v34  ;;  %v2321_v3 = vpop.f32.mrb[65].mxu1 }
 0x40c   : > { %v2322_v4 = vadd.f32 %v2321_v3, %v7534_v35  ;;  %v2323_v5 = vpop.f32.mrb[66].mxu1 }
 0x40d   : > { %v2324_v30 = vadd.f32 %v2323_v5, %v7530_v34  ;;  %v2325_v44 = vpop.f32.mrb[67].mxu1  ;;  %v2542_v63 = vmax.f32 %v2320_v2, 0.0 }
 0x40e   : > { %v2326_v43 = vadd.f32 %v2325_v44, %v7534_v35  ;;  %v2543_v57 = vmax.f32 %v2322_v4, 0.0 }
 0x40f   : > { %3006 = vmatmul.mubr.bf16.gmra.mrb[172].mxu1 %v7627_v59  ;;  %v2544_v62 = vmax.f32 %v2324_v30, 0.0 }
 0x410   : > { %3015 = vmatprep.mubr.bf16.mxu1 %v2631_v16  ;;  %v2545_v6 = vmax.f32 %v2326_v43, 0.0 }
 0x411   : > { %v7662_v7 = vpack.c.bf16 %v2544_v62, %v2542_v63 }
 0x412   : > { %v2329_v13 = vpop.f32.mrb[68].mxu1  ;;  %v2639_v17 = vpack.c.bf16 %v2545_v6, %v2543_v57 }
 0x413   : > { %v2330_v18 = vadd.f32 %v2329_v13, %v7530_v34  ;;  %v2331_v19 = vpop.f32.mrb[69].mxu1 }
 0x414   : > { %v2332_v20 = vadd.f32 %v2331_v19, %v7534_v35  ;;  %v2333_v21 = vpop.f32.mrb[70].mxu1 }
 0x415   : > { %v2334_v52 = vadd.f32 %v2333_v21, %v7530_v34  ;;  %v2335_v60 = vpop.f32.mrb[71].mxu1  ;;  %v2546_v16 = vmax.f32 %v2330_v18, 0.0 }
 0x416   : > { %v2336_v59 = vadd.f32 %v2335_v60, %v7534_v35  ;;  %v2547_v14 = vmax.f32 %v2332_v20, 0.0 }
 0x417   : > { %3016 = vmatmul.mubr.bf16.gmra.mrb[176].mxu1 %v7634_v8  ;;  %v2548_v15 = vmax.f32 %v2334_v52, 0.0 }
 0x418   : > { %3025 = vmatprep.mubr.bf16.mxu1 %v2633_v33  ;;  %v2549_v56 = vmax.f32 %v2336_v59, 0.0 }
 0x419   : > { %v7669_v22 = vpack.c.bf16 %v2548_v15, %v2546_v16 }
 0x41a   : > { %v2339_v27 = vpop.f32.mrb[72].mxu1  ;;  %v2641_v37 = vpack.c.bf16 %v2549_v56, %v2547_v14 }
 0x41b   : > { %v2340_v38 = vadd.f32 %v2339_v27, %v7530_v34  ;;  %v2341_v39 = vpop.f32.mrb[73].mxu1 }
 0x41c   : > { %v2342_v40 = vadd.f32 %v2341_v39, %v7534_v35  ;;  %v2343_v53 = vpop.f32.mrb[74].mxu1 }
 0x41d   : > { %v2344_v11 = vadd.f32 %v2343_v53, %v7530_v34  ;;  %v2345_v10 = vpop.f32.mrb[75].mxu1  ;;  %v2550_v33 = vmax.f32 %v2340_v38, 0.0 }
 0x41e   : > { %v2346_v8 = vadd.f32 %v2345_v10, %v7534_v35  ;;  %v2551_v29 = vmax.f32 %v2342_v40, 0.0 }
 0x41f   : > { %3026 = vmatmul.mubr.bf16.gmra.mrb[180].mxu1 %v7641_v23  ;;  %v2552_v32 = vmax.f32 %v2344_v11, 0.0 }
 0x420   : > { %3035 = vmatprep.mubr.bf16.mxu1 %v2635_v48  ;;  %v2553_v12 = vmax.f32 %v2346_v8, 0.0 }
 0x421   : > { %v7676_v41 = vpack.c.bf16 %v2552_v32, %v2550_v33 }
 0x422   : > { %v2349_v45 = vpop.f32.mrb[76].mxu1  ;;  %v2643_v49 = vpack.c.bf16 %v2553_v12, %v2551_v29 }
 0x423   : > { %v2350_v50 = vadd.f32 %v2349_v45, %v7530_v34  ;;  %v2351_v51 = vpop.f32.mrb[77].mxu1 }
 0x424   : > { %v2352_v54 = vadd.f32 %v2351_v51, %v7534_v35  ;;  %v2353_v9 = vpop.f32.mrb[78].mxu1 }
 0x425   : > { %v2354_v26 = vadd.f32 %v2353_v9, %v7530_v34  ;;  %v2355_v24 = vpop.f32.mrb[79].mxu1  ;;  %v2554_v48 = vmax.f32 %v2350_v50, 0.0 }
 0x426   : > { %v2356_v23 = vadd.f32 %v2355_v24, %v7534_v35  ;;  %v2555_v46 = vmax.f32 %v2352_v54, 0.0 }
 0x427   : > { %3036 = vmatmul.mubr.bf16.gmra.mrb[184].mxu1 %v7648_v42  ;;  %v2556_v47 = vmax.f32 %v2354_v26, 0.0 }
 0x428   : > { %3045 = vmatprep.mubr.bf16.mxu1 %v2637_v1  ;;  %v2557_v36 = vmax.f32 %v2356_v23, 0.0 }
 0x429   : > { %v7683_v55 = vpack.c.bf16 %v2556_v47, %v2554_v48 }
 0x42a   : > { %v2359_v61 = vpop.f32.mrb[80].mxu1  ;;  %v2645_v2 = vpack.c.bf16 %v2557_v36, %v2555_v46 }
 0x42b   : > { %v2360_v3 = vadd.f32 %v2359_v61, %v7530_v34  ;;  %v2361_v4 = vpop.f32.mrb[81].mxu1 }
 0x42c   : > { %v2362_v5 = vadd.f32 %v2361_v4, %v7534_v35  ;;  %v2363_v30 = vpop.f32.mrb[82].mxu1 }
 0x42d   : > { %v2364_v44 = vadd.f32 %v2363_v30, %v7530_v34  ;;  %v2365_v43 = vpop.f32.mrb[83].mxu1  ;;  %v2558_v1 = vmax.f32 %v2360_v3, 0.0 }
 0x42e   : > { %v2366_v42 = vadd.f32 %v2365_v43, %v7534_v35  ;;  %v2559_v62 = vmax.f32 %v2362_v5, 0.0 }
 0x42f   : > { %3046 = vmatmul.mubr.bf16.gmra.mrb[188].mxu1 %v7655_v58  ;;  %v2560_v63 = vmax.f32 %v2364_v44, 0.0 }
 0x430   : > { %3055 = vmatprep.mubr.bf16.mxu1 %v2639_v17  ;;  %v2561_v57 = vmax.f32 %v2366_v42, 0.0 }
 0x431   : > { %v7690_v6 = vpack.c.bf16 %v2560_v63, %v2558_v1 }
 0x432   : > { %v2369_v13 = vpop.f32.mrb[84].mxu1  ;;  %v2647_v18 = vpack.c.bf16 %v2561_v57, %v2559_v62 }
 0x433   : > { %v2370_v19 = vadd.f32 %v2369_v13, %v7530_v34  ;;  %v2371_v20 = vpop.f32.mrb[85].mxu1 }
 0x434   : > { %v2372_v21 = vadd.f32 %v2371_v20, %v7534_v35  ;;  %v2373_v52 = vpop.f32.mrb[86].mxu1 }
 0x435   : > { %v2374_v60 = vadd.f32 %v2373_v52, %v7530_v34  ;;  %v2375_v59 = vpop.f32.mrb[87].mxu1  ;;  %v2562_v17 = vmax.f32 %v2370_v19, 0.0 }
 0x436   : > { %v2376_v58 = vadd.f32 %v2375_v59, %v7534_v35  ;;  %v2563_v15 = vmax.f32 %v2372_v21, 0.0 }
 0x437   : > { %3056 = vmatmul.mubr.bf16.gmra.mrb[192].mxu1 %v7662_v7  ;;  %v2564_v16 = vmax.f32 %v2374_v60, 0.0 }
 0x438   : > { %3065 = vmatprep.mubr.bf16.mxu1 %v2641_v37  ;;  %v2565_v14 = vmax.f32 %v2376_v58, 0.0 }
 0x439   : > { %v7697_v56 = vpack.c.bf16 %v2564_v16, %v2562_v17 }
 0x43a   : > { %v2379_v27 = vpop.f32.mrb[88].mxu1  ;;  %v2649_v38 = vpack.c.bf16 %v2565_v14, %v2563_v15 }
 0x43b   : > { %v2380_v39 = vadd.f32 %v2379_v27, %v7530_v34  ;;  %v2381_v40 = vpop.f32.mrb[89].mxu1 }
 0x43c   : > { %v2382_v53 = vadd.f32 %v2381_v40, %v7534_v35  ;;  %v2383_v11 = vpop.f32.mrb[90].mxu1 }
 0x43d   : > { %v2384_v10 = vadd.f32 %v2383_v11, %v7530_v34  ;;  %v2385_v8 = vpop.f32.mrb[91].mxu1  ;;  %v2566_v37 = vmax.f32 %v2380_v39, 0.0 }
 0x43e   : > { %v2386_v7 = vadd.f32 %v2385_v8, %v7534_v35  ;;  %v2567_v32 = vmax.f32 %v2382_v53, 0.0 }
 0x43f   : > { %3066 = vmatmul.mubr.bf16.gmra.mrb[196].mxu1 %v7669_v22  ;;  %v2568_v33 = vmax.f32 %v2384_v10, 0.0 }
 0x440   : > { %3075 = vmatprep.mubr.bf16.mxu1 %v2643_v49  ;;  %v2569_v29 = vmax.f32 %v2386_v7, 0.0 }
 0x441   : > { %v7704_v12 = vpack.c.bf16 %v2568_v33, %v2566_v37 }
 0x442   : > { %v2389_v45 = vpop.f32.mrb[92].mxu1  ;;  %v2651_v50 = vpack.c.bf16 %v2569_v29, %v2567_v32 }
 0x443   : > { %v2390_v51 = vadd.f32 %v2389_v45, %v7530_v34  ;;  %v2391_v54 = vpop.f32.mrb[93].mxu1 }
 0x444   : > { %v2392_v9 = vadd.f32 %v2391_v54, %v7534_v35  ;;  %v2393_v26 = vpop.f32.mrb[94].mxu1 }
 0x445   : > { %v2394_v24 = vadd.f32 %v2393_v26, %v7530_v34  ;;  %v2395_v23 = vpop.f32.mrb[95].mxu1  ;;  %v2570_v49 = vmax.f32 %v2390_v51, 0.0 }
 0x446   : > { %v2396_v22 = vadd.f32 %v2395_v23, %v7534_v35  ;;  %v2571_v47 = vmax.f32 %v2392_v9, 0.0 }
 0x447   : > { %3076 = vmatmul.mubr.bf16.gmra.mrb[200].mxu1 %v7676_v41  ;;  %v2572_v48 = vmax.f32 %v2394_v24, 0.0 }
 0x448   : > { %3085 = vmatprep.mubr.bf16.mxu1 %v2645_v2  ;;  %v2573_v46 = vmax.f32 %v2396_v22, 0.0 }
 0x449   : > { %v7711_v36 = vpack.c.bf16 %v2572_v48, %v2570_v49 }
 0x44a   : > { %v2399_v61 = vpop.f32.mrb[96].mxu1  ;;  %v2653_v3 = vpack.c.bf16 %v2573_v46, %v2571_v47 }
 0x44b   : > { %v2400_v4 = vadd.f32 %v2399_v61, %v7530_v34  ;;  %v2401_v5 = vpop.f32.mrb[97].mxu1 }
 0x44c   : > { %v2402_v30 = vadd.f32 %v2401_v5, %v7534_v35  ;;  %v2403_v44 = vpop.f32.mrb[98].mxu1 }
 0x44d   : > { %v2404_v43 = vadd.f32 %v2403_v44, %v7530_v34  ;;  %v2405_v42 = vpop.f32.mrb[99].mxu1  ;;  %v2574_v2 = vmax.f32 %v2400_v4, 0.0 }
 0x44e   : > { %v2406_v41 = vadd.f32 %v2405_v42, %v7534_v35  ;;  %v2575_v63 = vmax.f32 %v2402_v30, 0.0 }
 0x44f   : > { %3086 = vmatmul.mubr.bf16.gmra.mrb[204].mxu1 %v7683_v55  ;;  %v2576_v1 = vmax.f32 %v2404_v43, 0.0 }
 0x450   : > { %3095 = vmatprep.mubr.bf16.mxu1 %v2647_v18  ;;  %v2577_v62 = vmax.f32 %v2406_v41, 0.0 }
 0x451   : > { %v7718_v57 = vpack.c.bf16 %v2576_v1, %v2574_v2 }
 0x452   : > { %v2409_v13 = vpop.f32.mrb[100].mxu1  ;;  %v2655_v19 = vpack.c.bf16 %v2577_v62, %v2575_v63 }
 0x453   : > { %v2410_v20 = vadd.f32 %v2409_v13, %v7530_v34  ;;  %v2411_v21 = vpop.f32.mrb[101].mxu1 }
 0x454   : > { %v2412_v52 = vadd.f32 %v2411_v21, %v7534_v35  ;;  %v2413_v60 = vpop.f32.mrb[102].mxu1 }
 0x455   : > { %v2414_v59 = vadd.f32 %v2413_v60, %v7530_v34  ;;  %v2415_v58 = vpop.f32.mrb[103].mxu1  ;;  %v2578_v18 = vmax.f32 %v2410_v20, 0.0 }
 0x456   : > { %v2416_v55 = vadd.f32 %v2415_v58, %v7534_v35  ;;  %v2579_v16 = vmax.f32 %v2412_v52, 0.0 }
 0x457   : > { %3096 = vmatmul.mubr.bf16.gmra.mrb[208].mxu1 %v7690_v6  ;;  %v2580_v17 = vmax.f32 %v2414_v59, 0.0 }
 0x458   : > { %3105 = vmatprep.mubr.bf16.mxu1 %v2649_v38  ;;  %v2581_v15 = vmax.f32 %v2416_v55, 0.0 }
 0x459   : > { %v7725_v14 = vpack.c.bf16 %v2580_v17, %v2578_v18 }
 0x45a   : > { %v2419_v27 = vpop.f32.mrb[104].mxu1  ;;  %v2657_v39 = vpack.c.bf16 %v2581_v15, %v2579_v16 }
 0x45b   : > { %v2420_v40 = vadd.f32 %v2419_v27, %v7530_v34  ;;  %v2421_v53 = vpop.f32.mrb[105].mxu1 }
 0x45c   : > { %v2422_v11 = vadd.f32 %v2421_v53, %v7534_v35  ;;  %v2423_v10 = vpop.f32.mrb[106].mxu1 }
 0x45d   : > { %v2424_v8 = vadd.f32 %v2423_v10, %v7530_v34  ;;  %v2425_v7 = vpop.f32.mrb[107].mxu1  ;;  %v2582_v38 = vmax.f32 %v2420_v40, 0.0 }
 0x45e   : > { %v2426_v6 = vadd.f32 %v2425_v7, %v7534_v35  ;;  %v2583_v33 = vmax.f32 %v2422_v11, 0.0 }
 0x45f   : > { %3106 = vmatmul.mubr.bf16.gmra.mrb[212].mxu1 %v7697_v56  ;;  %v2584_v37 = vmax.f32 %v2424_v8, 0.0 }
 0x460   : > { %3115 = vmatprep.mubr.bf16.mxu1 %v2651_v50  ;;  %v2585_v32 = vmax.f32 %v2426_v6, 0.0 }
 0x461   : > { %v7732_v29 = vpack.c.bf16 %v2584_v37, %v2582_v38 }
 0x462   : > { %v2429_v45 = vpop.f32.mrb[108].mxu1  ;;  %v2659_v51 = vpack.c.bf16 %v2585_v32, %v2583_v33 }
 0x463   : > { %v2430_v54 = vadd.f32 %v2429_v45, %v7530_v34  ;;  %v2431_v9 = vpop.f32.mrb[109].mxu1 }
 0x464   : > { %v2432_v26 = vadd.f32 %v2431_v9, %v7534_v35  ;;  %v2433_v24 = vpop.f32.mrb[110].mxu1 }
 0x465   : > { %v2434_v23 = vadd.f32 %v2433_v24, %v7530_v34  ;;  %v2435_v22 = vpop.f32.mrb[111].mxu1  ;;  %v2586_v50 = vmax.f32 %v2430_v54, 0.0 }
 0x466   : > { %v2436_v56 = vadd.f32 %v2435_v22, %v7534_v35  ;;  %v2587_v48 = vmax.f32 %v2432_v26, 0.0 }
 0x467   : > { %3116 = vmatmul.mubr.bf16.gmra.mrb[216].mxu1 %v7704_v12  ;;  %v2588_v49 = vmax.f32 %v2434_v23, 0.0 }
 0x468   : > { %3125 = vmatprep.mubr.bf16.mxu1 %v2653_v3  ;;  %v2589_v47 = vmax.f32 %v2436_v56, 0.0 }
 0x469   : > { %v7739_v46 = vpack.c.bf16 %v2588_v49, %v2586_v50 }
 0x46a   : > { %v2439_v61 = vpop.f32.mrb[112].mxu1  ;;  %v2661_v4 = vpack.c.bf16 %v2589_v47, %v2587_v48 }
 0x46b   : > { %v2440_v5 = vadd.f32 %v2439_v61, %v7530_v34  ;;  %v2441_v30 = vpop.f32.mrb[113].mxu1 }
 0x46c   : > { %v2442_v44 = vadd.f32 %v2441_v30, %v7534_v35  ;;  %v2443_v43 = vpop.f32.mrb[114].mxu1 }
 0x46d   : > { %v2444_v42 = vadd.f32 %v2443_v43, %v7530_v34  ;;  %v2445_v41 = vpop.f32.mrb[115].mxu1  ;;  %v2590_v3 = vmax.f32 %v2440_v5, 0.0 }
 0x46e   : > { %v2446_v12 = vadd.f32 %v2445_v41, %v7534_v35  ;;  %v2591_v1 = vmax.f32 %v2442_v44, 0.0 }
 0x46f   : > { %3126 = vmatmul.mubr.bf16.gmra.mrb[220].mxu1 %v7711_v36  ;;  %v2592_v2 = vmax.f32 %v2444_v42, 0.0 }
 0x470   : > { %3135 = vmatprep.mubr.bf16.mxu1 %v2655_v19  ;;  %v2593_v63 = vmax.f32 %v2446_v12, 0.0 }
 0x471   : > { %v7746_v62 = vpack.c.bf16 %v2592_v2, %v2590_v3 }
 0x472   : > { %v2449_v13 = vpop.f32.mrb[116].mxu1  ;;  %v2663_v20 = vpack.c.bf16 %v2593_v63, %v2591_v1 }
 0x473   : > { %v2450_v21 = vadd.f32 %v2449_v13, %v7530_v34  ;;  %v2451_v52 = vpop.f32.mrb[117].mxu1 }
 0x474   : > { %v2452_v60 = vadd.f32 %v2451_v52, %v7534_v35  ;;  %v2453_v59 = vpop.f32.mrb[118].mxu1 }
 0x475   : > { %v2454_v58 = vadd.f32 %v2453_v59, %v7530_v34  ;;  %v2455_v55 = vpop.f32.mrb[119].mxu1  ;;  %v2594_v19 = vmax.f32 %v2450_v21, 0.0 }
 0x476   : > { %v2456_v36 = vadd.f32 %v2455_v55, %v7534_v35  ;;  %v2595_v17 = vmax.f32 %v2452_v60, 0.0 }
 0x477   : > { %3136 = vmatmul.mubr.bf16.gmra.mrb[224].mxu1 %v7718_v57  ;;  %v2596_v18 = vmax.f32 %v2454_v58, 0.0 }
 0x478   : > { %3145 = vmatprep.mubr.bf16.mxu1 %v2657_v39  ;;  %v2597_v16 = vmax.f32 %v2456_v36, 0.0 }
 0x479   : > { %v2664_v15 = vpack.c.bf16 %v2596_v18, %v2594_v19 }
 0x47a   : > { %v2459_v27 = vpop.f32.mrb[120].mxu1  ;;  %v2665_v40 = vpack.c.bf16 %v2597_v16, %v2595_v17 }
 0x47b   : > { %v2460_v53 = vadd.f32 %v2459_v27, %v7530_v34  ;;  %v2461_v11 = vpop.f32.mrb[121].mxu1 }
 0x47c   : > { %v2462_v10 = vadd.f32 %v2461_v11, %v7534_v35  ;;  %v2463_v8 = vpop.f32.mrb[122].mxu1 }
 0x47d   : > { %v2464_v7 = vadd.f32 %v2463_v8, %v7530_v34  ;;  %v2465_v6 = vpop.f32.mrb[123].mxu1  ;;  %v2598_v57 = vmax.f32 %v2460_v53, 0.0 }
 0x47e   : > { %v2466_v38 = vadd.f32 %v2465_v6, %v7534_v35  ;;  %v2599_v37 = vmax.f32 %v2462_v10, 0.0 }
 0x47f   : > { %3146 = vmatmul.mubr.bf16.gmra.mrb[228].mxu1 %v7725_v14  ;;  %v2600_v39 = vmax.f32 %v2464_v7, 0.0 }
 0x480   : > { %3155 = vmatprep.mubr.bf16.mxu1 %v2659_v51  ;;  %v2601_v33 = vmax.f32 %v2466_v38, 0.0 }
 0x481   : > { %v2666_v32 = vpack.c.bf16 %v2600_v39, %v2598_v57 }
 0x482   : > { %v2469_v45 = vpop.f32.mrb[124].mxu1  ;;  %v2667_v54 = vpack.c.bf16 %v2601_v33, %v2599_v37 }
 0x483   : > { %v2470_v9 = vadd.f32 %v2469_v45, %v7530_v34  ;;  %v2471_v26 = vpop.f32.mrb[125].mxu1 }
 0x484   : > { %v2472_v24 = vadd.f32 %v2471_v26, %v7534_v35  ;;  %v2473_v23 = vpop.f32.mrb[126].mxu1 }
 0x485   : > { %v2474_v22 = vadd.f32 %v2473_v23, %v7530_v34  ;;  %v2475_v56 = vpop.f32.mrb[127].mxu1  ;;  %v2602_v14 = vmax.f32 %v2470_v9, 0.0 }
 0x486   : > { %v2476_v50 = vadd.f32 %v2475_v56, %v7534_v35  ;;  %v2603_v49 = vmax.f32 %v2472_v24, 0.0 }
 0x487   : > { %3156 = vmatmul.mubr.bf16.gmra.mrb[232].mxu1 %v7732_v29  ;;  %v2604_v51 = vmax.f32 %v2474_v22, 0.0 }
 0x488   : > { %3165 = vmatprep.mubr.bf16.mxu1 %v2661_v4  ;;  %v2605_v48 = vmax.f32 %v2476_v50, 0.0 }
 0x489   : > { %v2668_v47 = vpack.c.bf16 %v2604_v51, %v2602_v14 }
 0x48a   : > { %v2897_v61 = vpop.f32.mrb[128].mxu1  ;;  %v2669_v5 = vpack.c.bf16 %v2605_v48, %v2603_v49 }
 0x48b   : > { %v2899_v30 = vpop.f32.mrb[129].mxu1 }
 0x48c   : > { %v2901_v44 = vpop.f32.mrb[130].mxu1 }
 0x48d   : > { %v3216_v43 = vpack.c.bf16 %v2901_v44, %v2897_v61  ;;  %v2903_v42 = vpop.f32.mrb[131].mxu1 }
 0x48e   : > { %v3217_v41 = vpack.c.bf16 %v2903_v42, %v2899_v30 }
 0x48f   : > { %3166 = vmatmul.mubr.bf16.gmra.mrb[236].mxu1 %v7739_v46 }
 0x490   : > { %3175 = vmatprep.mubr.bf16.mxu1 %v2663_v20  ;;  %3291 = vmatprep.subr.bf16.mxu1 %v3217_v41 }
 0x491   : > { %3292 = vmatpush1.bf16.msra.mxu1 %v3216_v43 }
 0x492   : > { %v2907_v34 = vpop.f32.mrb[132].mxu1 }
 0x493   : > { %v2909_v35 = vpop.f32.mrb[133].mxu1 }
 0x494   : > { %v2911_v29 = vpop.f32.mrb[134].mxu1 }
 0x495   : > { %v3218_v12 = vpack.c.bf16 %v2911_v29, %v2907_v34  ;;  %v2913_v4 = vpop.f32.mrb[135].mxu1 }
 0x496   : > { %v3219_v3 = vpack.c.bf16 %v2913_v4, %v2909_v35 }
 0x497   : > { %3176 = vmatmul.mubr.bf16.gmra.mrb[240].mxu1 %v7746_v62 }
 0x498   : > { %3185 = vmatprep.mubr.bf16.mxu1 %v2665_v40  ;;  %3293 = vmatprep.subr.bf16.mxu1 %v3219_v3 }
 0x499   : > { %3294 = vmatpush1.bf16.msra.mxu1 %v3218_v12 }
 0x49a   : > { %v2917_v2 = vpop.f32.mrb[136].mxu1 }
 0x49b   : > { %v2919_v1 = vpop.f32.mrb[137].mxu1 }
 0x49c   : > { %v2921_v63 = vpop.f32.mrb[138].mxu1 }
 0x49d   : > { %v3220_v13 = vpack.c.bf16 %v2921_v63, %v2917_v2  ;;  %v2923_v21 = vpop.f32.mrb[139].mxu1 }
 0x49e   : > { %v3221_v46 = vpack.c.bf16 %v2923_v21, %v2919_v1 }
 0x49f   : > { %3186 = vmatmul.mubr.bf16.gmra.mrb[244].mxu1 %v2664_v15  ;;  %v6677_v15 = vld [vmem:[#allocation5 + $0x4] ss:$16 sps:$4 sm:$0xff]  }
 0x4a0   : > { %3195 = vmatprep.mubr.bf16.mxu1 %v2667_v54  ;;  %3295 = vmatprep.subr.bf16.mxu1 %v3221_v46 }
 0x4a1   : > { %3296 = vmatpush1.bf16.msra.mxu1 %v3220_v13 }
 0x4a2   : > { %v2927_v20 = vpop.f32.mrb[140].mxu1 }
 0x4a3   : > { %v2929_v52 = vpop.f32.mrb[141].mxu1 }
 0x4a4   : > { %v2931_v60 = vpop.f32.mrb[142].mxu1 }
 0x4a5   : > { %v3222_v59 = vpack.c.bf16 %v2931_v60, %v2927_v20  ;;  %v2933_v58 = vpop.f32.mrb[143].mxu1 }
 0x4a6   : > { %v3223_v55 = vpack.c.bf16 %v2933_v58, %v2929_v52 }
 0x4a7   : > { %3196 = vmatmul.mubr.bf16.gmra.mrb[248].mxu1 %v2666_v32 }
 0x4a8   : > { %3205 = vmatprep.mubr.bf16.mxu1 %v2669_v5  ;;  %3297 = vmatprep.subr.bf16.mxu1 %v3223_v55 }
 0x4a9   : > { %3298 = vmatpush1.bf16.msra.mxu1 %v3222_v59 }
 0x4aa   : > { %v2937_v62 = vpop.f32.mrb[144].mxu1 }
 0x4ab   : > { %v2939_v36 = vpop.f32.mrb[145].mxu1 }
 0x4ac   : > { %v2941_v19 = vpop.f32.mrb[146].mxu1 }
 0x4ad   : > { %v3224_v18 = vpack.c.bf16 %v2941_v19, %v2937_v62  ;;  %v2943_v17 = vpop.f32.mrb[147].mxu1 }
 0x4ae   : > { %v3225_v16 = vpack.c.bf16 %v2943_v17, %v2939_v36 }
 0x4af   : > { %3206 = vmatmul.mubr.bf16.gmra.mrb[252].mxu1 %v2668_v47 }
 0x4b0   : > { %3299 = vmatprep.subr.bf16.mxu1 %v3225_v16  ;;  %3323 = vmatprep.mubr.bf16.mxu1 %v6677_v15 }
 0x4b1   : > { %3300 = vmatpush1.bf16.msra.mxu1 %v3224_v18 }
 0x4b2   : > { %v2947_v27 = vpop.f32.mrb[148].mxu1 }
 0x4b3   : > { %v2949_v40 = vpop.f32.mrb[149].mxu1 }
 0x4b4   : > { %v2951_v53 = vpop.f32.mrb[150].mxu1 }
 0x4b5   : > { %v3226_v11 = vpack.c.bf16 %v2951_v53, %v2947_v27  ;;  %v2953_v10 = vpop.f32.mrb[151].mxu1 }
 0x4b6   : > { %v3227_v8 = vpack.c.bf16 %v2953_v10, %v2949_v40 }
 0x4b8   : > { %3301 = vmatprep.subr.bf16.mxu1 %v3227_v8 }
 0x4b9   : > { %3302 = vmatpush1.bf16.msra.mxu1 %v3226_v11 }
 0x4ba   : > { %v2957_v7 = vpop.f32.mrb[152].mxu1 }
 0x4bb   : > { %v2959_v6 = vpop.f32.mrb[153].mxu1 }
 0x4bc   : > { %v2961_v38 = vpop.f32.mrb[154].mxu1 }
 0x4bd   : > { %v3228_v57 = vpack.c.bf16 %v2961_v38, %v2957_v7  ;;  %v2963_v39 = vpop.f32.mrb[155].mxu1 }
 0x4be   : > { %v3229_v37 = vpack.c.bf16 %v2963_v39, %v2959_v6 }
 0x4c0   : > { %3303 = vmatprep.subr.bf16.mxu1 %v3229_v37 }
 0x4c1   : > { %3304 = vmatpush1.bf16.msra.mxu1 %v3228_v57  ;;  %v6678_v57 = vld [vmem:[#allocation5] ss:$16 sps:$4 sm:$0xff]  }
 0x4c2   : > { %v2967_v33 = vpop.f32.mrb[156].mxu1 }
 0x4c3   : > { %v2969_v32 = vpop.f32.mrb[157].mxu1 }
 0x4c4   : > { %v2971_v45 = vpop.f32.mrb[158].mxu1 }
 0x4c5   : > { %v3230_v54 = vpack.c.bf16 %v2971_v45, %v2967_v33  ;;  %v2973_v9 = vpop.f32.mrb[159].mxu1  ;;  %v6679_v33 = vld [vmem:[#allocation5 + $0x24] ss:$16 sps:$4 sm:$0xff]  }
 0x4c6   : > { %v3231_v26 = vpack.c.bf16 %v2973_v9, %v2969_v32 }
 0x4c8   : > { %3305 = vmatprep.subr.bf16.mxu1 %v3231_v26  ;;  %v6680_v26 = vld [vmem:[#allocation5 + $0x20] ss:$16 sps:$4 sm:$0xff]  }
 0x4c9   : > { %3306 = vmatpush1.bf16.msra.mxu1 %v3230_v54 }
 0x4ca   : > { %v2977_v24 = vpop.f32.mrb[160].mxu1 }
 0x4cb   : > { %v2979_v23 = vpop.f32.mrb[161].mxu1 }
 0x4cc   : > { %v2981_v22 = vpop.f32.mrb[162].mxu1 }
 0x4cd   : > { %v3232_v56 = vpack.c.bf16 %v2981_v22, %v2977_v24  ;;  %v2983_v50 = vpop.f32.mrb[163].mxu1  ;;  %v6681_v22 = vld [vmem:[#allocation5 + $0x44] ss:$16 sps:$4 sm:$0xff]  }
 0x4ce   : > { %v3233_v14 = vpack.c.bf16 %v2983_v50, %v2979_v23 }
 0x4d0   : > { %3307 = vmatprep.subr.bf16.mxu1 %v3233_v14 }
 0x4d1   : > { %3308 = vmatpush1.bf16.msra.mxu1 %v3232_v56 }
 0x4d2   : > { %v2987_v51 = vpop.f32.mrb[164].mxu1 }
 0x4d3   : > { %v2989_v49 = vpop.f32.mrb[165].mxu1 }
 0x4d4   : > { %v2991_v48 = vpop.f32.mrb[166].mxu1 }
 0x4d5   : > { %v3234_v47 = vpack.c.bf16 %v2991_v48, %v2987_v51  ;;  %v2993_v61 = vpop.f32.mrb[167].mxu1 }
 0x4d6   : > { %v3235_v5 = vpack.c.bf16 %v2993_v61, %v2989_v49  ;;  %v6682_v49 = vld [vmem:[#allocation5 + $0x40] ss:$16 sps:$4 sm:$0xff]   ;;  %v6683_v61 = vld [vmem:[#allocation5 + $0x64] ss:$16 sps:$4 sm:$0xff]  }
 0x4d8   : > { %3309 = vmatprep.subr.bf16.mxu1 %v3235_v5 }
 0x4d9   : > { %3310 = vmatpush1.bf16.msra.mxu1 %v3234_v47 }
 0x4da   : > { %v2997_v30 = vpop.f32.mrb[168].mxu1 }
 0x4db   : > { %v2999_v44 = vpop.f32.mrb[169].mxu1 }
 0x4dc   : > { %v3001_v43 = vpop.f32.mrb[170].mxu1 }
 0x4dd   : > { %v3236_v42 = vpack.c.bf16 %v3001_v43, %v2997_v30  ;;  %v3003_v41 = vpop.f32.mrb[171].mxu1 }
 0x4de   : > { %v3237_v34 = vpack.c.bf16 %v3003_v41, %v2999_v44 }
 0x4e0   : > { %3311 = vmatprep.subr.bf16.mxu1 %v3237_v34 }
 0x4e1   : > { %3312 = vmatpush1.bf16.msra.mxu1 %v3236_v42  ;;  %v6684_v42 = vld [vmem:[#allocation5 + $0x60] ss:$16 sps:$4 sm:$0xff]  }
 0x4e2   : > { %v3007_v35 = vpop.f32.mrb[172].mxu1 }
 0x4e3   : > { %v3009_v29 = vpop.f32.mrb[173].mxu1 }
 0x4e4   : > { %v3011_v12 = vpop.f32.mrb[174].mxu1 }
 0x4e5   : > { %v3238_v4 = vpack.c.bf16 %v3011_v12, %v3007_v35  ;;  %v3013_v3 = vpop.f32.mrb[175].mxu1  ;;  %v6685_v35 = vld [vmem:[#allocation5 + $0x84] ss:$16 sps:$4 sm:$0xff]  }
 0x4e6   : > { %v3239_v2 = vpack.c.bf16 %v3013_v3, %v3009_v29 }
 0x4e8   : > { %3313 = vmatprep.subr.bf16.mxu1 %v3239_v2  ;;  %v6686_v2 = vld [vmem:[#allocation5 + $0x80] ss:$16 sps:$4 sm:$0xff]  }
 0x4e9   : > { %3314 = vmatpush1.bf16.msra.mxu1 %v3238_v4 }
 0x4ea   : > { %v3017_v1 = vpop.f32.mrb[176].mxu1 }
 0x4eb   : > { %v3019_v63 = vpop.f32.mrb[177].mxu1 }
 0x4ec   : > { %v3021_v13 = vpop.f32.mrb[178].mxu1 }
 0x4ed   : > { %v3240_v21 = vpack.c.bf16 %v3021_v13, %v3017_v1  ;;  %v3023_v46 = vpop.f32.mrb[179].mxu1  ;;  %v6687_v13 = vld [vmem:[#allocation5 + $0xa4] ss:$16 sps:$4 sm:$0xff]  }
 0x4ee   : > { %v3241_v20 = vpack.c.bf16 %v3023_v46, %v3019_v63 }
 0x4f0   : > { %3315 = vmatprep.subr.bf16.mxu1 %v3241_v20 }
 0x4f1   : > { %3316 = vmatpush1.bf16.msra.mxu1 %v3240_v21 }
 0x4f2   : > { %v3027_v52 = vpop.f32.mrb[180].mxu1 }
 0x4f3   : > { %v3029_v60 = vpop.f32.mrb[181].mxu1 }
 0x4f4   : > { %v3031_v59 = vpop.f32.mrb[182].mxu1 }
 0x4f5   : > { %v3242_v58 = vpack.c.bf16 %v3031_v59, %v3027_v52  ;;  %v3033_v55 = vpop.f32.mrb[183].mxu1 }
 0x4f6   : > { %v3243_v62 = vpack.c.bf16 %v3033_v55, %v3029_v60  ;;  %v6688_v60 = vld [vmem:[#allocation5 + $0xa0] ss:$16 sps:$4 sm:$0xff]   ;;  %v6689_v55 = vld [vmem:[#allocation5 + $0xc4] ss:$16 sps:$4 sm:$0xff]  }
 0x4f8   : > { %3317 = vmatprep.subr.bf16.mxu1 %v3243_v62 }
 0x4f9   : > { %3318 = vmatpush1.bf16.msra.mxu1 %v3242_v58 }
 0x4fa   : > { %v3037_v36 = vpop.f32.mrb[184].mxu1 }
 0x4fb   : > { %v3039_v19 = vpop.f32.mrb[185].mxu1 }
 0x4fc   : > { %v3041_v18 = vpop.f32.mrb[186].mxu1 }
 0x4fd   : > { %v3244_v17 = vpack.c.bf16 %v3041_v18, %v3037_v36  ;;  %v3043_v16 = vpop.f32.mrb[187].mxu1 }
 0x4fe   : > { %v3245_v15 = vpack.c.bf16 %v3043_v16, %v3039_v19 }
 0x500   : > { %3319 = vmatprep.subr.bf16.mxu1 %v3245_v15 }
 0x501   : > { %3320 = vmatpush1.bf16.msra.mxu1 %v3244_v17  ;;  %v6690_v17 = vld [vmem:[#allocation5 + $0xc0] ss:$16 sps:$4 sm:$0xff]  }
 0x502   : > { %v3047_v27 = vpop.f32.mrb[188].mxu1 }
 0x503   : > { %v3049_v40 = vpop.f32.mrb[189].mxu1 }
 0x504   : > { %v3051_v53 = vpop.f32.mrb[190].mxu1 }
 0x505   : > { %v3246_v11 = vpack.c.bf16 %v3051_v53, %v3047_v27  ;;  %v3053_v10 = vpop.f32.mrb[191].mxu1  ;;  %v6691_v27 = vld [vmem:[#allocation5 + $0xe4] ss:$16 sps:$4 sm:$0xff]  }
 0x506   : > { %v3247_v8 = vpack.c.bf16 %v3053_v10, %v3049_v40 }
 0x508   : > { %3321 = vmatprep.subr.bf16.mxu1 %v3247_v8  ;;  %v6692_v8 = vld [vmem:[#allocation5 + $0xe0] ss:$16 sps:$4 sm:$0xff]  }
 0x509   : > { %3322 = vmatpush1.bf16.msra.mxu1 %v3246_v11 }
 0x50a   : > { %v3057_v7 = vpop.f32.mrb[192].mxu1 }
 0x50b   : > { %v3059_v6 = vpop.f32.mrb[193].mxu1 }
 0x50c   : > { %v3061_v38 = vpop.f32.mrb[194].mxu1  ;;  %3324 = vmatmul.mubr.bf16.vlgmr.msra.gmra.mrb[0].mxu1 %v6678_v57 }
 0x50d   : > { %v3248_v39 = vpack.c.bf16 %v3061_v38, %v3057_v7  ;;  %v3063_v37 = vpop.f32.mrb[195].mxu1  ;;  %3333 = vmatprep.mubr.bf16.mxu1 %v6679_v33  ;;  %v6693_v38 = vld [vmem:[#allocation5 + $0x104] ss:$16 sps:$4 sm:$0xff]  }
 0x50e   : > { %v3249_v32 = vpack.c.bf16 %v3063_v37, %v3059_v6 }
 0x510   : > { %3644 = vmatprep.subr.bf16.mxu1 %v3249_v32  ;;  %v6694_v32 = vld [vmem:[#allocation5 + $0x100] ss:$16 sps:$4 sm:$0xff]  }
 0x511   : > { %3645 = vmatpush1.bf16.msra.mxu1 %v3248_v39 }
 0x512   : > { %v3067_v45 = vpop.f32.mrb[196].mxu1 }
 0x513   : > { %v3069_v54 = vpop.f32.mrb[197].mxu1 }
 0x514   : > { %v3071_v9 = vpop.f32.mrb[198].mxu1  ;;  %3334 = vmatmul.mubr.bf16.gmra.mrb[4].mxu1 %v6680_v26 }
 0x515   : > { %v3250_v24 = vpack.c.bf16 %v3071_v9, %v3067_v45  ;;  %v3073_v23 = vpop.f32.mrb[199].mxu1  ;;  %3343 = vmatprep.mubr.bf16.mxu1 %v6681_v22  ;;  %v6695_v9 = vld [vmem:[#allocation5 + $0x124] ss:$16 sps:$4 sm:$0xff]  }
 0x516   : > { %v3251_v56 = vpack.c.bf16 %v3073_v23, %v3069_v54 }
 0x518   : > { %3646 = vmatprep.subr.bf16.mxu1 %v3251_v56  ;;  %v6696_v56 = vld [vmem:[#allocation5 + $0x120] ss:$16 sps:$4 sm:$0xff]  }
 0x519   : > { %3647 = vmatpush1.bf16.msra.mxu1 %v3250_v24 }
 0x51a   : > { %v3077_v50 = vpop.f32.mrb[200].mxu1 }
 0x51b   : > { %v3079_v14 = vpop.f32.mrb[201].mxu1 }
 0x51c   : > { %v3081_v51 = vpop.f32.mrb[202].mxu1  ;;  %3344 = vmatmul.mubr.bf16.gmra.mrb[8].mxu1 %v6682_v49 }
 0x51d   : > { %v3252_v48 = vpack.c.bf16 %v3081_v51, %v3077_v50  ;;  %v3083_v47 = vpop.f32.mrb[203].mxu1  ;;  %3353 = vmatprep.mubr.bf16.mxu1 %v6683_v61  ;;  %v6697_v51 = vld [vmem:[#allocation5 + $0x144] ss:$16 sps:$4 sm:$0xff]  }
 0x51e   : > { %v3253_v5 = vpack.c.bf16 %v3083_v47, %v3079_v14 }
 0x520   : > { %3648 = vmatprep.subr.bf16.mxu1 %v3253_v5  ;;  %v6698_v5 = vld [vmem:[#allocation5 + $0x140] ss:$16 sps:$4 sm:$0xff]  }
 0x521   : > { %3649 = vmatpush1.bf16.msra.mxu1 %v3252_v48 }
 0x522   : > { %v3087_v30 = vpop.f32.mrb[204].mxu1 }
 0x523   : > { %v3089_v44 = vpop.f32.mrb[205].mxu1 }
 0x524   : > { %v3091_v43 = vpop.f32.mrb[206].mxu1  ;;  %3354 = vmatmul.mubr.bf16.gmra.mrb[12].mxu1 %v6684_v42 }
 0x525   : > { %v3254_v41 = vpack.c.bf16 %v3091_v43, %v3087_v30  ;;  %v3093_v34 = vpop.f32.mrb[207].mxu1  ;;  %3363 = vmatprep.mubr.bf16.mxu1 %v6685_v35  ;;  %v6699_v43 = vld [vmem:[#allocation5 + $0x164] ss:$16 sps:$4 sm:$0xff]  }
 0x526   : > { %v3255_v29 = vpack.c.bf16 %v3093_v34, %v3089_v44 }
 0x528   : > { %3650 = vmatprep.subr.bf16.mxu1 %v3255_v29  ;;  %v6700_v29 = vld [vmem:[#allocation5 + $0x160] ss:$16 sps:$4 sm:$0xff]  }
 0x529   : > { %3651 = vmatpush1.bf16.msra.mxu1 %v3254_v41 }
 0x52a   : > { %v3097_v12 = vpop.f32.mrb[208].mxu1 }
 0x52b   : > { %v3099_v4 = vpop.f32.mrb[209].mxu1 }
 0x52c   : > { %v3101_v3 = vpop.f32.mrb[210].mxu1  ;;  %3364 = vmatmul.mubr.bf16.gmra.mrb[16].mxu1 %v6686_v2 }
 0x52d   : > { %v3256_v1 = vpack.c.bf16 %v3101_v3, %v3097_v12  ;;  %v3103_v63 = vpop.f32.mrb[211].mxu1  ;;  %3373 = vmatprep.mubr.bf16.mxu1 %v6687_v13  ;;  %v6701_v3 = vld [vmem:[#allocation5 + $0x184] ss:$16 sps:$4 sm:$0xff]  }
 0x52e   : > { %v3257_v21 = vpack.c.bf16 %v3103_v63, %v3099_v4 }
 0x530   : > { %3652 = vmatprep.subr.bf16.mxu1 %v3257_v21  ;;  %v6702_v21 = vld [vmem:[#allocation5 + $0x180] ss:$16 sps:$4 sm:$0xff]  }
 0x531   : > { %3653 = vmatpush1.bf16.msra.mxu1 %v3256_v1 }
 0x532   : > { %v3107_v46 = vpop.f32.mrb[212].mxu1 }
 0x533   : > { %v3109_v20 = vpop.f32.mrb[213].mxu1 }
 0x534   : > { %v3111_v52 = vpop.f32.mrb[214].mxu1  ;;  %3374 = vmatmul.mubr.bf16.gmra.mrb[20].mxu1 %v6688_v60 }
 0x535   : > { %v3258_v59 = vpack.c.bf16 %v3111_v52, %v3107_v46  ;;  %v3113_v58 = vpop.f32.mrb[215].mxu1  ;;  %3383 = vmatprep.mubr.bf16.mxu1 %v6689_v55  ;;  %v6703_v52 = vld [vmem:[#allocation5 + $0x1a4] ss:$16 sps:$4 sm:$0xff]  }
 0x536   : > { %v3259_v62 = vpack.c.bf16 %v3113_v58, %v3109_v20 }
 0x538   : > { %3654 = vmatprep.subr.bf16.mxu1 %v3259_v62  ;;  %v6704_v62 = vld [vmem:[#allocation5 + $0x1a0] ss:$16 sps:$4 sm:$0xff]  }
 0x539   : > { %3655 = vmatpush1.bf16.msra.mxu1 %v3258_v59 }
 0x53a   : > { %v3117_v36 = vpop.f32.mrb[216].mxu1 }
 0x53b   : > { %v3119_v19 = vpop.f32.mrb[217].mxu1 }
 0x53c   : > { %v3121_v18 = vpop.f32.mrb[218].mxu1  ;;  %3384 = vmatmul.mubr.bf16.gmra.mrb[24].mxu1 %v6690_v17 }
 0x53d   : > { %v3260_v16 = vpack.c.bf16 %v3121_v18, %v3117_v36  ;;  %v3123_v15 = vpop.f32.mrb[219].mxu1  ;;  %3393 = vmatprep.mubr.bf16.mxu1 %v6691_v27  ;;  %v6705_v18 = vld [vmem:[#allocation5 + $0x1c4] ss:$16 sps:$4 sm:$0xff]  }
 0x53e   : > { %v3261_v40 = vpack.c.bf16 %v3123_v15, %v3119_v19 }
 0x540   : > { %3656 = vmatprep.subr.bf16.mxu1 %v3261_v40  ;;  %v6706_v40 = vld [vmem:[#allocation5 + $0x1c0] ss:$16 sps:$4 sm:$0xff]  }
 0x541   : > { %3657 = vmatpush1.bf16.msra.mxu1 %v3260_v16 }
 0x542   : > { %v3127_v53 = vpop.f32.mrb[220].mxu1 }
 0x543   : > { %v3129_v11 = vpop.f32.mrb[221].mxu1 }
 0x544   : > { %v3131_v10 = vpop.f32.mrb[222].mxu1  ;;  %3394 = vmatmul.mubr.bf16.gmra.mrb[28].mxu1 %v6692_v8 }
 0x545   : > { %v3262_v7 = vpack.c.bf16 %v3131_v10, %v3127_v53  ;;  %v3133_v6 = vpop.f32.mrb[223].mxu1  ;;  %3403 = vmatprep.mubr.bf16.mxu1 %v6693_v38  ;;  %v6707_v10 = vld [vmem:[#allocation5 + $0x1e4] ss:$16 sps:$4 sm:$0xff]  }
 0x546   : > { %v3263_v57 = vpack.c.bf16 %v3133_v6, %v3129_v11 }
 0x548   : > { %3658 = vmatprep.subr.bf16.mxu1 %v3263_v57  ;;  %v6708_v57 = vld [vmem:[#allocation5 + $0x1e0] ss:$16 sps:$4 sm:$0xff]  }
 0x549   : > { %3659 = vmatpush1.bf16.msra.mxu1 %v3262_v7 }
 0x54a   : > { %v3137_v39 = vpop.f32.mrb[224].mxu1 }
 0x54b   : > { %v3139_v37 = vpop.f32.mrb[225].mxu1 }
 0x54c   : > { %v3141_v33 = vpop.f32.mrb[226].mxu1  ;;  %3404 = vmatmul.mubr.bf16.gmra.mrb[32].mxu1 %v6694_v32 }
 0x54d   : > { %v3264_v45 = vpack.c.bf16 %v3141_v33, %v3137_v39  ;;  %v3143_v54 = vpop.f32.mrb[227].mxu1  ;;  %3413 = vmatprep.mubr.bf16.mxu1 %v6695_v9  ;;  %v6709_v33 = vld [vmem:[#allocation5 + $0x204] ss:$16 sps:$4 sm:$0xff]   ;;  %v6712_v9 = vld [vmem:[#allocation5 + $0x220] ss:$16 sps:$4 sm:$0xff]  }
 0x54e   : > { %v3265_v26 = vpack.c.bf16 %v3143_v54, %v3139_v37  ;;  %v6711_v54 = vld [vmem:[#allocation5 + $0x224] ss:$16 sps:$4 sm:$0xff]  }
 0x550   : > { %3660 = vmatprep.subr.bf16.mxu1 %v3265_v26  ;;  %v6713_v26 = vld [vmem:[#allocation5 + $0x244] ss:$16 sps:$4 sm:$0xff]  }
 0x551   : > { %3661 = vmatpush1.bf16.msra.mxu1 %v3264_v45  ;;  %v6710_v45 = vld [vmem:[#allocation5 + $0x200] ss:$16 sps:$4 sm:$0xff]  }
 0x552   : > { %v3147_v24 = vpop.f32.mrb[228].mxu1 }
 0x553   : > { %v3149_v23 = vpop.f32.mrb[229].mxu1 }
 0x554   : > { %v3151_v22 = vpop.f32.mrb[230].mxu1  ;;  %3414 = vmatmul.mubr.bf16.gmra.mrb[36].mxu1 %v6696_v56  ;;  %v6717_v56 = vld [vmem:[#allocation5 + $0x284] ss:$16 sps:$4 sm:$0xff]  }
 0x555   : > { %v3266_v50 = vpack.c.bf16 %v3151_v22, %v3147_v24  ;;  %v3153_v14 = vpop.f32.mrb[231].mxu1  ;;  %3423 = vmatprep.mubr.bf16.mxu1 %v6697_v51  ;;  %v6714_v24 = vld [vmem:[#allocation5 + $0x240] ss:$16 sps:$4 sm:$0xff]  }
 0x556   : > { %v3267_v49 = vpack.c.bf16 %v3153_v14, %v3149_v23  ;;  %v6715_v23 = vld [vmem:[#allocation5 + $0x264] ss:$16 sps:$4 sm:$0xff]   ;;  %v6716_v22 = vld [vmem:[#allocation5 + $0x260] ss:$16 sps:$4 sm:$0xff]  }
 0x557   : > { %v6719_v14 = vld [vmem:[#allocation5 + $0x2a4] ss:$16 sps:$4 sm:$0xff]   ;;  %v6720_v51 = vld [vmem:[#allocation5 + $0x2a0] ss:$16 sps:$4 sm:$0xff]  }
 0x558   : > { %3662 = vmatprep.subr.bf16.mxu1 %v3267_v49  ;;  %v6721_v49 = vld [vmem:[#allocation5 + $0x2c4] ss:$16 sps:$4 sm:$0xff]  }
 0x559   : > { %3663 = vmatpush1.bf16.msra.mxu1 %v3266_v50  ;;  %v6718_v50 = vld [vmem:[#allocation5 + $0x280] ss:$16 sps:$4 sm:$0xff]  }
 0x55a   : > { %v3157_v48 = vpop.f32.mrb[232].mxu1 }
 0x55b   : > { %v3159_v47 = vpop.f32.mrb[233].mxu1 }
 0x55c   : > { %v3161_v61 = vpop.f32.mrb[234].mxu1  ;;  %3424 = vmatmul.mubr.bf16.gmra.mrb[40].mxu1 %v6698_v5  ;;  %v6725_v5 = vld [vmem:[#allocation5 + $0x304] ss:$16 sps:$4 sm:$0xff]  }
 0x55d   : > { %v3268_v30 = vpack.c.bf16 %v3161_v61, %v3157_v48  ;;  %v3163_v44 = vpop.f32.mrb[235].mxu1  ;;  %3433 = vmatprep.mubr.bf16.mxu1 %v6699_v43  ;;  %v6722_v48 = vld [vmem:[#allocation5 + $0x2c0] ss:$16 sps:$4 sm:$0xff]  }
 0x55e   : > { %v3269_v42 = vpack.c.bf16 %v3163_v44, %v3159_v47  ;;  %v6723_v47 = vld [vmem:[#allocation5 + $0x2e4] ss:$16 sps:$4 sm:$0xff]   ;;  %v6724_v61 = vld [vmem:[#allocation5 + $0x2e0] ss:$16 sps:$4 sm:$0xff]  }
 0x55f   : > { %v6727_v44 = vld [vmem:[#allocation5 + $0x324] ss:$16 sps:$4 sm:$0xff]   ;;  %v6728_v43 = vld [vmem:[#allocation5 + $0x320] ss:$16 sps:$4 sm:$0xff]  }
 0x560   : > { %3664 = vmatprep.subr.bf16.mxu1 %v3269_v42  ;;  %v6729_v42 = vld [vmem:[#allocation5 + $0x344] ss:$16 sps:$4 sm:$0xff]  }
 0x561   : > { %3665 = vmatpush1.bf16.msra.mxu1 %v3268_v30  ;;  %v6726_v30 = vld [vmem:[#allocation5 + $0x300] ss:$16 sps:$4 sm:$0xff]  }
 0x562   : > { %v3167_v41 = vpop.f32.mrb[236].mxu1 }
 0x563   : > { %v3169_v34 = vpop.f32.mrb[237].mxu1 }
 0x564   : > { %v3171_v35 = vpop.f32.mrb[238].mxu1  ;;  %3434 = vmatmul.mubr.bf16.gmra.mrb[44].mxu1 %v6700_v29  ;;  %v6733_v29 = vld [vmem:[#allocation5 + $0x384] ss:$16 sps:$4 sm:$0xff]  }
 0x565   : > { %v3270_v12 = vpack.c.bf16 %v3171_v35, %v3167_v41  ;;  %v3173_v4 = vpop.f32.mrb[239].mxu1  ;;  %3443 = vmatprep.mubr.bf16.mxu1 %v6701_v3  ;;  %v6730_v41 = vld [vmem:[#allocation5 + $0x340] ss:$16 sps:$4 sm:$0xff]  }
 0x566   : > { %v3271_v2 = vpack.c.bf16 %v3173_v4, %v3169_v34  ;;  %v6731_v34 = vld [vmem:[#allocation5 + $0x364] ss:$16 sps:$4 sm:$0xff]   ;;  %v6732_v35 = vld [vmem:[#allocation5 + $0x360] ss:$16 sps:$4 sm:$0xff]  }
 0x567   : > { %v6735_v4 = vld [vmem:[#allocation5 + $0x3a4] ss:$16 sps:$4 sm:$0xff]   ;;  %v6736_v3 = vld [vmem:[#allocation5 + $0x3a0] ss:$16 sps:$4 sm:$0xff]  }
 0x568   : > { %3666 = vmatprep.subr.bf16.mxu1 %v3271_v2  ;;  %v6661_v2 = vld [vmem:[#allocation10] sm:$0xff]  }
 0x569   : > { %3667 = vmatpush1.bf16.msra.mxu1 %v3270_v12  ;;  %v6734_v12 = vld [vmem:[#allocation5 + $0x380] ss:$16 sps:$4 sm:$0xff]   ;;  %4319 = vmatpush1.bf16.msra.mxu0 %v6661_v2 }
 0x56a   : > { %v3177_v1 = vpop.f32.mrb[240].mxu1  ;;  %4320 = vmatprep.subr.bf16.mxu0 %v7162_v0 }
 0x56b   : > { %v3179_v63 = vpop.f32.mrb[241].mxu1 }
 0x56c   : > { %v3181_v13 = vpop.f32.mrb[242].mxu1  ;;  %3444 = vmatmul.mubr.bf16.gmra.mrb[48].mxu1 %v6702_v21  ;;  %v6740_v21 = vld [vmem:[#allocation5 + $0x3e0] ss:$16 sps:$4 sm:$0xff]  }
 0x56d   : > { %v3272_v46 = vpack.c.bf16 %v3181_v13, %v3177_v1  ;;  %v3183_v20 = vpop.f32.mrb[243].mxu1  ;;  %3453 = vmatprep.mubr.bf16.mxu1 %v6703_v52  ;;  %v6737_v1 = vld [vmem:[#allocation5 + $0x3c4] ss:$16 sps:$4 sm:$0xff]   ;;  %v6742_v52 = vld [vmem:[#allocation5 + $0x8] ss:$16 sps:$4 sm:$0xff]  }
 0x56e   : > { %v3273_v60 = vpack.c.bf16 %v3183_v20, %v3179_v63  ;;  %v6738_v63 = vld [vmem:[#allocation5 + $0x3c0] ss:$16 sps:$4 sm:$0xff]   ;;  %v6739_v13 = vld [vmem:[#allocation5 + $0x3e4] ss:$16 sps:$4 sm:$0xff]   ;;  %v6741_v20 = vld [vmem:[#allocation5 + $0xc] ss:$16 sps:$4 sm:$0xff]  }
 0x570   : > { %3668 = vmatprep.subr.bf16.mxu1 %v3273_v60  ;;  %v6743_v60 = vld [vmem:[#allocation5 + $0x2c] ss:$16 sps:$4 sm:$0xff]  }
 0x571   : > { %3669 = vmatpush1.bf16.msra.mxu1 %v3272_v46  ;;  %v6662_v46 = vld [vmem:[#allocation10 + $0x8] sm:$0xff]  }
 0x572   : > { %v3187_v59 = vpop.f32.mrb[244].mxu1  ;;  %4321 = vmatpush1.bf16.msra.mxu0 %v6662_v46 }
 0x573   : > { %v3189_v58 = vpop.f32.mrb[245].mxu1  ;;  %4322 = vmatprep.subr.bf16.mxu0 %v7162_v0 }
 0x574   : > { %v3191_v55 = vpop.f32.mrb[246].mxu1  ;;  %3454 = vmatmul.mubr.bf16.gmra.mrb[52].mxu1 %v6704_v62  ;;  %v6746_v62 = vld [vmem:[#allocation5 + $0x48] ss:$16 sps:$4 sm:$0xff]  }
 0x575   : > { %v3274_v36 = vpack.c.bf16 %v3191_v55, %v3187_v59  ;;  %v3193_v19 = vpop.f32.mrb[247].mxu1  ;;  %3463 = vmatprep.mubr.bf16.mxu1 %v6705_v18  ;;  %v6744_v59 = vld [vmem:[#allocation5 + $0x28] ss:$16 sps:$4 sm:$0xff]   ;;  %v6745_v55 = vld [vmem:[#allocation5 + $0x4c] ss:$16 sps:$4 sm:$0xff]  }
 0x576   : > { %v3275_v17 = vpack.c.bf16 %v3193_v19, %v3189_v58  ;;  %v6663_v58 = vld [vmem:[#allocation10 + $0x10] sm:$0xff]   ;;  %v6748_v19 = vld [vmem:[#allocation5 + $0x68] ss:$16 sps:$4 sm:$0xff]  }
 0x577   : > { %4323 = vmatpush1.bf16.msra.mxu0 %v6663_v58  ;;  %v6664_v18 = vld [vmem:[#allocation10 + $0x18] sm:$0xff]  }
 0x578   : > { %3670 = vmatprep.subr.bf16.mxu1 %v3275_v17  ;;  %4324 = vmatprep.subr.bf16.mxu0 %v7162_v0  ;;  %v6749_v17 = vld [vmem:[#allocation5 + $0x8c] ss:$16 sps:$4 sm:$0xff]  }
 0x579   : > { %3671 = vmatpush1.bf16.msra.mxu1 %v3274_v36  ;;  %v6747_v36 = vld [vmem:[#allocation5 + $0x6c] ss:$16 sps:$4 sm:$0xff]  }
 0x57a   : > { %v3197_v16 = vpop.f32.mrb[248].mxu1 }
 0x57b   : > { %v3199_v15 = vpop.f32.mrb[249].mxu1  ;;  %4325 = vmatpush1.bf16.msra.mxu0 %v6664_v18 }
 0x57c   : > { %v3201_v27 = vpop.f32.mrb[250].mxu1  ;;  %3464 = vmatmul.mubr.bf16.gmra.mrb[56].mxu1 %v6706_v40  ;;  %4326 = vmatprep.subr.bf16.mxu0 %v7162_v0  ;;  %v6665_v40 = vld [vmem:[#allocation10 + $0x20] sm:$0xff]  }
 0x57d   : > { %v3276_v53 = vpack.c.bf16 %v3201_v27, %v3197_v16  ;;  %v3203_v11 = vpop.f32.mrb[251].mxu1  ;;  %3473 = vmatprep.mubr.bf16.mxu1 %v6707_v10  ;;  %v6750_v16 = vld [vmem:[#allocation5 + $0x88] ss:$16 sps:$4 sm:$0xff]  }
 0x57e   : > { %v3277_v8 = vpack.c.bf16 %v3203_v11, %v3199_v15  ;;  %v6751_v15 = vld [vmem:[#allocation5 + $0xac] ss:$16 sps:$4 sm:$0xff]   ;;  %v6752_v27 = vld [vmem:[#allocation5 + $0xa8] ss:$16 sps:$4 sm:$0xff]  }
 0x57f   : > { %4327 = vmatpush1.bf16.msra.mxu0 %v6665_v40  ;;  %v6754_v11 = vld [vmem:[#allocation5 + $0xc8] ss:$16 sps:$4 sm:$0xff]  }
 0x580   : > { %3672 = vmatprep.subr.bf16.mxu1 %v3277_v8  ;;  %4328 = vmatprep.subr.bf16.mxu0 %v7162_v0  ;;  %v6666_v10 = vld [vmem:[#allocation10 + $0x28] sm:$0xff]  }
 0x581   : > { %3673 = vmatpush1.bf16.msra.mxu1 %v3276_v53  ;;  %v6753_v53 = vld [vmem:[#allocation5 + $0xcc] ss:$16 sps:$4 sm:$0xff]  }
 0x582   : > { %v3207_v7 = vpop.f32.mrb[252].mxu1  ;;  %v6755_v8 = vld [vmem:[#allocation5 + $0xec] ss:$16 sps:$4 sm:$0xff]  }
 0x583   : > { %v3209_v6 = vpop.f32.mrb[253].mxu1  ;;  %4329 = vmatpush1.bf16.msra.mxu0 %v6666_v10 }
 0x584   : > { %v3211_v38 = vpop.f32.mrb[254].mxu1  ;;  %3474 = vmatmul.mubr.bf16.gmra.mrb[60].mxu1 %v6708_v57  ;;  %4330 = vmatprep.subr.bf16.mxu0 %v7162_v0  ;;  %v6757_v57 = vld [vmem:[#allocation5 + $0x10c] ss:$16 sps:$4 sm:$0xff]  }
 0x585   : > { %v3278_v39 = vpack.c.bf16 %v3211_v38, %v3207_v7  ;;  %v3213_v37 = vpop.f32.mrb[255].mxu1  ;;  %3483 = vmatprep.mubr.bf16.mxu1 %v6709_v33  ;;  %v6667_v7 = vld [vmem:[#allocation10 + $0x30] sm:$0xff]   ;;  %v6668_v38 = vld [vmem:[#allocation10 + $0x38] sm:$0xff]   ;;  %v6670_v33 = vld [vmem:[#allocation10 + $0x48] sm:$0xff]  }
 0x586   : > { %v3279_v32 = vpack.c.bf16 %v3213_v37, %v3209_v6  ;;  %v6756_v6 = vld [vmem:[#allocation5 + $0xe8] ss:$16 sps:$4 sm:$0xff]  }
 0x587   : > { %4331 = vmatpush1.bf16.msra.mxu0 %v6667_v7  ;;  %v6758_v37 = vld [vmem:[#allocation5 + $0x108] ss:$16 sps:$4 sm:$0xff]  }
 0x588   : > { %3674 = vmatprep.subr.bf16.mxu1 %v3279_v32  ;;  %4332 = vmatprep.subr.bf16.mxu0 %v7162_v0  ;;  %v6759_v32 = vld [vmem:[#allocation5 + $0x12c] ss:$16 sps:$4 sm:$0xff]  }
 0x589   : > { %3675 = vmatpush1.bf16.msra.mxu1 %v3278_v39  ;;  %v6669_v39 = vld [vmem:[#allocation10 + $0x40] sm:$0xff]  }
 0x58a   : > { %5661 = vmatprep.subr.bf16.mxu1 %v7162_v0 }
 0x58b   : > { %4333 = vmatpush1.bf16.msra.mxu0 %v6668_v38 }
 0x58c   : > { %3484 = vmatmul.mubr.bf16.gmra.mrb[64].mxu1 %v6710_v45  ;;  %4334 = vmatprep.subr.bf16.mxu0 %v7162_v0  ;;  %v6671_v45 = vld [vmem:[#allocation10 + $0x50] sm:$0xff]  }
 0x58d   : > { %3493 = vmatprep.mubr.bf16.mxu1 %v6711_v54  ;;  %v6760_v54 = vld [vmem:[#allocation5 + $0x128] ss:$16 sps:$4 sm:$0xff]  }
 0x58f   : > { %4335 = vmatpush1.bf16.msra.mxu0 %v6669_v39 }
 0x590   : > { %4336 = vmatprep.subr.bf16.mxu0 %v7162_v0 }
 0x593   : > { %4337 = vmatpush1.bf16.msra.mxu0 %v6670_v33 }
 0x594   : > { %3494 = vmatmul.mubr.bf16.gmra.mrb[68].mxu1 %v6712_v9  ;;  %4338 = vmatprep.subr.bf16.mxu0 %v7162_v0  ;;  %v6672_v9 = vld [vmem:[#allocation10 + $0x58] sm:$0xff]  }
 0x595   : > { %3503 = vmatprep.mubr.bf16.mxu1 %v6713_v26  ;;  %v6761_v26 = vld [vmem:[#allocation5 + $0x14c] ss:$16 sps:$4 sm:$0xff]  }
 0x597   : > { %4339 = vmatpush1.bf16.msra.mxu0 %v6671_v45 }
 0x598   : > { %4340 = vmatprep.subr.bf16.mxu0 %v7162_v0 }
 0x59b   : > { %4341 = vmatpush1.bf16.msra.mxu0 %v6672_v9 }
 0x59c   : > { %3504 = vmatmul.mubr.bf16.gmra.mrb[72].mxu1 %v6714_v24  ;;  %v6673_v24 = vld [vmem:[#allocation10 + $0x60] sm:$0xff]   ;;  %4342 = vmatprep.subr.bf16.mxu0 %v7162_v0 }
 0x59d   : > { %3513 = vmatprep.mubr.bf16.mxu1 %v6715_v23  ;;  %v6762_v23 = vld [vmem:[#allocation5 + $0x148] ss:$16 sps:$4 sm:$0xff]  }
 0x59f   : > { %4343 = vmatpush1.bf16.msra.mxu0 %v6673_v24 }
 0x5a0   : > { %4344 = vmatprep.subr.bf16.mxu0 %v7162_v0 }
 0x5a4   : > { %3514 = vmatmul.mubr.bf16.gmra.mrb[76].mxu1 %v6716_v22  ;;  %v6763_v22 = vld [vmem:[#allocation5 + $0x16c] ss:$16 sps:$4 sm:$0xff]  }
 0x5a5   : > { %3523 = vmatprep.mubr.bf16.mxu1 %v6717_v56  ;;  %v6674_v56 = vld [vmem:[#allocation10 + $0x68] sm:$0xff]  }
 0x5a6   : > { %4345 = vmatpush1.bf16.msra.mxu0 %v6674_v56 }
 0x5a7   : > { %4346 = vmatprep.subr.bf16.mxu0 %v7162_v0 }
 0x5ac   : > { %3524 = vmatmul.mubr.bf16.gmra.mrb[80].mxu1 %v6718_v50  ;;  %v6675_v50 = vld [vmem:[#allocation10 + $0x70] sm:$0xff]  }
 0x5ad   : > { %3533 = vmatprep.mubr.bf16.mxu1 %v6719_v14  ;;  %4347 = vmatpush1.bf16.msra.mxu0 %v6675_v50  ;;  %v6764_v14 = vld [vmem:[#allocation5 + $0x168] ss:$16 sps:$4 sm:$0xff]  }
 0x5ae   : > { %4348 = vmatprep.subr.bf16.mxu0 %v7162_v0 }
 0x5b4   : > { %3534 = vmatmul.mubr.bf16.gmra.mrb[84].mxu1 %v6720_v51  ;;  %v6765_v51 = vld [vmem:[#allocation5 + $0x18c] ss:$16 sps:$4 sm:$0xff]  }
 0x5b5   : > { %3543 = vmatprep.mubr.bf16.mxu1 %v6721_v49  ;;  %v6676_v49 = vld [vmem:[#allocation10 + $0x78] sm:$0xff]  }
 0x5b6   : > { %4349 = vmatpush1.bf16.msra.mxu0 %v6676_v49 }
 0x5b7   : > { %4645 = vmatprep.subr.bf16.mxu0 %v7162_v0 }
 0x5bc   : > { %3544 = vmatmul.mubr.bf16.gmra.mrb[88].mxu1 %v6722_v48  ;;  %v6766_v48 = vld [vmem:[#allocation5 + $0x188] ss:$16 sps:$4 sm:$0xff]  }
 0x5bd   : > { %3553 = vmatprep.mubr.bf16.mxu1 %v6723_v47  ;;  %v6767_v47 = vld [vmem:[#allocation5 + $0x1ac] ss:$16 sps:$4 sm:$0xff]  }
 0x5c4   : > { %3554 = vmatmul.mubr.bf16.gmra.mrb[92].mxu1 %v6724_v61  ;;  %v6768_v61 = vld [vmem:[#allocation5 + $0x1a8] ss:$16 sps:$4 sm:$0xff]  }
 0x5c5   : > { %3563 = vmatprep.mubr.bf16.mxu1 %v6725_v5  ;;  %v6769_v5 = vld [vmem:[#allocation5 + $0x1cc] ss:$16 sps:$4 sm:$0xff]  }
 0x5cc   : > { %3564 = vmatmul.mubr.bf16.gmra.mrb[96].mxu1 %v6726_v30  ;;  %v6770_v30 = vld [vmem:[#allocation5 + $0x1c8] ss:$16 sps:$4 sm:$0xff]  }
 0x5cd   : > { %3573 = vmatprep.mubr.bf16.mxu1 %v6727_v44  ;;  %v6771_v44 = vld [vmem:[#allocation5 + $0x1ec] ss:$16 sps:$4 sm:$0xff]  }
 0x5d4   : > { %3574 = vmatmul.mubr.bf16.gmra.mrb[100].mxu1 %v6728_v43  ;;  %v6772_v43 = vld [vmem:[#allocation5 + $0x1e8] ss:$16 sps:$4 sm:$0xff]  }
 0x5d5   : > { %3583 = vmatprep.mubr.bf16.mxu1 %v6729_v42  ;;  %v6773_v42 = vld [vmem:[#allocation5 + $0x20c] ss:$16 sps:$4 sm:$0xff]  }
 0x5dc   : > { %3584 = vmatmul.mubr.bf16.gmra.mrb[104].mxu1 %v6730_v41  ;;  %v6774_v41 = vld [vmem:[#allocation5 + $0x208] ss:$16 sps:$4 sm:$0xff]  }
 0x5dd   : > { %3593 = vmatprep.mubr.bf16.mxu1 %v6731_v34  ;;  %v6775_v34 = vld [vmem:[#allocation5 + $0x22c] ss:$16 sps:$4 sm:$0xff]  }
 0x5e4   : > { %3594 = vmatmul.mubr.bf16.gmra.mrb[108].mxu1 %v6732_v35  ;;  %v6776_v35 = vld [vmem:[#allocation5 + $0x228] ss:$16 sps:$4 sm:$0xff]  }
 0x5e5   : > { %3603 = vmatprep.mubr.bf16.mxu1 %v6733_v29  ;;  %v6777_v29 = vld [vmem:[#allocation5 + $0x24c] ss:$16 sps:$4 sm:$0xff]  }
 0x5ec   : > { %3604 = vmatmul.mubr.bf16.gmra.mrb[112].mxu1 %v6734_v12  ;;  %v6778_v12 = vld [vmem:[#allocation5 + $0x248] ss:$16 sps:$4 sm:$0xff]  }
 0x5ed   : > { %3613 = vmatprep.mubr.bf16.mxu1 %v6735_v4  ;;  %v6779_v4 = vld [vmem:[#allocation5 + $0x26c] ss:$16 sps:$4 sm:$0xff]  }
 0x5f4   : > { %3614 = vmatmul.mubr.bf16.gmra.mrb[116].mxu1 %v6736_v3  ;;  %v6780_v3 = vld [vmem:[#allocation5 + $0x268] ss:$16 sps:$4 sm:$0xff]  }
 0x5f5   : > { %3623 = vmatprep.mubr.bf16.mxu1 %v6737_v1  ;;  %v6782_v1 = vld [vmem:[#allocation5 + $0x288] ss:$16 sps:$4 sm:$0xff]  }
 0x5fc   : > { %3624 = vmatmul.mubr.bf16.gmra.mrb[120].mxu1 %v6738_v63  ;;  %v6783_v63 = vld [vmem:[#allocation5 + $0x2ac] ss:$16 sps:$4 sm:$0xff]  }
 0x5fd   : > { %3633 = vmatprep.mubr.bf16.mxu1 %v6739_v13  ;;  %v6784_v13 = vld [vmem:[#allocation5 + $0x2a8] ss:$16 sps:$4 sm:$0xff]  }
 0x604   : > { %3634 = vmatmul.mubr.bf16.gmra.mrb[124].mxu1 %v6740_v21  ;;  %v6785_v21 = vld [vmem:[#allocation5 + $0x2cc] ss:$16 sps:$4 sm:$0xff]  }
 0x605   : > { %3676 = vmatprep.mubr.bf16.mxu1 %v6741_v20  ;;  %v6787_v20 = vld [vmem:[#allocation5 + $0x2ec] ss:$16 sps:$4 sm:$0xff]  }
 0x60c   : > { %3677 = vmatmul.mubr.bf16.vlgmr.msra.gmra.mrb[0].mxu1 %v6742_v52  ;;  %v6788_v52 = vld [vmem:[#allocation5 + $0x2e8] ss:$16 sps:$4 sm:$0xff]  }
 0x60d   : > { %3686 = vmatprep.mubr.bf16.mxu1 %v6743_v60  ;;  %5677 = vmatpush1.bf16.msra.mxu1 %v6661_v2  ;;  %v6781_v2 = vld [vmem:[#allocation5 + $0x28c] ss:$16 sps:$4 sm:$0xff]  }
 0x60e   : > { %5662 = vmatprep.subr.bf16.mxu1 %v7162_v0  ;;  %v6789_v60 = vld [vmem:[#allocation5 + $0x30c] ss:$16 sps:$4 sm:$0xff]  }
 0x611   : > { %5678 = vmatpush1.bf16.msra.mxu1 %v6662_v46  ;;  %v6786_v46 = vld [vmem:[#allocation5 + $0x2c8] ss:$16 sps:$4 sm:$0xff]  }
 0x612   : > { %5663 = vmatprep.subr.bf16.mxu1 %v7162_v0 }
 0x614   : > { %3687 = vmatmul.mubr.bf16.gmra.mrb[4].mxu1 %v6744_v59  ;;  %v6790_v59 = vld [vmem:[#allocation5 + $0x308] ss:$16 sps:$4 sm:$0xff]  }
 0x615   : > { %3696 = vmatprep.mubr.bf16.mxu1 %v6745_v55  ;;  %5679 = vmatpush1.bf16.msra.mxu1 %v6663_v58  ;;  %v6791_v58 = vld [vmem:[#allocation5 + $0x32c] ss:$16 sps:$4 sm:$0xff]   ;;  %v6792_v55 = vld [vmem:[#allocation5 + $0x328] ss:$16 sps:$4 sm:$0xff]  }
 0x616   : > { %5664 = vmatprep.subr.bf16.mxu1 %v7162_v0 }
 0x619   : > { %5680 = vmatpush1.bf16.msra.mxu1 %v6664_v18 }
 0x61a   : > { %5665 = vmatprep.subr.bf16.mxu1 %v7162_v0 }
 0x61c   : > { %3697 = vmatmul.mubr.bf16.gmra.mrb[8].mxu1 %v6746_v62  ;;  %v6793_v62 = vld [vmem:[#allocation5 + $0x34c] ss:$16 sps:$4 sm:$0xff]  }
 0x61d   : > { %3706 = vmatprep.mubr.bf16.mxu1 %v6747_v36  ;;  %5681 = vmatpush1.bf16.msra.mxu1 %v6665_v40  ;;  %v2702_v36 = vld [vmem:[%s8160_s6] sm:$0x3] }
 0x61e   : > { %5666 = vmatprep.subr.bf16.mxu1 %v7162_v0  ;;  %v7802_v18 = vrot.slane %v2702_v36, %v2037_v28 }
 0x621   : > { %5682 = vmatpush1.bf16.msra.mxu1 %v6666_v10 }
 0x622   : > { %5667 = vmatprep.subr.bf16.mxu1 %v7162_v0 }
 0x624   : > { %3707 = vmatmul.mubr.bf16.gmra.mrb[12].mxu1 %v6748_v19  ;;  %v6794_v19 = vld [vmem:[#allocation5 + $0x348] ss:$16 sps:$4 sm:$0xff]  }
 0x625   : > { %3716 = vmatprep.mubr.bf16.mxu1 %v6749_v17  ;;  %5683 = vmatpush1.bf16.msra.mxu1 %v6667_v7  ;;  %v7806_v17 = vrot.slane %v2702_v36, %v2041_v31  ;;  %v6802_v36 = vld [vmem:[#allocation5 + $0x3c8] ss:$16 sps:$4 sm:$0xff]  }
 0x626   : > { %5668 = vmatprep.subr.bf16.mxu1 %v7162_v0 }
 0x629   : > { %5684 = vmatpush1.bf16.msra.mxu1 %v6668_v38  ;;  %v6796_v38 = vld [vmem:[#allocation5 + $0x368] ss:$16 sps:$4 sm:$0xff]  }
 0x62a   : > { %5669 = vmatprep.subr.bf16.mxu1 %v7162_v0 }
 0x62c   : > { %3717 = vmatmul.mubr.bf16.gmra.mrb[16].mxu1 %v6750_v16  ;;  %v6795_v16 = vld [vmem:[#allocation5 + $0x36c] ss:$16 sps:$4 sm:$0xff]  }
 0x62d   : > { %3726 = vmatprep.mubr.bf16.mxu1 %v6751_v15  ;;  %5685 = vmatpush1.bf16.msra.mxu1 %v6669_v39 }
 0x62e   : > { %5670 = vmatprep.subr.bf16.mxu1 %v7162_v0 }
 0x631   : > { %5686 = vmatpush1.bf16.msra.mxu1 %v6670_v33 }
 0x632   : > { %5671 = vmatprep.subr.bf16.mxu1 %v7162_v0 }
 0x634   : > { %3727 = vmatmul.mubr.bf16.gmra.mrb[20].mxu1 %v6752_v27 }
 0x635   : > { %3736 = vmatprep.mubr.bf16.mxu1 %v6753_v53  ;;  %5687 = vmatpush1.bf16.msra.mxu1 %v6671_v45 }
 0x636   : > { %5672 = vmatprep.subr.bf16.mxu1 %v7162_v0 }
 0x639   : > { %5688 = vmatpush1.bf16.msra.mxu1 %v6672_v9 }
 0x63a   : > { %5673 = vmatprep.subr.bf16.mxu1 %v7162_v0 }
 0x63c   : > { %3737 = vmatmul.mubr.bf16.gmra.mrb[24].mxu1 %v6754_v11 }
 0x63d   : > { %3746 = vmatprep.mubr.bf16.mxu1 %v6755_v8  ;;  %5689 = vmatpush1.bf16.msra.mxu1 %v6673_v24 }
 0x63e   : > { %5674 = vmatprep.subr.bf16.mxu1 %v7162_v0 }
 0x641   : > { %5690 = vmatpush1.bf16.msra.mxu1 %v6674_v56 }
 0x642   : > { %5675 = vmatprep.subr.bf16.mxu1 %v7162_v0 }
 0x644   : > { %3747 = vmatmul.mubr.bf16.gmra.mrb[28].mxu1 %v6756_v6 }
 0x645   : > { %3756 = vmatprep.mubr.bf16.mxu1 %v6757_v57  ;;  %5691 = vmatpush1.bf16.msra.mxu1 %v6675_v50  ;;  %v6797_v57 = vld [vmem:[#allocation5 + $0x38c] ss:$16 sps:$4 sm:$0xff]   ;;  %v6798_v50 = vld [vmem:[#allocation5 + $0x388] ss:$16 sps:$4 sm:$0xff]  }
 0x646   : > { %5676 = vmatprep.subr.bf16.mxu1 %v7162_v0 }
 0x649   : > { %5692 = vmatpush1.bf16.msra.mxu1 %v6676_v49  ;;  %v6799_v49 = vld [vmem:[#allocation5 + $0x3ac] ss:$16 sps:$4 sm:$0xff]  }
 0x64c   : > { %3757 = vmatmul.mubr.bf16.gmra.mrb[32].mxu1 %v6758_v37 }
 0x64d   : > { %3766 = vmatprep.mubr.bf16.mxu1 %v6759_v32 }
 0x654   : > { %3767 = vmatmul.mubr.bf16.gmra.mrb[36].mxu1 %v6760_v54 }
 0x655   : > { %3776 = vmatprep.mubr.bf16.mxu1 %v6761_v26 }
 0x65c   : > { %3777 = vmatmul.mubr.bf16.gmra.mrb[40].mxu1 %v6762_v23 }
 0x65d   : > { %3786 = vmatprep.mubr.bf16.mxu1 %v6763_v22 }
 0x664   : > { %3787 = vmatmul.mubr.bf16.gmra.mrb[44].mxu1 %v6764_v14 }
 0x665   : > { %3796 = vmatprep.mubr.bf16.mxu1 %v6765_v51 }
 0x66c   : > { %3797 = vmatmul.mubr.bf16.gmra.mrb[48].mxu1 %v6766_v48 }
 0x66d   : > { %3806 = vmatprep.mubr.bf16.mxu1 %v6767_v47 }
 0x674   : > { %3807 = vmatmul.mubr.bf16.gmra.mrb[52].mxu1 %v6768_v61 }
 0x675   : > { %3816 = vmatprep.mubr.bf16.mxu1 %v6769_v5 }
 0x67c   : > { %3817 = vmatmul.mubr.bf16.gmra.mrb[56].mxu1 %v6770_v30 }
 0x67d   : > { %3826 = vmatprep.mubr.bf16.mxu1 %v6771_v44 }
 0x684   : > { %3827 = vmatmul.mubr.bf16.gmra.mrb[60].mxu1 %v6772_v43 }
 0x685   : > { %3836 = vmatprep.mubr.bf16.mxu1 %v6773_v42 }
 0x68c   : > { %3837 = vmatmul.mubr.bf16.gmra.mrb[64].mxu1 %v6774_v41 }
 0x68d   : > { %3846 = vmatprep.mubr.bf16.mxu1 %v6775_v34 }
 0x694   : > { %3847 = vmatmul.mubr.bf16.gmra.mrb[68].mxu1 %v6776_v35 }
 0x695   : > { %3856 = vmatprep.mubr.bf16.mxu1 %v6777_v29 }
 0x69c   : > { %3857 = vmatmul.mubr.bf16.gmra.mrb[72].mxu1 %v6778_v12  ;;  %v6800_v12 = vld [vmem:[#allocation5 + $0x3a8] ss:$16 sps:$4 sm:$0xff]  }
 0x69d   : > { %3866 = vmatprep.mubr.bf16.mxu1 %v6779_v4 }
 0x6a4   : > { %3867 = vmatmul.mubr.bf16.gmra.mrb[76].mxu1 %v6780_v3 }
 0x6a5   : > { %3876 = vmatprep.mubr.bf16.mxu1 %v6781_v2  ;;  %v6801_v2 = vld [vmem:[#allocation5 + $0x3cc] ss:$16 sps:$4 sm:$0xff]  }
 0x6ac   : > { %3877 = vmatmul.mubr.bf16.gmra.mrb[80].mxu1 %v6782_v1 }
 0x6ad   : > { %3886 = vmatprep.mubr.bf16.mxu1 %v6783_v63 }
 0x6b4   : > { %3887 = vmatmul.mubr.bf16.gmra.mrb[84].mxu1 %v6784_v13 }
 0x6b5   : > { %3896 = vmatprep.mubr.bf16.mxu1 %v6785_v21 }
 0x6bc   : > { %3897 = vmatmul.mubr.bf16.gmra.mrb[88].mxu1 %v6786_v46 }
 0x6bd   : > { %3906 = vmatprep.mubr.bf16.mxu1 %v6787_v20 }
 0x6c4   : > { %3907 = vmatmul.mubr.bf16.gmra.mrb[92].mxu1 %v6788_v52 }
 0x6c5   : > { %3916 = vmatprep.mubr.bf16.mxu1 %v6789_v60 }
 0x6cc   : > { %3917 = vmatmul.mubr.bf16.gmra.mrb[96].mxu1 %v6790_v59 }
 0x6cd   : > { %3926 = vmatprep.mubr.bf16.mxu1 %v6791_v58 }
 0x6d4   : > { %3927 = vmatmul.mubr.bf16.gmra.mrb[100].mxu1 %v6792_v55 }
 0x6d5   : > { %3936 = vmatprep.mubr.bf16.mxu1 %v6793_v62 }
 0x6dc   : > { %3937 = vmatmul.mubr.bf16.gmra.mrb[104].mxu1 %v6794_v19 }
 0x6dd   : > { %3946 = vmatprep.mubr.bf16.mxu1 %v6795_v16 }
 0x6df   : > { %v3678_v15 = vpop.f32.mrb[0].mxu1 }
 0x6e0   : > { %v5693_v27 = vadd.f32 %v3678_v15, %v7802_v18  ;;  %v3680_v40 = vpop.f32.mrb[1].mxu1  ;;  %v6803_v15 = vld [vmem:[#allocation5 + $0x3ec] ss:$16 sps:$4 sm:$0xff]  }
 0x6e1   : > { %v5694_v53 = vadd.f32 %v3680_v40, %v7806_v17  ;;  %v3682_v11 = vpop.f32.mrb[2].mxu1 }
 0x6e2   : > { %v5695_v10 = vadd.f32 %v3682_v11, %v7802_v18  ;;  %v3684_v8 = vpop.f32.mrb[3].mxu1  ;;  %v3997_v28 = vmax.f32 %v5693_v27, 0.0 }
 0x6e3   : > { %v5696_v7 = vadd.f32 %v3684_v8, %v7806_v17  ;;  %v3998_v25 = vmax.f32 %v5694_v53, 0.0 }
 0x6e4   : > { %v3999_v6 = vmax.f32 %v5695_v10, 0.0  ;;  %3947 = vmatmul.mubr.bf16.gmra.mrb[108].mxu1 %v6796_v38 }
 0x6e5   : > { %v4000_v31 = vmax.f32 %v5696_v7, 0.0  ;;  %3956 = vmatprep.mubr.bf16.mxu1 %v6797_v57  ;;  %v6804_v57 = vld [vmem:[#allocation5 + $0x3e8] ss:$16 sps:$4 sm:$0xff]  }
 0x6e6   : > { %v4125_v39 = vpack.c.bf16 %v3999_v6, %v3997_v28 }
 0x6e7   : > { %v4126_v37 = vpack.c.bf16 %v4000_v31, %v3998_v25  ;;  %v3688_v33 = vpop.f32.mrb[4].mxu1 }
 0x6e8   : > { %v5697_v32 = vadd.f32 %v3688_v33, %v7802_v18  ;;  %v3690_v45 = vpop.f32.mrb[5].mxu1 }
 0x6e9   : > { %v5698_v54 = vadd.f32 %v3690_v45, %v7806_v17  ;;  %v3692_v9 = vpop.f32.mrb[6].mxu1  ;;  %4350 = vmatprep.mubr.bf16.mxu0 %v4126_v37 }
 0x6ea   : > { %v5699_v26 = vadd.f32 %v3692_v9, %v7802_v18  ;;  %v3694_v24 = vpop.f32.mrb[7].mxu1  ;;  %4351 = vmatmul.mubr.bf16.vlgmr.msra.gmra.mrb[128].mxu0 %v4125_v39  ;;  %v4001_v22 = vmax.f32 %v5697_v32, 0.0 }
 0x6eb   : > { %v5700_v23 = vadd.f32 %v3694_v24, %v7806_v17  ;;  %v4002_v14 = vmax.f32 %v5698_v54, 0.0 }
 0x6ec   : > { %v4003_v56 = vmax.f32 %v5699_v26, 0.0  ;;  %3957 = vmatmul.mubr.bf16.gmra.mrb[112].mxu1 %v6798_v50 }
 0x6ed   : > { %v4004_v51 = vmax.f32 %v5700_v23, 0.0  ;;  %3966 = vmatprep.mubr.bf16.mxu1 %v6799_v49 }
 0x6ee   : > { %v4127_v48 = vpack.c.bf16 %v4003_v56, %v4001_v22 }
 0x6ef   : > { %v4128_v47 = vpack.c.bf16 %v4004_v51, %v4002_v14  ;;  %v3698_v61 = vpop.f32.mrb[8].mxu1 }
 0x6f0   : > { %v5701_v5 = vadd.f32 %v3698_v61, %v7802_v18  ;;  %v3700_v30 = vpop.f32.mrb[9].mxu1 }
 0x6f1   : > { %v5702_v44 = vadd.f32 %v3700_v30, %v7806_v17  ;;  %v3702_v43 = vpop.f32.mrb[10].mxu1  ;;  %4358 = vmatprep.mubr.bf16.mxu0 %v4128_v47 }
 0x6f2   : > { %v5703_v42 = vadd.f32 %v3702_v43, %v7802_v18  ;;  %v3704_v41 = vpop.f32.mrb[11].mxu1  ;;  %4359 = vmatmul.mubr.bf16.gmra.mrb[132].mxu0 %v4127_v48  ;;  %v4005_v35 = vmax.f32 %v5701_v5, 0.0 }
 0x6f3   : > { %v5704_v34 = vadd.f32 %v3704_v41, %v7806_v17  ;;  %v4006_v4 = vmax.f32 %v5702_v44, 0.0 }
 0x6f4   : > { %v4007_v29 = vmax.f32 %v5703_v42, 0.0  ;;  %3967 = vmatmul.mubr.bf16.gmra.mrb[116].mxu1 %v6800_v12 }
 0x6f5   : > { %v4008_v3 = vmax.f32 %v5704_v34, 0.0  ;;  %3976 = vmatprep.mubr.bf16.mxu1 %v6801_v2 }
 0x6f6   : > { %v4129_v1 = vpack.c.bf16 %v4007_v29, %v4005_v35 }
 0x6f7   : > { %v4130_v63 = vpack.c.bf16 %v4008_v3, %v4006_v4  ;;  %v3708_v13 = vpop.f32.mrb[12].mxu1 }
 0x6f8   : > { %v5705_v21 = vadd.f32 %v3708_v13, %v7802_v18  ;;  %v3710_v46 = vpop.f32.mrb[13].mxu1 }
 0x6f9   : > { %v5706_v20 = vadd.f32 %v3710_v46, %v7806_v17  ;;  %v3712_v52 = vpop.f32.mrb[14].mxu1  ;;  %4366 = vmatprep.mubr.bf16.mxu0 %v4130_v63 }
 0x6fa   : > { %v5707_v60 = vadd.f32 %v3712_v52, %v7802_v18  ;;  %v3714_v59 = vpop.f32.mrb[15].mxu1  ;;  %4367 = vmatmul.mubr.bf16.gmra.mrb[136].mxu0 %v4129_v1  ;;  %v4009_v55 = vmax.f32 %v5705_v21, 0.0 }
 0x6fb   : > { %v5708_v58 = vadd.f32 %v3714_v59, %v7806_v17  ;;  %v4010_v19 = vmax.f32 %v5706_v20, 0.0 }
 0x6fc   : > { %v4011_v62 = vmax.f32 %v5707_v60, 0.0  ;;  %3977 = vmatmul.mubr.bf16.gmra.mrb[120].mxu1 %v6802_v36 }
 0x6fd   : > { %v4012_v16 = vmax.f32 %v5708_v58, 0.0  ;;  %3986 = vmatprep.mubr.bf16.mxu1 %v6803_v15 }
 0x6fe   : > { %v4131_v27 = vpack.c.bf16 %v4011_v62, %v4009_v55 }
 0x6ff   : > { %v4132_v40 = vpack.c.bf16 %v4012_v16, %v4010_v19  ;;  %v3718_v53 = vpop.f32.mrb[16].mxu1 }
 0x700   : > { %v5709_v11 = vadd.f32 %v3718_v53, %v7802_v18  ;;  %v3720_v10 = vpop.f32.mrb[17].mxu1 }
 0x701   : > { %v5710_v8 = vadd.f32 %v3720_v10, %v7806_v17  ;;  %v3722_v7 = vpop.f32.mrb[18].mxu1  ;;  %4374 = vmatprep.mubr.bf16.mxu0 %v4132_v40 }
 0x702   : > { %v5711_v28 = vadd.f32 %v3722_v7, %v7802_v18  ;;  %v3724_v6 = vpop.f32.mrb[19].mxu1  ;;  %4375 = vmatmul.mubr.bf16.gmra.mrb[140].mxu0 %v4131_v27  ;;  %v4013_v25 = vmax.f32 %v5709_v11, 0.0 }
 0x703   : > { %v5712_v38 = vadd.f32 %v3724_v6, %v7806_v17  ;;  %v4014_v39 = vmax.f32 %v5710_v8, 0.0 }
 0x704   : > { %v4015_v31 = vmax.f32 %v5711_v28, 0.0  ;;  %3987 = vmatmul.mubr.bf16.gmra.mrb[124].mxu1 %v6804_v57 }
 0x705   : > { %v4016_v37 = vmax.f32 %v5712_v38, 0.0 }
 0x706   : > { %v4133_v33 = vpack.c.bf16 %v4015_v31, %v4013_v25 }
 0x707   : > { %v4134_v32 = vpack.c.bf16 %v4016_v37, %v4014_v39  ;;  %v3728_v45 = vpop.f32.mrb[20].mxu1 }
 0x708   : > { %v5713_v54 = vadd.f32 %v3728_v45, %v7802_v18  ;;  %v3730_v9 = vpop.f32.mrb[21].mxu1 }
 0x709   : > { %v5714_v26 = vadd.f32 %v3730_v9, %v7806_v17  ;;  %v3732_v24 = vpop.f32.mrb[22].mxu1  ;;  %4382 = vmatprep.mubr.bf16.mxu0 %v4134_v32 }
 0x70a   : > { %v5715_v23 = vadd.f32 %v3732_v24, %v7802_v18  ;;  %v3734_v22 = vpop.f32.mrb[23].mxu1  ;;  %4383 = vmatmul.mubr.bf16.gmra.mrb[144].mxu0 %v4133_v33  ;;  %v4017_v50 = vmax.f32 %v5713_v54, 0.0 }
 0x70b   : > { %v5716_v56 = vadd.f32 %v3734_v22, %v7806_v17  ;;  %v4018_v51 = vmax.f32 %v5714_v26, 0.0 }
 0x70c   : > { %v4019_v14 = vmax.f32 %v5715_v23, 0.0 }
 0x70d   : > { %v4020_v49 = vmax.f32 %v5716_v56, 0.0 }
 0x70e   : > { %v4135_v48 = vpack.c.bf16 %v4019_v14, %v4017_v50 }
 0x70f   : > { %v4136_v47 = vpack.c.bf16 %v4020_v49, %v4018_v51  ;;  %v3738_v61 = vpop.f32.mrb[24].mxu1 }
 0x710   : > { %v5717_v5 = vadd.f32 %v3738_v61, %v7802_v18  ;;  %v3740_v30 = vpop.f32.mrb[25].mxu1 }
 0x711   : > { %v5718_v44 = vadd.f32 %v3740_v30, %v7806_v17  ;;  %v3742_v43 = vpop.f32.mrb[26].mxu1  ;;  %4390 = vmatprep.mubr.bf16.mxu0 %v4136_v47 }
 0x712   : > { %v5719_v42 = vadd.f32 %v3742_v43, %v7802_v18  ;;  %v3744_v41 = vpop.f32.mrb[27].mxu1  ;;  %4391 = vmatmul.mubr.bf16.gmra.mrb[148].mxu0 %v4135_v48  ;;  %v4021_v35 = vmax.f32 %v5717_v5, 0.0 }
 0x713   : > { %v5720_v34 = vadd.f32 %v3744_v41, %v7806_v17  ;;  %v4022_v12 = vmax.f32 %v5718_v44, 0.0 }
 0x714   : > { %v4023_v29 = vmax.f32 %v5719_v42, 0.0 }
 0x715   : > { %v4024_v4 = vmax.f32 %v5720_v34, 0.0 }
 0x716   : > { %v4137_v3 = vpack.c.bf16 %v4023_v29, %v4021_v35 }
 0x717   : > { %v4138_v2 = vpack.c.bf16 %v4024_v4, %v4022_v12  ;;  %v3748_v1 = vpop.f32.mrb[28].mxu1 }
 0x718   : > { %v5721_v63 = vadd.f32 %v3748_v1, %v7802_v18  ;;  %v3750_v13 = vpop.f32.mrb[29].mxu1 }
 0x719   : > { %v5722_v21 = vadd.f32 %v3750_v13, %v7806_v17  ;;  %v3752_v46 = vpop.f32.mrb[30].mxu1  ;;  %4398 = vmatprep.mubr.bf16.mxu0 %v4138_v2 }
 0x71a   : > { %v5723_v20 = vadd.f32 %v3752_v46, %v7802_v18  ;;  %v3754_v52 = vpop.f32.mrb[31].mxu1  ;;  %4399 = vmatmul.mubr.bf16.gmra.mrb[152].mxu0 %v4137_v3  ;;  %v4025_v59 = vmax.f32 %v5721_v63, 0.0 }
 0x71b   : > { %v5724_v60 = vadd.f32 %v3754_v52, %v7806_v17  ;;  %v4026_v55 = vmax.f32 %v5722_v21, 0.0 }
 0x71c   : > { %v4027_v58 = vmax.f32 %v5723_v20, 0.0 }
 0x71d   : > { %v4028_v62 = vmax.f32 %v5724_v60, 0.0 }
 0x71e   : > { %v4139_v36 = vpack.c.bf16 %v4027_v58, %v4025_v59 }
 0x71f   : > { %v4140_v19 = vpack.c.bf16 %v4028_v62, %v4026_v55  ;;  %v3758_v16 = vpop.f32.mrb[32].mxu1 }
 0x720   : > { %v5725_v15 = vadd.f32 %v3758_v16, %v7802_v18  ;;  %v3760_v27 = vpop.f32.mrb[33].mxu1 }
 0x721   : > { %v5726_v40 = vadd.f32 %v3760_v27, %v7806_v17  ;;  %v3762_v53 = vpop.f32.mrb[34].mxu1  ;;  %4406 = vmatprep.mubr.bf16.mxu0 %v4140_v19 }
 0x722   : > { %v5727_v11 = vadd.f32 %v3762_v53, %v7802_v18  ;;  %v3764_v10 = vpop.f32.mrb[35].mxu1  ;;  %4407 = vmatmul.mubr.bf16.gmra.mrb[156].mxu0 %v4139_v36  ;;  %v4029_v7 = vmax.f32 %v5725_v15, 0.0 }
 0x723   : > { %v5728_v8 = vadd.f32 %v3764_v10, %v7806_v17  ;;  %v4030_v6 = vmax.f32 %v5726_v40, 0.0 }
 0x724   : > { %v4031_v28 = vmax.f32 %v5727_v11, 0.0 }
 0x725   : > { %v4032_v38 = vmax.f32 %v5728_v8, 0.0 }
 0x726   : > { %v4141_v25 = vpack.c.bf16 %v4031_v28, %v4029_v7 }
 0x727   : > { %v4142_v31 = vpack.c.bf16 %v4032_v38, %v4030_v6  ;;  %v3768_v57 = vpop.f32.mrb[36].mxu1 }
 0x728   : > { %v5729_v39 = vadd.f32 %v3768_v57, %v7802_v18  ;;  %v3770_v37 = vpop.f32.mrb[37].mxu1 }
 0x729   : > { %v5730_v33 = vadd.f32 %v3770_v37, %v7806_v17  ;;  %v3772_v32 = vpop.f32.mrb[38].mxu1  ;;  %4414 = vmatprep.mubr.bf16.mxu0 %v4142_v31 }
 0x72a   : > { %v5731_v45 = vadd.f32 %v3772_v32, %v7802_v18  ;;  %v3774_v54 = vpop.f32.mrb[39].mxu1  ;;  %4415 = vmatmul.mubr.bf16.gmra.mrb[160].mxu0 %v4141_v25  ;;  %v4033_v26 = vmax.f32 %v5729_v39, 0.0 }
 0x72b   : > { %v5732_v9 = vadd.f32 %v3774_v54, %v7806_v17  ;;  %v4034_v23 = vmax.f32 %v5730_v33, 0.0 }
 0x72c   : > { %v4035_v24 = vmax.f32 %v5731_v45, 0.0 }
 0x72d   : > { %v4036_v22 = vmax.f32 %v5732_v9, 0.0 }
 0x72e   : > { %v4143_v56 = vpack.c.bf16 %v4035_v24, %v4033_v26 }
 0x72f   : > { %v4144_v50 = vpack.c.bf16 %v4036_v22, %v4034_v23  ;;  %v3778_v14 = vpop.f32.mrb[40].mxu1 }
 0x730   : > { %v5733_v51 = vadd.f32 %v3778_v14, %v7802_v18  ;;  %v3780_v49 = vpop.f32.mrb[41].mxu1 }
 0x731   : > { %v5734_v48 = vadd.f32 %v3780_v49, %v7806_v17  ;;  %v3782_v47 = vpop.f32.mrb[42].mxu1  ;;  %4422 = vmatprep.mubr.bf16.mxu0 %v4144_v50 }
 0x732   : > { %v5735_v61 = vadd.f32 %v3782_v47, %v7802_v18  ;;  %v3784_v5 = vpop.f32.mrb[43].mxu1  ;;  %4423 = vmatmul.mubr.bf16.gmra.mrb[164].mxu0 %v4143_v56  ;;  %v4037_v44 = vmax.f32 %v5733_v51, 0.0 }
 0x733   : > { %v5736_v30 = vadd.f32 %v3784_v5, %v7806_v17  ;;  %v4038_v42 = vmax.f32 %v5734_v48, 0.0  ;;  %v6805_v48 = vld [vmem:[#allocation5 + $0x4] ss:$16 sps:$4 sm:$0xff]  }
 0x734   : > { %v4039_v43 = vmax.f32 %v5735_v61, 0.0 }
 0x735   : > { %v4040_v41 = vmax.f32 %v5736_v30, 0.0 }
 0x736   : > { %v4145_v34 = vpack.c.bf16 %v4039_v43, %v4037_v44 }
 0x737   : > { %v4146_v35 = vpack.c.bf16 %v4040_v41, %v4038_v42  ;;  %v3788_v29 = vpop.f32.mrb[44].mxu1 }
 0x738   : > { %v5737_v12 = vadd.f32 %v3788_v29, %v7802_v18  ;;  %v3790_v4 = vpop.f32.mrb[45].mxu1 }
 0x739   : > { %v5738_v3 = vadd.f32 %v3790_v4, %v7806_v17  ;;  %v3792_v2 = vpop.f32.mrb[46].mxu1  ;;  %4430 = vmatprep.mubr.bf16.mxu0 %v4146_v35 }
 0x73a   : > { %v5739_v1 = vadd.f32 %v3792_v2, %v7802_v18  ;;  %v3794_v63 = vpop.f32.mrb[47].mxu1  ;;  %4431 = vmatmul.mubr.bf16.gmra.mrb[168].mxu0 %v4145_v34  ;;  %v4041_v21 = vmax.f32 %v5737_v12, 0.0 }
 0x73b   : > { %v5740_v13 = vadd.f32 %v3794_v63, %v7806_v17  ;;  %v4042_v20 = vmax.f32 %v5738_v3, 0.0 }
 0x73c   : > { %v4043_v46 = vmax.f32 %v5739_v1, 0.0 }
 0x73d   : > { %v4044_v52 = vmax.f32 %v5740_v13, 0.0 }
 0x73e   : > { %v4147_v60 = vpack.c.bf16 %v4043_v46, %v4041_v21 }
 0x73f   : > { %v4148_v59 = vpack.c.bf16 %v4044_v52, %v4042_v20  ;;  %v3798_v58 = vpop.f32.mrb[48].mxu1 }
 0x740   : > { %v5741_v55 = vadd.f32 %v3798_v58, %v7802_v18  ;;  %v3800_v62 = vpop.f32.mrb[49].mxu1 }
 0x741   : > { %v5742_v36 = vadd.f32 %v3800_v62, %v7806_v17  ;;  %v3802_v19 = vpop.f32.mrb[50].mxu1  ;;  %4438 = vmatprep.mubr.bf16.mxu0 %v4148_v59 }
 0x742   : > { %v5743_v16 = vadd.f32 %v3802_v19, %v7802_v18  ;;  %v3804_v15 = vpop.f32.mrb[51].mxu1  ;;  %4439 = vmatmul.mubr.bf16.gmra.mrb[172].mxu0 %v4147_v60  ;;  %v4045_v40 = vmax.f32 %v5741_v55, 0.0 }
 0x743   : > { %v5744_v27 = vadd.f32 %v3804_v15, %v7806_v17  ;;  %v4046_v11 = vmax.f32 %v5742_v36, 0.0 }
 0x744   : > { %v4047_v53 = vmax.f32 %v5743_v16, 0.0 }
 0x745   : > { %v4048_v10 = vmax.f32 %v5744_v27, 0.0 }
 0x746   : > { %v4149_v8 = vpack.c.bf16 %v4047_v53, %v4045_v40 }
 0x747   : > { %v4150_v7 = vpack.c.bf16 %v4048_v10, %v4046_v11  ;;  %v3808_v28 = vpop.f32.mrb[52].mxu1 }
 0x748   : > { %v5745_v6 = vadd.f32 %v3808_v28, %v7802_v18  ;;  %v3810_v38 = vpop.f32.mrb[53].mxu1 }
 0x749   : > { %v5746_v25 = vadd.f32 %v3810_v38, %v7806_v17  ;;  %v3812_v31 = vpop.f32.mrb[54].mxu1  ;;  %4446 = vmatprep.mubr.bf16.mxu0 %v4150_v7 }
 0x74a   : > { %v5747_v57 = vadd.f32 %v3812_v31, %v7802_v18  ;;  %v3814_v39 = vpop.f32.mrb[55].mxu1  ;;  %4447 = vmatmul.mubr.bf16.gmra.mrb[176].mxu0 %v4149_v8  ;;  %v4049_v33 = vmax.f32 %v5745_v6, 0.0 }
 0x74b   : > { %v5748_v37 = vadd.f32 %v3814_v39, %v7806_v17  ;;  %v4050_v45 = vmax.f32 %v5746_v25, 0.0 }
 0x74c   : > { %v4051_v32 = vmax.f32 %v5747_v57, 0.0 }
 0x74d   : > { %v4052_v54 = vmax.f32 %v5748_v37, 0.0 }
 0x74e   : > { %v4151_v9 = vpack.c.bf16 %v4051_v32, %v4049_v33 }
 0x74f   : > { %v4152_v26 = vpack.c.bf16 %v4052_v54, %v4050_v45  ;;  %v3818_v24 = vpop.f32.mrb[56].mxu1 }
 0x750   : > { %v5749_v23 = vadd.f32 %v3818_v24, %v7802_v18  ;;  %v3820_v22 = vpop.f32.mrb[57].mxu1 }
 0x751   : > { %v5750_v56 = vadd.f32 %v3820_v22, %v7806_v17  ;;  %v3822_v50 = vpop.f32.mrb[58].mxu1  ;;  %4454 = vmatprep.mubr.bf16.mxu0 %v4152_v26 }
 0x752   : > { %v5751_v14 = vadd.f32 %v3822_v50, %v7802_v18  ;;  %v3824_v51 = vpop.f32.mrb[59].mxu1  ;;  %4455 = vmatmul.mubr.bf16.gmra.mrb[180].mxu0 %v4151_v9  ;;  %v4053_v47 = vmax.f32 %v5749_v23, 0.0 }
 0x753   : > { %v5752_v49 = vadd.f32 %v3824_v51, %v7806_v17  ;;  %4677 = vmatprep.mubr.bf16.mxu0 %v6805_v48  ;;  %v4054_v5 = vmax.f32 %v5750_v56, 0.0 }
 0x754   : > { %v4055_v61 = vmax.f32 %v5751_v14, 0.0 }
 0x755   : > { %v4056_v30 = vmax.f32 %v5752_v49, 0.0 }
 0x756   : > { %v4153_v44 = vpack.c.bf16 %v4055_v61, %v4053_v47 }
 0x757   : > { %v4154_v43 = vpack.c.bf16 %v4056_v30, %v4054_v5  ;;  %v3828_v42 = vpop.f32.mrb[60].mxu1 }
 0x758   : > { %v5753_v41 = vadd.f32 %v3828_v42, %v7802_v18  ;;  %v3830_v34 = vpop.f32.mrb[61].mxu1 }
 0x759   : > { %v5754_v35 = vadd.f32 %v3830_v34, %v7806_v17  ;;  %v3832_v29 = vpop.f32.mrb[62].mxu1  ;;  %4462 = vmatprep.mubr.bf16.mxu1 %v4154_v43 }
 0x75a   : > { %v5755_v12 = vadd.f32 %v3832_v29, %v7802_v18  ;;  %v3834_v4 = vpop.f32.mrb[63].mxu1  ;;  %4463 = vmatmul.mubr.bf16.vlgmr.msra.gmra.mrb[128].mxu1 %v4153_v44  ;;  %v4057_v2 = vmax.f32 %v5753_v41, 0.0 }
 0x75b   : > { %v5756_v3 = vadd.f32 %v3834_v4, %v7806_v17  ;;  %v4058_v63 = vmax.f32 %v5754_v35, 0.0 }
 0x75c   : > { %v4059_v1 = vmax.f32 %v5755_v12, 0.0 }
 0x75d   : > { %v4060_v13 = vmax.f32 %v5756_v3, 0.0 }
 0x75e   : > { %v4155_v21 = vpack.c.bf16 %v4059_v1, %v4057_v2 }
 0x75f   : > { %v4156_v46 = vpack.c.bf16 %v4060_v13, %v4058_v63  ;;  %v3838_v20 = vpop.f32.mrb[64].mxu1 }
 0x760   : > { %v5757_v52 = vadd.f32 %v3838_v20, %v7802_v18  ;;  %v3840_v60 = vpop.f32.mrb[65].mxu1 }
 0x761   : > { %v5758_v59 = vadd.f32 %v3840_v60, %v7806_v17  ;;  %v3842_v58 = vpop.f32.mrb[66].mxu1  ;;  %4470 = vmatprep.mubr.bf16.mxu1 %v4156_v46 }
 0x762   : > { %v5759_v55 = vadd.f32 %v3842_v58, %v7802_v18  ;;  %v3844_v62 = vpop.f32.mrb[67].mxu1  ;;  %4471 = vmatmul.mubr.bf16.gmra.mrb[132].mxu1 %v4155_v21  ;;  %v4061_v19 = vmax.f32 %v5757_v52, 0.0 }
 0x763   : > { %v5760_v36 = vadd.f32 %v3844_v62, %v7806_v17  ;;  %v4062_v15 = vmax.f32 %v5758_v59, 0.0 }
 0x764   : > { %v4063_v16 = vmax.f32 %v5759_v55, 0.0 }
 0x765   : > { %v4064_v27 = vmax.f32 %v5760_v36, 0.0 }
 0x766   : > { %v4157_v40 = vpack.c.bf16 %v4063_v16, %v4061_v19 }
 0x767   : > { %v4158_v53 = vpack.c.bf16 %v4064_v27, %v4062_v15  ;;  %v3848_v11 = vpop.f32.mrb[68].mxu1 }
 0x768   : > { %v5761_v10 = vadd.f32 %v3848_v11, %v7802_v18  ;;  %v3850_v8 = vpop.f32.mrb[69].mxu1 }
 0x769   : > { %v5762_v7 = vadd.f32 %v3850_v8, %v7806_v17  ;;  %v3852_v28 = vpop.f32.mrb[70].mxu1  ;;  %4478 = vmatprep.mubr.bf16.mxu1 %v4158_v53 }
 0x76a   : > { %v5763_v6 = vadd.f32 %v3852_v28, %v7802_v18  ;;  %v3854_v38 = vpop.f32.mrb[71].mxu1  ;;  %4479 = vmatmul.mubr.bf16.gmra.mrb[136].mxu1 %v4157_v40  ;;  %v4065_v31 = vmax.f32 %v5761_v10, 0.0 }
 0x76b   : > { %v5764_v25 = vadd.f32 %v3854_v38, %v7806_v17  ;;  %v4066_v39 = vmax.f32 %v5762_v7, 0.0 }
 0x76c   : > { %v4067_v57 = vmax.f32 %v5763_v6, 0.0 }
 0x76d   : > { %v4068_v37 = vmax.f32 %v5764_v25, 0.0 }
 0x76e   : > { %v4159_v33 = vpack.c.bf16 %v4067_v57, %v4065_v31 }
 0x76f   : > { %v4160_v32 = vpack.c.bf16 %v4068_v37, %v4066_v39  ;;  %v3858_v45 = vpop.f32.mrb[72].mxu1 }
 0x770   : > { %v5765_v54 = vadd.f32 %v3858_v45, %v7802_v18  ;;  %v3860_v9 = vpop.f32.mrb[73].mxu1 }
 0x771   : > { %v5766_v26 = vadd.f32 %v3860_v9, %v7806_v17  ;;  %v3862_v24 = vpop.f32.mrb[74].mxu1  ;;  %4486 = vmatprep.mubr.bf16.mxu1 %v4160_v32 }
 0x772   : > { %v5767_v23 = vadd.f32 %v3862_v24, %v7802_v18  ;;  %v3864_v22 = vpop.f32.mrb[75].mxu1  ;;  %4487 = vmatmul.mubr.bf16.gmra.mrb[140].mxu1 %v4159_v33  ;;  %v4069_v50 = vmax.f32 %v5765_v54, 0.0 }
 0x773   : > { %v5768_v56 = vadd.f32 %v3864_v22, %v7806_v17  ;;  %v4070_v51 = vmax.f32 %v5766_v26, 0.0 }
 0x774   : > { %v4071_v14 = vmax.f32 %v5767_v23, 0.0 }
 0x775   : > { %v4072_v49 = vmax.f32 %v5768_v56, 0.0 }
 0x776   : > { %v4161_v48 = vpack.c.bf16 %v4071_v14, %v4069_v50 }
 0x777   : > { %v4162_v47 = vpack.c.bf16 %v4072_v49, %v4070_v51  ;;  %v3868_v61 = vpop.f32.mrb[76].mxu1 }
 0x778   : > { %v5769_v5 = vadd.f32 %v3868_v61, %v7802_v18  ;;  %v3870_v30 = vpop.f32.mrb[77].mxu1 }
 0x779   : > { %v5770_v44 = vadd.f32 %v3870_v30, %v7806_v17  ;;  %v3872_v43 = vpop.f32.mrb[78].mxu1  ;;  %4494 = vmatprep.mubr.bf16.mxu1 %v4162_v47 }
 0x77a   : > { %v5771_v42 = vadd.f32 %v3872_v43, %v7802_v18  ;;  %v3874_v41 = vpop.f32.mrb[79].mxu1  ;;  %4495 = vmatmul.mubr.bf16.gmra.mrb[144].mxu1 %v4161_v48  ;;  %v4073_v35 = vmax.f32 %v5769_v5, 0.0 }
 0x77b   : > { %v5772_v34 = vadd.f32 %v3874_v41, %v7806_v17  ;;  %v4074_v12 = vmax.f32 %v5770_v44, 0.0 }
 0x77c   : > { %v4075_v29 = vmax.f32 %v5771_v42, 0.0 }
 0x77d   : > { %v4076_v4 = vmax.f32 %v5772_v34, 0.0 }
 0x77e   : > { %v4163_v3 = vpack.c.bf16 %v4075_v29, %v4073_v35 }
 0x77f   : > { %v4164_v2 = vpack.c.bf16 %v4076_v4, %v4074_v12  ;;  %v3878_v1 = vpop.f32.mrb[80].mxu1 }
 0x780   : > { %v5773_v63 = vadd.f32 %v3878_v1, %v7802_v18  ;;  %v3880_v13 = vpop.f32.mrb[81].mxu1 }
 0x781   : > { %v5774_v21 = vadd.f32 %v3880_v13, %v7806_v17  ;;  %v3882_v46 = vpop.f32.mrb[82].mxu1  ;;  %4502 = vmatprep.mubr.bf16.mxu1 %v4164_v2 }
 0x782   : > { %v5775_v20 = vadd.f32 %v3882_v46, %v7802_v18  ;;  %v3884_v52 = vpop.f32.mrb[83].mxu1  ;;  %4503 = vmatmul.mubr.bf16.gmra.mrb[148].mxu1 %v4163_v3  ;;  %v4077_v59 = vmax.f32 %v5773_v63, 0.0 }
 0x783   : > { %v5776_v60 = vadd.f32 %v3884_v52, %v7806_v17  ;;  %v4078_v55 = vmax.f32 %v5774_v21, 0.0 }
 0x784   : > { %v4079_v58 = vmax.f32 %v5775_v20, 0.0 }
 0x785   : > { %v4080_v62 = vmax.f32 %v5776_v60, 0.0 }
 0x786   : > { %v4165_v36 = vpack.c.bf16 %v4079_v58, %v4077_v59 }
 0x787   : > { %v4166_v19 = vpack.c.bf16 %v4080_v62, %v4078_v55  ;;  %v3888_v16 = vpop.f32.mrb[84].mxu1 }
 0x788   : > { %v5777_v15 = vadd.f32 %v3888_v16, %v7802_v18  ;;  %v3890_v27 = vpop.f32.mrb[85].mxu1 }
 0x789   : > { %v5778_v40 = vadd.f32 %v3890_v27, %v7806_v17  ;;  %v3892_v53 = vpop.f32.mrb[86].mxu1  ;;  %4510 = vmatprep.mubr.bf16.mxu1 %v4166_v19 }
 0x78a   : > { %v5779_v11 = vadd.f32 %v3892_v53, %v7802_v18  ;;  %v3894_v10 = vpop.f32.mrb[87].mxu1  ;;  %4511 = vmatmul.mubr.bf16.gmra.mrb[152].mxu1 %v4165_v36  ;;  %v4081_v7 = vmax.f32 %v5777_v15, 0.0 }
 0x78b   : > { %v5780_v8 = vadd.f32 %v3894_v10, %v7806_v17  ;;  %v4082_v6 = vmax.f32 %v5778_v40, 0.0 }
 0x78c   : > { %v4083_v28 = vmax.f32 %v5779_v11, 0.0 }
 0x78d   : > { %v4084_v38 = vmax.f32 %v5780_v8, 0.0 }
 0x78e   : > { %v4167_v25 = vpack.c.bf16 %v4083_v28, %v4081_v7 }
 0x78f   : > { %v4168_v31 = vpack.c.bf16 %v4084_v38, %v4082_v6  ;;  %v3898_v57 = vpop.f32.mrb[88].mxu1 }
 0x790   : > { %v5781_v39 = vadd.f32 %v3898_v57, %v7802_v18  ;;  %v3900_v37 = vpop.f32.mrb[89].mxu1 }
 0x791   : > { %v5782_v33 = vadd.f32 %v3900_v37, %v7806_v17  ;;  %v3902_v32 = vpop.f32.mrb[90].mxu1  ;;  %4518 = vmatprep.mubr.bf16.mxu1 %v4168_v31 }
 0x792   : > { %v5783_v45 = vadd.f32 %v3902_v32, %v7802_v18  ;;  %v3904_v54 = vpop.f32.mrb[91].mxu1  ;;  %4519 = vmatmul.mubr.bf16.gmra.mrb[156].mxu1 %v4167_v25  ;;  %v4085_v26 = vmax.f32 %v5781_v39, 0.0 }
 0x793   : > { %v5784_v9 = vadd.f32 %v3904_v54, %v7806_v17  ;;  %v4086_v23 = vmax.f32 %v5782_v33, 0.0 }
 0x794   : > { %v4087_v24 = vmax.f32 %v5783_v45, 0.0 }
 0x795   : > { %v4088_v22 = vmax.f32 %v5784_v9, 0.0 }
 0x796   : > { %v4169_v56 = vpack.c.bf16 %v4087_v24, %v4085_v26 }
 0x797   : > { %v4170_v50 = vpack.c.bf16 %v4088_v22, %v4086_v23  ;;  %v3908_v14 = vpop.f32.mrb[92].mxu1 }
 0x798   : > { %v5785_v51 = vadd.f32 %v3908_v14, %v7802_v18  ;;  %v3910_v49 = vpop.f32.mrb[93].mxu1 }
 0x799   : > { %v5786_v48 = vadd.f32 %v3910_v49, %v7806_v17  ;;  %v3912_v47 = vpop.f32.mrb[94].mxu1  ;;  %4526 = vmatprep.mubr.bf16.mxu1 %v4170_v50 }
 0x79a   : > { %v5787_v61 = vadd.f32 %v3912_v47, %v7802_v18  ;;  %v3914_v5 = vpop.f32.mrb[95].mxu1  ;;  %4527 = vmatmul.mubr.bf16.gmra.mrb[160].mxu1 %v4169_v56  ;;  %v4089_v44 = vmax.f32 %v5785_v51, 0.0 }
 0x79b   : > { %v5788_v30 = vadd.f32 %v3914_v5, %v7806_v17  ;;  %v4090_v42 = vmax.f32 %v5786_v48, 0.0 }
 0x79c   : > { %v4091_v43 = vmax.f32 %v5787_v61, 0.0 }
 0x79d   : > { %v4092_v41 = vmax.f32 %v5788_v30, 0.0 }
 0x79e   : > { %v4171_v34 = vpack.c.bf16 %v4091_v43, %v4089_v44 }
 0x79f   : > { %v4172_v35 = vpack.c.bf16 %v4092_v41, %v4090_v42  ;;  %v3918_v29 = vpop.f32.mrb[96].mxu1 }
 0x7a0   : > { %v5789_v12 = vadd.f32 %v3918_v29, %v7802_v18  ;;  %v3920_v4 = vpop.f32.mrb[97].mxu1 }
 0x7a1   : > { %v5790_v3 = vadd.f32 %v3920_v4, %v7806_v17  ;;  %v3922_v2 = vpop.f32.mrb[98].mxu1  ;;  %4534 = vmatprep.mubr.bf16.mxu1 %v4172_v35 }
 0x7a2   : > { %v5791_v1 = vadd.f32 %v3922_v2, %v7802_v18  ;;  %v3924_v63 = vpop.f32.mrb[99].mxu1  ;;  %4535 = vmatmul.mubr.bf16.gmra.mrb[164].mxu1 %v4171_v34  ;;  %v4093_v21 = vmax.f32 %v5789_v12, 0.0 }
 0x7a3   : > { %v5792_v13 = vadd.f32 %v3924_v63, %v7806_v17  ;;  %v4094_v20 = vmax.f32 %v5790_v3, 0.0 }
 0x7a4   : > { %v4095_v46 = vmax.f32 %v5791_v1, 0.0 }
 0x7a5   : > { %v4096_v52 = vmax.f32 %v5792_v13, 0.0 }
 0x7a6   : > { %v4173_v60 = vpack.c.bf16 %v4095_v46, %v4093_v21 }
 0x7a7   : > { %v4174_v59 = vpack.c.bf16 %v4096_v52, %v4094_v20  ;;  %v3928_v58 = vpop.f32.mrb[100].mxu1 }
 0x7a8   : > { %v5793_v55 = vadd.f32 %v3928_v58, %v7802_v18  ;;  %v3930_v62 = vpop.f32.mrb[101].mxu1 }
 0x7a9   : > { %v5794_v36 = vadd.f32 %v3930_v62, %v7806_v17  ;;  %v3932_v19 = vpop.f32.mrb[102].mxu1  ;;  %4542 = vmatprep.mubr.bf16.mxu1 %v4174_v59 }
 0x7aa   : > { %v5795_v16 = vadd.f32 %v3932_v19, %v7802_v18  ;;  %v3934_v15 = vpop.f32.mrb[103].mxu1  ;;  %4543 = vmatmul.mubr.bf16.gmra.mrb[168].mxu1 %v4173_v60  ;;  %v4097_v40 = vmax.f32 %v5793_v55, 0.0 }
 0x7ab   : > { %v5796_v27 = vadd.f32 %v3934_v15, %v7806_v17  ;;  %v4098_v11 = vmax.f32 %v5794_v36, 0.0 }
 0x7ac   : > { %v4099_v53 = vmax.f32 %v5795_v16, 0.0 }
 0x7ad   : > { %v4100_v10 = vmax.f32 %v5796_v27, 0.0 }
 0x7ae   : > { %v4175_v8 = vpack.c.bf16 %v4099_v53, %v4097_v40 }
 0x7af   : > { %v4176_v7 = vpack.c.bf16 %v4100_v10, %v4098_v11  ;;  %v3938_v28 = vpop.f32.mrb[104].mxu1 }
 0x7b0   : > { %v5797_v6 = vadd.f32 %v3938_v28, %v7802_v18  ;;  %v3940_v38 = vpop.f32.mrb[105].mxu1 }
 0x7b1   : > { %v5798_v25 = vadd.f32 %v3940_v38, %v7806_v17  ;;  %v3942_v31 = vpop.f32.mrb[106].mxu1  ;;  %4550 = vmatprep.mubr.bf16.mxu1 %v4176_v7 }
 0x7b2   : > { %v5799_v57 = vadd.f32 %v3942_v31, %v7802_v18  ;;  %v3944_v39 = vpop.f32.mrb[107].mxu1  ;;  %4551 = vmatmul.mubr.bf16.gmra.mrb[172].mxu1 %v4175_v8  ;;  %v4101_v33 = vmax.f32 %v5797_v6, 0.0 }
 0x7b3   : > { %v5800_v37 = vadd.f32 %v3944_v39, %v7806_v17  ;;  %v4102_v45 = vmax.f32 %v5798_v25, 0.0 }
 0x7b4   : > { %v4103_v32 = vmax.f32 %v5799_v57, 0.0 }
 0x7b5   : > { %v4104_v54 = vmax.f32 %v5800_v37, 0.0 }
 0x7b6   : > { %v4177_v9 = vpack.c.bf16 %v4103_v32, %v4101_v33 }
 0x7b7   : > { %v4178_v26 = vpack.c.bf16 %v4104_v54, %v4102_v45  ;;  %v3948_v24 = vpop.f32.mrb[108].mxu1 }
 0x7b8   : > { %v5801_v23 = vadd.f32 %v3948_v24, %v7802_v18  ;;  %v3950_v22 = vpop.f32.mrb[109].mxu1 }
 0x7b9   : > { %v5802_v56 = vadd.f32 %v3950_v22, %v7806_v17  ;;  %v3952_v50 = vpop.f32.mrb[110].mxu1  ;;  %4558 = vmatprep.mubr.bf16.mxu1 %v4178_v26 }
 0x7ba   : > { %v5803_v14 = vadd.f32 %v3952_v50, %v7802_v18  ;;  %v3954_v51 = vpop.f32.mrb[111].mxu1  ;;  %4559 = vmatmul.mubr.bf16.gmra.mrb[176].mxu1 %v4177_v9  ;;  %v4105_v48 = vmax.f32 %v5801_v23, 0.0 }
 0x7bb   : > { %v5804_v49 = vadd.f32 %v3954_v51, %v7806_v17  ;;  %v4106_v61 = vmax.f32 %v5802_v56, 0.0 }
 0x7bc   : > { %v4107_v47 = vmax.f32 %v5803_v14, 0.0 }
 0x7bd   : > { %v4108_v5 = vmax.f32 %v5804_v49, 0.0  ;;  %v4352_v30 = vpop.f32.mrb[128].mxu0 }
 0x7be   : > { %v4179_v44 = vpack.c.bf16 %v4107_v47, %v4105_v48  ;;  %v4354_v43 = vpop.f32.mrb[129].mxu0 }
 0x7bf   : > { %v4180_v42 = vpack.c.bf16 %v4108_v5, %v4106_v61  ;;  %v3958_v41 = vpop.f32.mrb[112].mxu1  ;;  %v4355_v34 = vpop.f32.mrb[130].mxu0 }
 0x7c0   : > { %v5805_v35 = vadd.f32 %v3958_v41, %v7802_v18  ;;  %v4607_v29 = vpack.c.bf16 %v4355_v34, %v4352_v30  ;;  %v3960_v12 = vpop.f32.mrb[113].mxu1  ;;  %v4357_v4 = vpop.f32.mrb[131].mxu0 }
 0x7c1   : > { %v5806_v3 = vadd.f32 %v3960_v12, %v7806_v17  ;;  %v3962_v2 = vpop.f32.mrb[114].mxu1  ;;  %4566 = vmatprep.mubr.bf16.mxu1 %v4180_v42 }
 0x7c2   : > { %v5807_v1 = vadd.f32 %v3962_v2, %v7802_v18  ;;  %v3964_v63 = vpop.f32.mrb[115].mxu1  ;;  %4567 = vmatmul.mubr.bf16.gmra.mrb[180].mxu1 %v4179_v44  ;;  %4646 = vmatpush1.bf16.msra.mxu0 %v4607_v29  ;;  %v4109_v21 = vmax.f32 %v5805_v35, 0.0 }
 0x7c3   : > { %v5808_v13 = vadd.f32 %v3964_v63, %v7806_v17  ;;  %4647 = vmatprep.subr.bf16.mxu0 %v7162_v0  ;;  %v4110_v20 = vmax.f32 %v5806_v3, 0.0 }
 0x7c4   : > { %v4111_v46 = vmax.f32 %v5807_v1, 0.0 }
 0x7c5   : > { %v4112_v52 = vmax.f32 %v5808_v13, 0.0  ;;  %v4360_v60 = vpop.f32.mrb[132].mxu0 }
 0x7c6   : > { %v4181_v59 = vpack.c.bf16 %v4111_v46, %v4109_v21  ;;  %v4362_v58 = vpop.f32.mrb[133].mxu0 }
 0x7c7   : > { %v4182_v55 = vpack.c.bf16 %v4112_v52, %v4110_v20  ;;  %v3968_v62 = vpop.f32.mrb[116].mxu1  ;;  %v4363_v36 = vpop.f32.mrb[134].mxu0 }
 0x7c8   : > { %v5809_v19 = vadd.f32 %v3968_v62, %v7802_v18  ;;  %v4608_v16 = vpack.c.bf16 %v4363_v36, %v4360_v60  ;;  %v3970_v15 = vpop.f32.mrb[117].mxu1  ;;  %v4365_v27 = vpop.f32.mrb[135].mxu0 }
 0x7c9   : > { %v5810_v40 = vadd.f32 %v3970_v15, %v7806_v17  ;;  %v3972_v53 = vpop.f32.mrb[118].mxu1  ;;  %4574 = vmatprep.mubr.bf16.mxu1 %v4182_v55 }
 0x7ca   : > { %v5811_v11 = vadd.f32 %v3972_v53, %v7802_v18  ;;  %v3974_v10 = vpop.f32.mrb[119].mxu1  ;;  %4575 = vmatmul.mubr.bf16.gmra.mrb[184].mxu1 %v4181_v59  ;;  %4648 = vmatpush1.bf16.msra.mxu0 %v4608_v16  ;;  %v4113_v7 = vmax.f32 %v5809_v19, 0.0 }
 0x7cb   : > { %v5812_v8 = vadd.f32 %v3974_v10, %v7806_v17  ;;  %4649 = vmatprep.subr.bf16.mxu0 %v7162_v0  ;;  %v4114_v6 = vmax.f32 %v5810_v40, 0.0 }
 0x7cc   : > { %v4115_v28 = vmax.f32 %v5811_v11, 0.0 }
 0x7cd   : > { %v4116_v38 = vmax.f32 %v5812_v8, 0.0  ;;  %v4368_v25 = vpop.f32.mrb[136].mxu0 }
 0x7ce   : > { %v4183_v31 = vpack.c.bf16 %v4115_v28, %v4113_v7  ;;  %v4370_v57 = vpop.f32.mrb[137].mxu0 }
 0x7cf   : > { %v4184_v39 = vpack.c.bf16 %v4116_v38, %v4114_v6  ;;  %v3978_v37 = vpop.f32.mrb[120].mxu1  ;;  %v4371_v33 = vpop.f32.mrb[138].mxu0 }
 0x7d0   : > { %v5813_v32 = vadd.f32 %v3978_v37, %v7802_v18  ;;  %v4609_v45 = vpack.c.bf16 %v4371_v33, %v4368_v25  ;;  %v3980_v54 = vpop.f32.mrb[121].mxu1  ;;  %v4373_v9 = vpop.f32.mrb[139].mxu0 }
 0x7d1   : > { %v5814_v26 = vadd.f32 %v3980_v54, %v7806_v17  ;;  %v3982_v24 = vpop.f32.mrb[122].mxu1  ;;  %4582 = vmatprep.mubr.bf16.mxu1 %v4184_v39 }
 0x7d2   : > { %v5815_v23 = vadd.f32 %v3982_v24, %v7802_v18  ;;  %v3984_v22 = vpop.f32.mrb[123].mxu1  ;;  %4583 = vmatmul.mubr.bf16.gmra.mrb[188].mxu1 %v4183_v31  ;;  %4650 = vmatpush1.bf16.msra.mxu0 %v4609_v45  ;;  %v4117_v50 = vmax.f32 %v5813_v32, 0.0 }
 0x7d3   : > { %v5816_v56 = vadd.f32 %v3984_v22, %v7806_v17  ;;  %4651 = vmatprep.subr.bf16.mxu0 %v7162_v0  ;;  %v4118_v51 = vmax.f32 %v5814_v26, 0.0 }
 0x7d4   : > { %v4119_v14 = vmax.f32 %v5815_v23, 0.0 }
 0x7d5   : > { %v4120_v49 = vmax.f32 %v5816_v56, 0.0  ;;  %v4376_v48 = vpop.f32.mrb[140].mxu0 }
 0x7d6   : > { %v4185_v47 = vpack.c.bf16 %v4119_v14, %v4117_v50  ;;  %v4378_v61 = vpop.f32.mrb[141].mxu0 }
 0x7d7   : > { %v4186_v5 = vpack.c.bf16 %v4120_v49, %v4118_v51  ;;  %v3988_v30 = vpop.f32.mrb[124].mxu1  ;;  %v4379_v44 = vpop.f32.mrb[142].mxu0 }
 0x7d8   : > { %v5817_v43 = vadd.f32 %v3988_v30, %v7802_v18  ;;  %v4610_v42 = vpack.c.bf16 %v4379_v44, %v4376_v48  ;;  %v3990_v41 = vpop.f32.mrb[125].mxu1  ;;  %v4381_v34 = vpop.f32.mrb[143].mxu0 }
 0x7d9   : > { %v5818_v35 = vadd.f32 %v3990_v41, %v7806_v17  ;;  %v3992_v29 = vpop.f32.mrb[126].mxu1  ;;  %4590 = vmatprep.mubr.bf16.mxu1 %v4186_v5 }
 0x7da   : > { %v5819_v12 = vadd.f32 %v3992_v29, %v7802_v18  ;;  %v3994_v4 = vpop.f32.mrb[127].mxu1  ;;  %4591 = vmatmul.mubr.bf16.gmra.mrb[192].mxu1 %v4185_v47  ;;  %4652 = vmatpush1.bf16.msra.mxu0 %v4610_v42  ;;  %v4121_v2 = vmax.f32 %v5817_v43, 0.0 }
 0x7db   : > { %v5820_v3 = vadd.f32 %v3994_v4, %v7806_v17  ;;  %4653 = vmatprep.subr.bf16.mxu0 %v7162_v0  ;;  %v4122_v63 = vmax.f32 %v5818_v35, 0.0 }
 0x7dc   : > { %v4123_v1 = vmax.f32 %v5819_v12, 0.0 }
 0x7dd   : > { %v4124_v13 = vmax.f32 %v5820_v3, 0.0  ;;  %v4384_v21 = vpop.f32.mrb[144].mxu0 }
 0x7de   : > { %v4187_v46 = vpack.c.bf16 %v4123_v1, %v4121_v2  ;;  %v4386_v20 = vpop.f32.mrb[145].mxu0 }
 0x7df   : > { %v4188_v52 = vpack.c.bf16 %v4124_v13, %v4122_v63  ;;  %v4387_v60 = vpop.f32.mrb[146].mxu0  ;;  %v6807_v20 = vld [vmem:[#allocation5 + $0x24] ss:$16 sps:$4 sm:$0xff]  }
 0x7e0   : > { %v4611_v59 = vpack.c.bf16 %v4387_v60, %v4384_v21  ;;  %v4389_v58 = vpop.f32.mrb[147].mxu0  ;;  %v6806_v21 = vld [vmem:[#allocation5] ss:$16 sps:$4 sm:$0xff]  }
 0x7e1   : > { %4598 = vmatprep.mubr.bf16.mxu1 %v4188_v52 }
 0x7e2   : > { %4599 = vmatmul.mubr.bf16.gmra.mrb[196].mxu1 %v4187_v46  ;;  %4654 = vmatpush1.bf16.msra.mxu0 %v4611_v59 }
 0x7e3   : > { %4655 = vmatprep.subr.bf16.mxu0 %v7162_v0 }
 0x7e5   : > { %v4392_v18 = vpop.f32.mrb[148].mxu0 }
 0x7e6   : > { %v4394_v17 = vpop.f32.mrb[149].mxu0 }
 0x7e7   : > { %v4395_v55 = vpop.f32.mrb[150].mxu0 }
 0x7e8   : > { %v4612_v62 = vpack.c.bf16 %v4395_v55, %v4392_v18  ;;  %v4397_v36 = vpop.f32.mrb[151].mxu0  ;;  %v6808_v18 = vld [vmem:[#allocation5 + $0x20] ss:$16 sps:$4 sm:$0xff]   ;;  %v6809_v55 = vld [vmem:[#allocation5 + $0x44] ss:$16 sps:$4 sm:$0xff]  }
 0x7ea   : > { %4656 = vmatpush1.bf16.msra.mxu0 %v4612_v62 }
 0x7eb   : > { %4657 = vmatprep.subr.bf16.mxu0 %v7162_v0 }
 0x7ed   : > { %v4400_v19 = vpop.f32.mrb[152].mxu0 }
 0x7ee   : > { %v4402_v16 = vpop.f32.mrb[153].mxu0 }
 0x7ef   : > { %v4403_v15 = vpop.f32.mrb[154].mxu0 }
 0x7f0   : > { %v4613_v27 = vpack.c.bf16 %v4403_v15, %v4400_v19  ;;  %v4405_v40 = vpop.f32.mrb[155].mxu0  ;;  %v6810_v15 = vld [vmem:[#allocation5 + $0x40] ss:$16 sps:$4 sm:$0xff]  }
 0x7f1   : > { %v6811_v40 = vld [vmem:[#allocation5 + $0x64] ss:$16 sps:$4 sm:$0xff]  }
 0x7f2   : > { %4658 = vmatpush1.bf16.msra.mxu0 %v4613_v27 }
 0x7f3   : > { %4659 = vmatprep.subr.bf16.mxu0 %v7162_v0 }
 0x7f5   : > { %v4408_v53 = vpop.f32.mrb[156].mxu0 }
 0x7f6   : > { %v4410_v11 = vpop.f32.mrb[157].mxu0 }
 0x7f7   : > { %v4411_v10 = vpop.f32.mrb[158].mxu0 }
 0x7f8   : > { %v4614_v8 = vpack.c.bf16 %v4411_v10, %v4408_v53  ;;  %v4413_v7 = vpop.f32.mrb[159].mxu0 }
 0x7f9   : > { %v6812_v7 = vld [vmem:[#allocation5 + $0x60] ss:$16 sps:$4 sm:$0xff]  }
 0x7fa   : > { %4660 = vmatpush1.bf16.msra.mxu0 %v4614_v8 }
 0x7fb   : > { %4661 = vmatprep.subr.bf16.mxu0 %v7162_v0 }
 0x7fd   : > { %v4416_v28 = vpop.f32.mrb[160].mxu0 }
 0x7fe   : > { %v4418_v6 = vpop.f32.mrb[161].mxu0 }
 0x7ff   : > { %v4419_v38 = vpop.f32.mrb[162].mxu0  ;;  %v6813_v6 = vld [vmem:[#allocation5 + $0x84] ss:$16 sps:$4 sm:$0xff]  }
 0x800   : > { %v4615_v25 = vpack.c.bf16 %v4419_v38, %v4416_v28  ;;  %v4421_v31 = vpop.f32.mrb[163].mxu0 }
 0x802   : > { %4662 = vmatpush1.bf16.msra.mxu0 %v4615_v25 }
 0x803   : > { %4663 = vmatprep.subr.bf16.mxu0 %v7162_v0 }
 0x805   : > { %v4424_v57 = vpop.f32.mrb[164].mxu0 }
 0x806   : > { %v4426_v39 = vpop.f32.mrb[165].mxu0 }
 0x807   : > { %v4427_v37 = vpop.f32.mrb[166].mxu0  ;;  %v6814_v39 = vld [vmem:[#allocation5 + $0x80] ss:$16 sps:$4 sm:$0xff]  }
 0x808   : > { %v4616_v33 = vpack.c.bf16 %v4427_v37, %v4424_v57  ;;  %v4429_v32 = vpop.f32.mrb[167].mxu0 }
 0x80a   : > { %4664 = vmatpush1.bf16.msra.mxu0 %v4616_v33  ;;  %v6815_v33 = vld [vmem:[#allocation5 + $0xa4] ss:$16 sps:$4 sm:$0xff]  }
 0x80b   : > { %4665 = vmatprep.subr.bf16.mxu0 %v7162_v0 }
 0x80d   : > { %v4432_v45 = vpop.f32.mrb[168].mxu0 }
 0x80e   : > { %v4434_v54 = vpop.f32.mrb[169].mxu0 }
 0x80f   : > { %v4435_v9 = vpop.f32.mrb[170].mxu0 }
 0x810   : > { %v4617_v26 = vpack.c.bf16 %v4435_v9, %v4432_v45  ;;  %v4437_v24 = vpop.f32.mrb[171].mxu0 }
 0x812   : > { %4666 = vmatpush1.bf16.msra.mxu0 %v4617_v26  ;;  %v6816_v26 = vld [vmem:[#allocation5 + $0xa0] ss:$16 sps:$4 sm:$0xff]  }
 0x813   : > { %4667 = vmatprep.subr.bf16.mxu0 %v7162_v0 }
 0x815   : > { %v4440_v23 = vpop.f32.mrb[172].mxu0 }
 0x816   : > { %v4442_v22 = vpop.f32.mrb[173].mxu0 }
 0x817   : > { %v4443_v56 = vpop.f32.mrb[174].mxu0 }
 0x818   : > { %v4618_v50 = vpack.c.bf16 %v4443_v56, %v4440_v23  ;;  %v4445_v14 = vpop.f32.mrb[175].mxu0  ;;  %v6817_v23 = vld [vmem:[#allocation5 + $0xc4] ss:$16 sps:$4 sm:$0xff]  }
 0x81a   : > { %4668 = vmatpush1.bf16.msra.mxu0 %v4618_v50 }
 0x81b   : > { %4669 = vmatprep.subr.bf16.mxu0 %v7162_v0 }
 0x81d   : > { %v4448_v51 = vpop.f32.mrb[176].mxu0 }
 0x81e   : > { %v4450_v49 = vpop.f32.mrb[177].mxu0 }
 0x81f   : > { %v4451_v48 = vpop.f32.mrb[178].mxu0 }
 0x820   : > { %v4619_v47 = vpack.c.bf16 %v4451_v48, %v4448_v51  ;;  %v4453_v61 = vpop.f32.mrb[179].mxu0  ;;  %v6818_v51 = vld [vmem:[#allocation5 + $0xc0] ss:$16 sps:$4 sm:$0xff]   ;;  %v6819_v48 = vld [vmem:[#allocation5 + $0xe4] ss:$16 sps:$4 sm:$0xff]  }
 0x822   : > { %4670 = vmatpush1.bf16.msra.mxu0 %v4619_v47 }
 0x823   : > { %4671 = vmatprep.subr.bf16.mxu0 %v7162_v0 }
 0x825   : > { %v4456_v5 = vpop.f32.mrb[180].mxu0 }
 0x826   : > { %v4458_v30 = vpop.f32.mrb[181].mxu0 }
 0x827   : > { %v4459_v44 = vpop.f32.mrb[182].mxu0 }
 0x828   : > { %v4620_v43 = vpack.c.bf16 %v4459_v44, %v4456_v5  ;;  %v4461_v42 = vpop.f32.mrb[183].mxu0  ;;  %v6820_v44 = vld [vmem:[#allocation5 + $0xe0] ss:$16 sps:$4 sm:$0xff]  }
 0x829   : > { %v6821_v42 = vld [vmem:[#allocation5 + $0x104] ss:$16 sps:$4 sm:$0xff]  }
 0x82a   : > { %4672 = vmatpush1.bf16.msra.mxu0 %v4620_v43 }
 0x82b   : > { %4673 = vmatprep.subr.bf16.mxu0 %v7162_v0 }
 0x82d   : > { %v4464_v41 = vpop.f32.mrb[128].mxu1 }
 0x82e   : > { %v4466_v34 = vpop.f32.mrb[129].mxu1 }
 0x82f   : > { %v4467_v35 = vpop.f32.mrb[130].mxu1 }
 0x830   : > { %v4621_v29 = vpack.c.bf16 %v4467_v35, %v4464_v41  ;;  %v4469_v12 = vpop.f32.mrb[131].mxu1 }
 0x831   : > { %v6822_v12 = vld [vmem:[#allocation5 + $0x100] ss:$16 sps:$4 sm:$0xff]  }
 0x832   : > { %4674 = vmatpush1.bf16.msra.mxu0 %v4621_v29 }
 0x833   : > { %4675 = vmatprep.subr.bf16.mxu0 %v7162_v0 }
 0x835   : > { %v4472_v4 = vpop.f32.mrb[132].mxu1 }
 0x836   : > { %v4474_v3 = vpop.f32.mrb[133].mxu1 }
 0x837   : > { %v4475_v2 = vpop.f32.mrb[134].mxu1  ;;  %v6823_v3 = vld [vmem:[#allocation5 + $0x124] ss:$16 sps:$4 sm:$0xff]  }
 0x838   : > { %v4622_v1 = vpack.c.bf16 %v4475_v2, %v4472_v4  ;;  %v4477_v63 = vpop.f32.mrb[135].mxu1 }
 0x83a   : > { %4676 = vmatpush1.bf16.msra.mxu0 %v4622_v1 }
 0x83b   : > { %4934 = vmatprep.subr.bf16.mxu0 %v7162_v0 }
 0x83d   : > { %v4480_v13 = vpop.f32.mrb[136].mxu1  ;;  %4678 = vmatmul.mubr.bf16.vlgmr.msra.gmra.mrb[184].mxu0 %v6806_v21  ;;  %v6824_v21 = vld [vmem:[#allocation5 + $0x120] ss:$16 sps:$4 sm:$0xff]  }
 0x83e   : > { %v4482_v46 = vpop.f32.mrb[137].mxu1  ;;  %4685 = vmatprep.mubr.bf16.mxu0 %v6807_v20  ;;  %v6825_v20 = vld [vmem:[#allocation5 + $0x144] ss:$16 sps:$4 sm:$0xff]  }
 0x83f   : > { %v4483_v52 = vpop.f32.mrb[138].mxu1 }
 0x840   : > { %v4623_v60 = vpack.c.bf16 %v4483_v52, %v4480_v13  ;;  %v4485_v59 = vpop.f32.mrb[139].mxu1 }
 0x842   : > { %4935 = vmatpush1.bf16.msra.mxu0 %v4623_v60 }
 0x843   : > { %4936 = vmatprep.subr.bf16.mxu0 %v7162_v0 }
 0x845   : > { %v4488_v58 = vpop.f32.mrb[140].mxu1  ;;  %4686 = vmatmul.mubr.bf16.gmra.mrb[188].mxu0 %v6808_v18  ;;  %v6826_v18 = vld [vmem:[#allocation5 + $0x140] ss:$16 sps:$4 sm:$0xff]  }
 0x846   : > { %v4490_v17 = vpop.f32.mrb[141].mxu1  ;;  %4693 = vmatprep.mubr.bf16.mxu0 %v6809_v55  ;;  %v6827_v55 = vld [vmem:[#allocation5 + $0x164] ss:$16 sps:$4 sm:$0xff]  }
 0x847   : > { %v4491_v62 = vpop.f32.mrb[142].mxu1 }
 0x848   : > { %v4624_v36 = vpack.c.bf16 %v4491_v62, %v4488_v58  ;;  %v4493_v19 = vpop.f32.mrb[143].mxu1 }
 0x84a   : > { %4937 = vmatpush1.bf16.msra.mxu0 %v4624_v36 }
 0x84b   : > { %4938 = vmatprep.subr.bf16.mxu0 %v7162_v0 }
 0x84d   : > { %v4496_v16 = vpop.f32.mrb[144].mxu1  ;;  %4694 = vmatmul.mubr.bf16.gmra.mrb[192].mxu0 %v6810_v15  ;;  %v6828_v15 = vld [vmem:[#allocation5 + $0x160] ss:$16 sps:$4 sm:$0xff]  }
 0x84e   : > { %v4498_v27 = vpop.f32.mrb[145].mxu1  ;;  %4701 = vmatprep.mubr.bf16.mxu0 %v6811_v40  ;;  %v6829_v40 = vld [vmem:[#allocation5 + $0x184] ss:$16 sps:$4 sm:$0xff]  }
 0x84f   : > { %v4499_v53 = vpop.f32.mrb[146].mxu1 }
 0x850   : > { %v4625_v11 = vpack.c.bf16 %v4499_v53, %v4496_v16  ;;  %v4501_v10 = vpop.f32.mrb[147].mxu1 }
 0x852   : > { %4939 = vmatpush1.bf16.msra.mxu0 %v4625_v11 }
 0x853   : > { %4940 = vmatprep.subr.bf16.mxu0 %v7162_v0 }
 0x855   : > { %v4504_v8 = vpop.f32.mrb[148].mxu1  ;;  %4702 = vmatmul.mubr.bf16.gmra.mrb[196].mxu0 %v6812_v7  ;;  %v6830_v7 = vld [vmem:[#allocation5 + $0x180] ss:$16 sps:$4 sm:$0xff]  }
 0x856   : > { %v4506_v28 = vpop.f32.mrb[149].mxu1  ;;  %4709 = vmatprep.mubr.bf16.mxu0 %v6813_v6  ;;  %v6831_v6 = vld [vmem:[#allocation5 + $0x1a4] ss:$16 sps:$4 sm:$0xff]  }
 0x857   : > { %v4507_v38 = vpop.f32.mrb[150].mxu1 }
 0x858   : > { %v4626_v25 = vpack.c.bf16 %v4507_v38, %v4504_v8  ;;  %v4509_v31 = vpop.f32.mrb[151].mxu1 }
 0x85a   : > { %4941 = vmatpush1.bf16.msra.mxu0 %v4626_v25 }
 0x85b   : > { %4942 = vmatprep.subr.bf16.mxu0 %v7162_v0 }
 0x85d   : > { %v4512_v57 = vpop.f32.mrb[152].mxu1  ;;  %4710 = vmatmul.mubr.bf16.gmra.mrb[200].mxu0 %v6814_v39  ;;  %v6832_v39 = vld [vmem:[#allocation5 + $0x1a0] ss:$16 sps:$4 sm:$0xff]  }
 0x85e   : > { %v4514_v37 = vpop.f32.mrb[153].mxu1  ;;  %4717 = vmatprep.mubr.bf16.mxu0 %v6815_v33  ;;  %v6833_v33 = vld [vmem:[#allocation5 + $0x1c4] ss:$16 sps:$4 sm:$0xff]  }
 0x85f   : > { %v4515_v32 = vpop.f32.mrb[154].mxu1 }
 0x860   : > { %v4627_v45 = vpack.c.bf16 %v4515_v32, %v4512_v57  ;;  %v4517_v54 = vpop.f32.mrb[155].mxu1 }
 0x862   : > { %4943 = vmatpush1.bf16.msra.mxu0 %v4627_v45 }
 0x863   : > { %4944 = vmatprep.subr.bf16.mxu0 %v7162_v0 }
 0x865   : > { %v4520_v9 = vpop.f32.mrb[156].mxu1  ;;  %4718 = vmatmul.mubr.bf16.gmra.mrb[204].mxu0 %v6816_v26  ;;  %v6834_v26 = vld [vmem:[#allocation5 + $0x1c0] ss:$16 sps:$4 sm:$0xff]  }
 0x866   : > { %v4522_v24 = vpop.f32.mrb[157].mxu1  ;;  %4725 = vmatprep.mubr.bf16.mxu0 %v6817_v23  ;;  %v6835_v23 = vld [vmem:[#allocation5 + $0x1e4] ss:$16 sps:$4 sm:$0xff]  }
 0x867   : > { %v4523_v22 = vpop.f32.mrb[158].mxu1 }
 0x868   : > { %v4628_v56 = vpack.c.bf16 %v4523_v22, %v4520_v9  ;;  %v4525_v50 = vpop.f32.mrb[159].mxu1 }
 0x86a   : > { %4945 = vmatpush1.bf16.msra.mxu0 %v4628_v56 }
 0x86b   : > { %4946 = vmatprep.subr.bf16.mxu0 %v7162_v0 }
 0x86d   : > { %v4528_v14 = vpop.f32.mrb[160].mxu1  ;;  %4726 = vmatmul.mubr.bf16.gmra.mrb[208].mxu0 %v6818_v51  ;;  %v6836_v51 = vld [vmem:[#allocation5 + $0x1e0] ss:$16 sps:$4 sm:$0xff]  }
 0x86e   : > { %v4530_v49 = vpop.f32.mrb[161].mxu1  ;;  %4733 = vmatprep.mubr.bf16.mxu0 %v6819_v48  ;;  %v6837_v48 = vld [vmem:[#allocation5 + $0x204] ss:$16 sps:$4 sm:$0xff]  }
 0x86f   : > { %v4531_v47 = vpop.f32.mrb[162].mxu1 }
 0x870   : > { %v4629_v61 = vpack.c.bf16 %v4531_v47, %v4528_v14  ;;  %v4533_v5 = vpop.f32.mrb[163].mxu1 }
 0x872   : > { %4947 = vmatpush1.bf16.msra.mxu0 %v4629_v61 }
 0x873   : > { %4948 = vmatprep.subr.bf16.mxu0 %v7162_v0 }
 0x875   : > { %v4536_v30 = vpop.f32.mrb[164].mxu1  ;;  %4734 = vmatmul.mubr.bf16.gmra.mrb[212].mxu0 %v6820_v44  ;;  %v6839_v44 = vld [vmem:[#allocation5 + $0x224] ss:$16 sps:$4 sm:$0xff]  }
 0x876   : > { %v4538_v43 = vpop.f32.mrb[165].mxu1  ;;  %4741 = vmatprep.mubr.bf16.mxu0 %v6821_v42  ;;  %v6841_v42 = vld [vmem:[#allocation5 + $0x244] ss:$16 sps:$4 sm:$0xff]  }
 0x877   : > { %v4539_v41 = vpop.f32.mrb[166].mxu1  ;;  %v6840_v43 = vld [vmem:[#allocation5 + $0x220] ss:$16 sps:$4 sm:$0xff]  }
 0x878   : > { %v4630_v34 = vpack.c.bf16 %v4539_v41, %v4536_v30  ;;  %v4541_v35 = vpop.f32.mrb[167].mxu1  ;;  %v6838_v30 = vld [vmem:[#allocation5 + $0x200] ss:$16 sps:$4 sm:$0xff]  }
 0x879   : > { %v6842_v41 = vld [vmem:[#allocation5 + $0x240] ss:$16 sps:$4 sm:$0xff]   ;;  %v6845_v35 = vld [vmem:[#allocation5 + $0x284] ss:$16 sps:$4 sm:$0xff]  }
 0x87a   : > { %4949 = vmatpush1.bf16.msra.mxu0 %v4630_v34  ;;  %v6844_v34 = vld [vmem:[#allocation5 + $0x260] ss:$16 sps:$4 sm:$0xff]  }
 0x87b   : > { %4950 = vmatprep.subr.bf16.mxu0 %v7162_v0 }
 0x87d   : > { %v4544_v29 = vpop.f32.mrb[168].mxu1  ;;  %4742 = vmatmul.mubr.bf16.gmra.mrb[216].mxu0 %v6822_v12  ;;  %v6847_v12 = vld [vmem:[#allocation5 + $0x2a4] ss:$16 sps:$4 sm:$0xff]  }
 0x87e   : > { %v4546_v4 = vpop.f32.mrb[169].mxu1  ;;  %4749 = vmatprep.mubr.bf16.mxu0 %v6823_v3  ;;  %v6849_v3 = vld [vmem:[#allocation5 + $0x2c4] ss:$16 sps:$4 sm:$0xff]  }
 0x87f   : > { %v4547_v2 = vpop.f32.mrb[170].mxu1  ;;  %v6848_v4 = vld [vmem:[#allocation5 + $0x2a0] ss:$16 sps:$4 sm:$0xff]  }
 0x880   : > { %v4631_v1 = vpack.c.bf16 %v4547_v2, %v4544_v29  ;;  %v4549_v63 = vpop.f32.mrb[171].mxu1  ;;  %v6846_v29 = vld [vmem:[#allocation5 + $0x280] ss:$16 sps:$4 sm:$0xff]  }
 0x881   : > { %v6850_v2 = vld [vmem:[#allocation5 + $0x2c0] ss:$16 sps:$4 sm:$0xff]  }
 0x882   : > { %4951 = vmatpush1.bf16.msra.mxu0 %v4631_v1  ;;  %v6851_v1 = vld [vmem:[#allocation5 + $0x2e4] ss:$16 sps:$4 sm:$0xff]   ;;  %v6852_v63 = vld [vmem:[#allocation5 + $0x2e0] ss:$16 sps:$4 sm:$0xff]  }
 0x883   : > { %4952 = vmatprep.subr.bf16.mxu0 %v7162_v0 }
 0x885   : > { %v4552_v13 = vpop.f32.mrb[172].mxu1  ;;  %4750 = vmatmul.mubr.bf16.gmra.mrb[220].mxu0 %v6824_v21  ;;  %v6854_v21 = vld [vmem:[#allocation5 + $0x300] ss:$16 sps:$4 sm:$0xff]  }
 0x886   : > { %v4554_v46 = vpop.f32.mrb[173].mxu1  ;;  %4757 = vmatprep.mubr.bf16.mxu0 %v6825_v20  ;;  %v6856_v20 = vld [vmem:[#allocation5 + $0x320] ss:$16 sps:$4 sm:$0xff]  }
 0x887   : > { %v4555_v52 = vpop.f32.mrb[174].mxu1  ;;  %v6855_v46 = vld [vmem:[#allocation5 + $0x324] ss:$16 sps:$4 sm:$0xff]  }
 0x888   : > { %v4632_v60 = vpack.c.bf16 %v4555_v52, %v4552_v13  ;;  %v4557_v59 = vpop.f32.mrb[175].mxu1  ;;  %v6853_v13 = vld [vmem:[#allocation5 + $0x304] ss:$16 sps:$4 sm:$0xff]  }
 0x889   : > { %v6857_v52 = vld [vmem:[#allocation5 + $0x344] ss:$16 sps:$4 sm:$0xff]  }
 0x88a   : > { %4953 = vmatpush1.bf16.msra.mxu0 %v4632_v60  ;;  %v6858_v60 = vld [vmem:[#allocation5 + $0x340] ss:$16 sps:$4 sm:$0xff]   ;;  %v6859_v59 = vld [vmem:[#allocation5 + $0x364] ss:$16 sps:$4 sm:$0xff]  }
 0x88b   : > { %4954 = vmatprep.subr.bf16.mxu0 %v7162_v0 }
 0x88d   : > { %v4560_v58 = vpop.f32.mrb[176].mxu1  ;;  %4758 = vmatmul.mubr.bf16.gmra.mrb[224].mxu0 %v6826_v18  ;;  %v6861_v18 = vld [vmem:[#allocation5 + $0x384] ss:$16 sps:$4 sm:$0xff]  }
 0x88e   : > { %v4562_v17 = vpop.f32.mrb[177].mxu1  ;;  %4765 = vmatprep.mubr.bf16.mxu0 %v6827_v55  ;;  %v6863_v55 = vld [vmem:[#allocation5 + $0x3a4] ss:$16 sps:$4 sm:$0xff]  }
 0x88f   : > { %v4563_v62 = vpop.f32.mrb[178].mxu1  ;;  %v6862_v17 = vld [vmem:[#allocation5 + $0x380] ss:$16 sps:$4 sm:$0xff]  }
 0x890   : > { %v4633_v36 = vpack.c.bf16 %v4563_v62, %v4560_v58  ;;  %v4565_v19 = vpop.f32.mrb[179].mxu1  ;;  %v6860_v58 = vld [vmem:[#allocation5 + $0x360] ss:$16 sps:$4 sm:$0xff]  }
 0x891   : > { %v6864_v62 = vld [vmem:[#allocation5 + $0x3a0] ss:$16 sps:$4 sm:$0xff]  }
 0x892   : > { %4955 = vmatpush1.bf16.msra.mxu0 %v4633_v36  ;;  %v6865_v36 = vld [vmem:[#allocation5 + $0x3c4] ss:$16 sps:$4 sm:$0xff]   ;;  %v6866_v19 = vld [vmem:[#allocation5 + $0x3c0] ss:$16 sps:$4 sm:$0xff]  }
 0x893   : > { %4956 = vmatprep.subr.bf16.mxu0 %v7162_v0 }
 0x895   : > { %v4568_v16 = vpop.f32.mrb[180].mxu1  ;;  %4766 = vmatmul.mubr.bf16.gmra.mrb[228].mxu0 %v6828_v15  ;;  %v6868_v15 = vld [vmem:[#allocation5 + $0x3e0] ss:$16 sps:$4 sm:$0xff]  }
 0x896   : > { %v4570_v27 = vpop.f32.mrb[181].mxu1  ;;  %4773 = vmatprep.mubr.bf16.mxu0 %v6829_v40  ;;  %v6870_v40 = vld [vmem:[#allocation5 + $0x8] ss:$16 sps:$4 sm:$0xff]  }
 0x897   : > { %v4571_v53 = vpop.f32.mrb[182].mxu1  ;;  %v6869_v27 = vld [vmem:[#allocation5 + $0xc] ss:$16 sps:$4 sm:$0xff]  }
 0x898   : > { %v4634_v11 = vpack.c.bf16 %v4571_v53, %v4568_v16  ;;  %v4573_v10 = vpop.f32.mrb[183].mxu1  ;;  %v6867_v16 = vld [vmem:[#allocation5 + $0x3e4] ss:$16 sps:$4 sm:$0xff]   ;;  %v6871_v53 = vld [vmem:[#allocation5 + $0x2c] ss:$16 sps:$4 sm:$0xff]  }
 0x899   : > { %v6873_v10 = vld [vmem:[#allocation5 + $0x4c] ss:$16 sps:$4 sm:$0xff]  }
 0x89a   : > { %4957 = vmatpush1.bf16.msra.mxu0 %v4634_v11  ;;  %v6872_v11 = vld [vmem:[#allocation5 + $0x28] ss:$16 sps:$4 sm:$0xff]  }
 0x89b   : > { %4958 = vmatprep.subr.bf16.mxu0 %v7162_v0 }
 0x89d   : > { %v4576_v8 = vpop.f32.mrb[184].mxu1  ;;  %4774 = vmatmul.mubr.bf16.gmra.mrb[232].mxu0 %v6830_v7  ;;  %v6875_v7 = vld [vmem:[#allocation5 + $0x6c] ss:$16 sps:$4 sm:$0xff]  }
 0x89e   : > { %v4578_v28 = vpop.f32.mrb[185].mxu1  ;;  %4781 = vmatprep.mubr.bf16.mxu0 %v6831_v6  ;;  %v6877_v6 = vld [vmem:[#allocation5 + $0x8c] ss:$16 sps:$4 sm:$0xff]  }
 0x89f   : > { %v4579_v38 = vpop.f32.mrb[186].mxu1  ;;  %v6876_v28 = vld [vmem:[#allocation5 + $0x68] ss:$16 sps:$4 sm:$0xff]  }
 0x8a0   : > { %v4635_v25 = vpack.c.bf16 %v4579_v38, %v4576_v8  ;;  %v4581_v31 = vpop.f32.mrb[187].mxu1  ;;  %v6874_v8 = vld [vmem:[#allocation5 + $0x48] ss:$16 sps:$4 sm:$0xff]  }
 0x8a1   : > { %v6878_v38 = vld [vmem:[#allocation5 + $0x88] ss:$16 sps:$4 sm:$0xff]  }
 0x8a2   : > { %4959 = vmatpush1.bf16.msra.mxu0 %v4635_v25  ;;  %v6879_v25 = vld [vmem:[#allocation5 + $0xac] ss:$16 sps:$4 sm:$0xff]   ;;  %v6880_v31 = vld [vmem:[#allocation5 + $0xa8] ss:$16 sps:$4 sm:$0xff]  }
 0x8a3   : > { %4960 = vmatprep.subr.bf16.mxu0 %v7162_v0 }
 0x8a5   : > { %v4584_v57 = vpop.f32.mrb[188].mxu1  ;;  %4782 = vmatmul.mubr.bf16.gmra.mrb[236].mxu0 %v6832_v39  ;;  %v6882_v39 = vld [vmem:[#allocation5 + $0xc8] ss:$16 sps:$4 sm:$0xff]  }
 0x8a6   : > { %v4586_v37 = vpop.f32.mrb[189].mxu1  ;;  %4789 = vmatprep.mubr.bf16.mxu0 %v6833_v33  ;;  %v6884_v33 = vld [vmem:[#allocation5 + $0xe8] ss:$16 sps:$4 sm:$0xff]  }
 0x8a7   : > { %v4587_v32 = vpop.f32.mrb[190].mxu1  ;;  %v6883_v37 = vld [vmem:[#allocation5 + $0xec] ss:$16 sps:$4 sm:$0xff]  }
 0x8a8   : > { %v4636_v45 = vpack.c.bf16 %v4587_v32, %v4584_v57  ;;  %v4589_v54 = vpop.f32.mrb[191].mxu1  ;;  %v6881_v57 = vld [vmem:[#allocation5 + $0xcc] ss:$16 sps:$4 sm:$0xff]  }
 0x8a9   : > { %v6885_v32 = vld [vmem:[#allocation5 + $0x10c] ss:$16 sps:$4 sm:$0xff]  }
 0x8aa   : > { %4961 = vmatpush1.bf16.msra.mxu0 %v4636_v45  ;;  %v6886_v45 = vld [vmem:[#allocation5 + $0x108] ss:$16 sps:$4 sm:$0xff]   ;;  %v6887_v54 = vld [vmem:[#allocation5 + $0x12c] ss:$16 sps:$4 sm:$0xff]  }
 0x8ab   : > { %4962 = vmatprep.subr.bf16.mxu0 %v7162_v0 }
 0x8ad   : > { %v4592_v9 = vpop.f32.mrb[192].mxu1  ;;  %4790 = vmatmul.mubr.bf16.gmra.mrb[240].mxu0 %v6834_v26  ;;  %v6889_v26 = vld [vmem:[#allocation5 + $0x14c] ss:$16 sps:$4 sm:$0xff]  }
 0x8ae   : > { %v4594_v24 = vpop.f32.mrb[193].mxu1  ;;  %4797 = vmatprep.mubr.bf16.mxu0 %v6835_v23  ;;  %v6891_v23 = vld [vmem:[#allocation5 + $0x16c] ss:$16 sps:$4 sm:$0xff]  }
 0x8af   : > { %v4595_v22 = vpop.f32.mrb[194].mxu1  ;;  %v6890_v24 = vld [vmem:[#allocation5 + $0x148] ss:$16 sps:$4 sm:$0xff]  }
 0x8b0   : > { %v4637_v56 = vpack.c.bf16 %v4595_v22, %v4592_v9  ;;  %v4597_v50 = vpop.f32.mrb[195].mxu1  ;;  %v6888_v9 = vld [vmem:[#allocation5 + $0x128] ss:$16 sps:$4 sm:$0xff]  }
 0x8b1   : > { %v6892_v22 = vld [vmem:[#allocation5 + $0x168] ss:$16 sps:$4 sm:$0xff]  }
 0x8b2   : > { %4963 = vmatpush1.bf16.msra.mxu0 %v4637_v56  ;;  %v6893_v56 = vld [vmem:[#allocation5 + $0x18c] ss:$16 sps:$4 sm:$0xff]   ;;  %v6894_v50 = vld [vmem:[#allocation5 + $0x188] ss:$16 sps:$4 sm:$0xff]  }
 0x8b3   : > { %4964 = vmatprep.subr.bf16.mxu0 %v7162_v0  ;;  %v6843_v0 = vld [vmem:[#allocation5 + $0x264] ss:$16 sps:$4 sm:$0xff]  }
 0x8b5   : > { %v4600_v14 = vpop.f32.mrb[196].mxu1  ;;  %4798 = vmatmul.mubr.bf16.gmra.mrb[244].mxu0 %v6836_v51  ;;  %v6896_v51 = vld [vmem:[#allocation5 + $0x1a8] ss:$16 sps:$4 sm:$0xff]  }
 0x8b6   : > { %v4602_v49 = vpop.f32.mrb[197].mxu1  ;;  %4805 = vmatprep.mubr.bf16.mxu0 %v6837_v48  ;;  %v6898_v48 = vld [vmem:[#allocation5 + $0x1c8] ss:$16 sps:$4 sm:$0xff]  }
 0x8b7   : > { %v4603_v47 = vpop.f32.mrb[198].mxu1  ;;  %v6897_v49 = vld [vmem:[#allocation5 + $0x1cc] ss:$16 sps:$4 sm:$0xff]  }
 0x8b8   : > { %v4638_v61 = vpack.c.bf16 %v4603_v47, %v4600_v14  ;;  %v4605_v5 = vpop.f32.mrb[199].mxu1  ;;  %v6895_v14 = vld [vmem:[#allocation5 + $0x1ac] ss:$16 sps:$4 sm:$0xff]  }
 0x8b9   : > { %v6899_v47 = vld [vmem:[#allocation5 + $0x1ec] ss:$16 sps:$4 sm:$0xff]  }
 0x8ba   : > { %4965 = vmatpush1.bf16.msra.mxu0 %v4638_v61  ;;  %v6900_v61 = vld [vmem:[#allocation5 + $0x1e8] ss:$16 sps:$4 sm:$0xff]   ;;  %v6901_v5 = vld [vmem:[#allocation5 + $0x20c] ss:$16 sps:$4 sm:$0xff]  }
 0x8bd   : > { %4806 = vmatmul.mubr.bf16.gmra.mrb[248].mxu0 %v6838_v30  ;;  %v6902_v30 = vld [vmem:[#allocation5 + $0x208] ss:$16 sps:$4 sm:$0xff]  }
 0x8be   : > { %4813 = vmatprep.mubr.bf16.mxu0 %v6839_v44  ;;  %v6903_v44 = vld [vmem:[#allocation5 + $0x22c] ss:$16 sps:$4 sm:$0xff]  }
 0x8c5   : > { %4814 = vmatmul.mubr.bf16.gmra.mrb[252].mxu0 %v6840_v43  ;;  %v6904_v43 = vld [vmem:[#allocation5 + $0x228] ss:$16 sps:$4 sm:$0xff]  }
 0x8c6   : > { %4821 = vmatprep.mubr.bf16.mxu0 %v6841_v42  ;;  %v6905_v42 = vld [vmem:[#allocation5 + $0x24c] ss:$16 sps:$4 sm:$0xff]  }
 0x8cd   : > { %4822 = vmatmul.mubr.bf16.gmra.mrb[0].mxu0 %v6842_v41  ;;  %v6906_v41 = vld [vmem:[#allocation5 + $0x248] ss:$16 sps:$4 sm:$0xff]  }
 0x8ce   : > { %4829 = vmatprep.mubr.bf16.mxu0 %v6843_v0  ;;  %v6907_v0 = vld [vmem:[#allocation5 + $0x26c] ss:$16 sps:$4 sm:$0xff]  }
 0x8d5   : > { %4830 = vmatmul.mubr.bf16.gmra.mrb[4].mxu0 %v6844_v34  ;;  %v6908_v34 = vld [vmem:[#allocation5 + $0x268] ss:$16 sps:$4 sm:$0xff]  }
 0x8d6   : > { %4837 = vmatprep.mubr.bf16.mxu0 %v6845_v35  ;;  %v6909_v35 = vld [vmem:[#allocation5 + $0x28c] ss:$16 sps:$4 sm:$0xff]  }
 0x8dd   : > { %4838 = vmatmul.mubr.bf16.gmra.mrb[8].mxu0 %v6846_v29  ;;  %v6910_v29 = vld [vmem:[#allocation5 + $0x288] ss:$16 sps:$4 sm:$0xff]  }
 0x8de   : > { %4845 = vmatprep.mubr.bf16.mxu0 %v6847_v12  ;;  %v6911_v12 = vld [vmem:[#allocation5 + $0x2ac] ss:$16 sps:$4 sm:$0xff]  }
 0x8e5   : > { %4846 = vmatmul.mubr.bf16.gmra.mrb[12].mxu0 %v6848_v4  ;;  %v6912_v4 = vld [vmem:[#allocation5 + $0x2a8] ss:$16 sps:$4 sm:$0xff]  }
 0x8e6   : > { %4853 = vmatprep.mubr.bf16.mxu0 %v6849_v3  ;;  %v6913_v3 = vld [vmem:[#allocation5 + $0x2cc] ss:$16 sps:$4 sm:$0xff]  }
 0x8ed   : > { %4854 = vmatmul.mubr.bf16.gmra.mrb[16].mxu0 %v6850_v2  ;;  %v6914_v2 = vld [vmem:[#allocation5 + $0x2c8] ss:$16 sps:$4 sm:$0xff]  }
 0x8ee   : > { %4861 = vmatprep.mubr.bf16.mxu0 %v6851_v1  ;;  %v6915_v1 = vld [vmem:[#allocation5 + $0x2ec] ss:$16 sps:$4 sm:$0xff]  }
 0x8f5   : > { %4862 = vmatmul.mubr.bf16.gmra.mrb[20].mxu0 %v6852_v63  ;;  %v6916_v63 = vld [vmem:[#allocation5 + $0x2e8] ss:$16 sps:$4 sm:$0xff]  }
 0x8f6   : > { %4869 = vmatprep.mubr.bf16.mxu0 %v6853_v13  ;;  %v6917_v13 = vld [vmem:[#allocation5 + $0x30c] ss:$16 sps:$4 sm:$0xff]  }
 0x8fd   : > { %4870 = vmatmul.mubr.bf16.gmra.mrb[24].mxu0 %v6854_v21  ;;  %v6918_v21 = vld [vmem:[#allocation5 + $0x308] ss:$16 sps:$4 sm:$0xff]  }
 0x8fe   : > { %4877 = vmatprep.mubr.bf16.mxu0 %v6855_v46  ;;  %v6919_v46 = vld [vmem:[#allocation5 + $0x32c] ss:$16 sps:$4 sm:$0xff]  }
 0x905   : > { %4878 = vmatmul.mubr.bf16.gmra.mrb[28].mxu0 %v6856_v20  ;;  %v6920_v20 = vld [vmem:[#allocation5 + $0x328] ss:$16 sps:$4 sm:$0xff]  }
 0x906   : > { %4885 = vmatprep.mubr.bf16.mxu0 %v6857_v52  ;;  %v6921_v52 = vld [vmem:[#allocation5 + $0x34c] ss:$16 sps:$4 sm:$0xff]  }
 0x90d   : > { %4886 = vmatmul.mubr.bf16.gmra.mrb[32].mxu0 %v6858_v60  ;;  %v6922_v60 = vld [vmem:[#allocation5 + $0x348] ss:$16 sps:$4 sm:$0xff]  }
 0x90e   : > { %4893 = vmatprep.mubr.bf16.mxu0 %v6859_v59  ;;  %v7971_v59 = vld [vmem:[%s8161_s7] ss:$0 sm:$0xff] }
 0x915   : > { %4894 = vmatmul.mubr.bf16.gmra.mrb[36].mxu0 %v6860_v58  ;;  %v6923_v58 = vld [vmem:[#allocation5 + $0x36c] ss:$16 sps:$4 sm:$0xff]  }
 0x916   : > { %4901 = vmatprep.mubr.bf16.mxu0 %v6861_v18 }
 0x91d   : > { %4902 = vmatmul.mubr.bf16.gmra.mrb[40].mxu0 %v6862_v17 }
 0x91e   : > { %4909 = vmatprep.mubr.bf16.mxu0 %v6863_v55 }
 0x925   : > { %4910 = vmatmul.mubr.bf16.gmra.mrb[44].mxu0 %v6864_v62 }
 0x926   : > { %4917 = vmatprep.mubr.bf16.mxu0 %v6865_v36 }
 0x92d   : > { %4918 = vmatmul.mubr.bf16.gmra.mrb[48].mxu0 %v6866_v19 }
 0x92e   : > { %4925 = vmatprep.mubr.bf16.mxu0 %v6867_v16  ;;  %v6924_v16 = vld [vmem:[#allocation5 + $0x368] ss:$16 sps:$4 sm:$0xff]  }
 0x935   : > { %4926 = vmatmul.mubr.bf16.gmra.mrb[52].mxu0 %v6868_v15  ;;  %v6925_v15 = vld [vmem:[#allocation5 + $0x38c] ss:$16 sps:$4 sm:$0xff]  }
 0x936   : > { %4966 = vmatprep.mubr.bf16.mxu0 %v6869_v27 }
 0x93d   : > { %4967 = vmatmul.mubr.bf16.vlgmr.msra.gmra.mrb[184].mxu0 %v6870_v40 }
 0x93e   : > { %4974 = vmatprep.mubr.bf16.mxu0 %v6871_v53 }
 0x945   : > { %4975 = vmatmul.mubr.bf16.gmra.mrb[188].mxu0 %v6872_v11 }
 0x946   : > { %4982 = vmatprep.mubr.bf16.mxu0 %v6873_v10 }
 0x94d   : > { %4983 = vmatmul.mubr.bf16.gmra.mrb[192].mxu0 %v6874_v8 }
 0x94e   : > { %4990 = vmatprep.mubr.bf16.mxu0 %v6875_v7  ;;  %v6926_v7 = vld [vmem:[#allocation5 + $0x388] ss:$16 sps:$4 sm:$0xff]  }
 0x955   : > { %4991 = vmatmul.mubr.bf16.gmra.mrb[196].mxu0 %v6876_v28  ;;  %v6927_v28 = vld [vmem:[#allocation5 + $0x3ac] ss:$16 sps:$4 sm:$0xff]  }
 0x956   : > { %4998 = vmatprep.mubr.bf16.mxu0 %v6877_v6 }
 0x95d   : > { %4999 = vmatmul.mubr.bf16.gmra.mrb[200].mxu0 %v6878_v38 }
 0x95e   : > { %5006 = vmatprep.mubr.bf16.mxu0 %v6879_v25 }
 0x965   : > { %5007 = vmatmul.mubr.bf16.gmra.mrb[204].mxu0 %v6880_v31 }
 0x966   : > { %5014 = vmatprep.mubr.bf16.mxu0 %v6881_v57 }
 0x96d   : > { %5015 = vmatmul.mubr.bf16.gmra.mrb[208].mxu0 %v6882_v39 }
 0x96e   : > { %5022 = vmatprep.mubr.bf16.mxu0 %v6883_v37  ;;  %v6928_v37 = vld [vmem:[#allocation5 + $0x3a8] ss:$16 sps:$4 sm:$0xff]  }
 0x975   : > { %5023 = vmatmul.mubr.bf16.gmra.mrb[212].mxu0 %v6884_v33  ;;  %v6929_v33 = vld [vmem:[#allocation5 + $0x3cc] ss:$16 sps:$4 sm:$0xff]  }
 0x976   : > { %5030 = vmatprep.mubr.bf16.mxu0 %v6885_v32 }
 0x97d   : > { %5031 = vmatmul.mubr.bf16.gmra.mrb[216].mxu0 %v6886_v45 }
 0x97e   : > { %5038 = vmatprep.mubr.bf16.mxu0 %v6887_v54 }
 0x985   : > { %5039 = vmatmul.mubr.bf16.gmra.mrb[220].mxu0 %v6888_v9 }
 0x986   : > { %5046 = vmatprep.mubr.bf16.mxu0 %v6889_v26 }
 0x98d   : > { %5047 = vmatmul.mubr.bf16.gmra.mrb[224].mxu0 %v6890_v24 }
 0x98e   : > { %5054 = vmatprep.mubr.bf16.mxu0 %v6891_v23  ;;  %v6930_v23 = vld [vmem:[#allocation5 + $0x3c8] ss:$16 sps:$4 sm:$0xff]  }
 0x995   : > { %5055 = vmatmul.mubr.bf16.gmra.mrb[228].mxu0 %v6892_v22  ;;  %v6931_v22 = vld [vmem:[#allocation5 + $0x3ec] ss:$16 sps:$4 sm:$0xff]  }
 0x996   : > { %5062 = vmatprep.mubr.bf16.mxu0 %v6893_v56 }
 0x99d   : > { %5063 = vmatmul.mubr.bf16.gmra.mrb[232].mxu0 %v6894_v50 }
 0x99e   : > { %5070 = vmatprep.mubr.bf16.mxu0 %v6895_v14 }
 0x9a5   : > { %5071 = vmatmul.mubr.bf16.gmra.mrb[236].mxu0 %v6896_v51 }
 0x9a6   : > { %5078 = vmatprep.mubr.bf16.mxu0 %v6897_v49 }
 0x9ad   : > { %5079 = vmatmul.mubr.bf16.gmra.mrb[240].mxu0 %v6898_v48 }
 0x9ae   : > { %5086 = vmatprep.mubr.bf16.mxu0 %v6899_v47  ;;  %v6932_v47 = vld [vmem:[#allocation5 + $0x3e8] ss:$16 sps:$4 sm:$0xff]  }
 0x9b5   : > { %5087 = vmatmul.mubr.bf16.gmra.mrb[244].mxu0 %v6900_v61 }
 0x9b6   : > { %5094 = vmatprep.mubr.bf16.mxu0 %v6901_v5 }
 0x9bd   : > { %5095 = vmatmul.mubr.bf16.gmra.mrb[248].mxu0 %v6902_v30 }
 0x9be   : > { %5102 = vmatprep.mubr.bf16.mxu0 %v6903_v44 }
 0x9c5   : > { %5103 = vmatmul.mubr.bf16.gmra.mrb[252].mxu0 %v6904_v43 }
 0x9c6   : > { %5110 = vmatprep.mubr.bf16.mxu0 %v6905_v42 }
 0x9cd   : > { %5111 = vmatmul.mubr.bf16.gmra.mrb[0].mxu0 %v6906_v41 }
 0x9ce   : > { %5118 = vmatprep.mubr.bf16.mxu0 %v6907_v0 }
 0x9d5   : > { %5119 = vmatmul.mubr.bf16.gmra.mrb[4].mxu0 %v6908_v34 }
 0x9d6   : > { %5126 = vmatprep.mubr.bf16.mxu0 %v6909_v35 }
 0x9dd   : > { %5127 = vmatmul.mubr.bf16.gmra.mrb[8].mxu0 %v6910_v29 }
 0x9de   : > { %5134 = vmatprep.mubr.bf16.mxu0 %v6911_v12 }
 0x9e5   : > { %5135 = vmatmul.mubr.bf16.gmra.mrb[12].mxu0 %v6912_v4 }
 0x9e6   : > { %5142 = vmatprep.mubr.bf16.mxu0 %v6913_v3 }
 0x9ed   : > { %5143 = vmatmul.mubr.bf16.gmra.mrb[16].mxu0 %v6914_v2 }
 0x9ee   : > { %5150 = vmatprep.mubr.bf16.mxu0 %v6915_v1 }
 0x9f5   : > { %5151 = vmatmul.mubr.bf16.gmra.mrb[20].mxu0 %v6916_v63 }
 0x9f6   : > { %5158 = vmatprep.mubr.bf16.mxu0 %v6917_v13 }
 0x9fd   : > { %5159 = vmatmul.mubr.bf16.gmra.mrb[24].mxu0 %v6918_v21 }
 0x9fe   : > { %5166 = vmatprep.mubr.bf16.mxu0 %v6919_v46 }
 0xa05   : > { %5167 = vmatmul.mubr.bf16.gmra.mrb[28].mxu0 %v6920_v20 }
 0xa06   : > { %5174 = vmatprep.mubr.bf16.mxu0 %v6921_v52 }
 0xa0d   : > { %5175 = vmatmul.mubr.bf16.gmra.mrb[32].mxu0 %v6922_v60 }
 0xa0e   : > { %5182 = vmatprep.mubr.bf16.mxu0 %v6923_v58 }
 0xa10   : > { %v4968_v18 = vpop.f32.mrb[184].mxu0 }
 0xa11   : > { %v5821_v17 = vadd.f32 %v7971_v59, %v4968_v18  ;;  %v4970_v55 = vpop.f32.mrb[185].mxu0 }
 0xa12   : > { %v4971_v62 = vpop.f32.mrb[186].mxu0 }
 0xa13   : > { %5223 = vst [vmem:[%s7974_s10] sm:$0xff] %v5821_v17  ;;  %v5822_v36 = vadd.f32 %v7971_v59, %v4971_v62  ;;  %v4973_v19 = vpop.f32.mrb[187].mxu0 }
 0xa15   : > { %5224 = vst [vmem:[%s7974_s10 + $0x8] sm:$0xff] %v5822_v36  ;;  %5183 = vmatmul.mubr.bf16.gmra.mrb[36].mxu0 %v6924_v16 }
 0xa16   : > { %5190 = vmatprep.mubr.bf16.mxu0 %v6925_v15 }
 0xa18   : > { %v4976_v27 = vpop.f32.mrb[188].mxu0 }
 0xa19   : > { %v5823_v40 = vadd.f32 %v7971_v59, %v4976_v27  ;;  %v4978_v53 = vpop.f32.mrb[189].mxu0 }
 0xa1a   : > { %v4979_v11 = vpop.f32.mrb[190].mxu0 }
 0xa1b   : > { %5225 = vst [vmem:[%s7974_s10 + $0x10] sm:$0xff] %v5823_v40  ;;  %v5824_v10 = vadd.f32 %v7971_v59, %v4979_v11  ;;  %v4981_v8 = vpop.f32.mrb[191].mxu0 }
 0xa1d   : > { %5226 = vst [vmem:[%s7974_s10 + $0x18] sm:$0xff] %v5824_v10  ;;  %5191 = vmatmul.mubr.bf16.gmra.mrb[40].mxu0 %v6926_v7 }
 0xa1e   : > { %5198 = vmatprep.mubr.bf16.mxu0 %v6927_v28 }
 0xa20   : > { %v4984_v6 = vpop.f32.mrb[192].mxu0 }
 0xa21   : > { %v5825_v38 = vadd.f32 %v7971_v59, %v4984_v6  ;;  %v4986_v25 = vpop.f32.mrb[193].mxu0 }
 0xa22   : > { %v4987_v31 = vpop.f32.mrb[194].mxu0 }
 0xa23   : > { %5227 = vst [vmem:[%s7974_s10 + $0x20] sm:$0xff] %v5825_v38  ;;  %v5826_v57 = vadd.f32 %v7971_v59, %v4987_v31  ;;  %v4989_v39 = vpop.f32.mrb[195].mxu0 }
 0xa25   : > { %5228 = vst [vmem:[%s7974_s10 + $0x28] sm:$0xff] %v5826_v57  ;;  %5199 = vmatmul.mubr.bf16.gmra.mrb[44].mxu0 %v6928_v37 }
 0xa26   : > { %5206 = vmatprep.mubr.bf16.mxu0 %v6929_v33 }
 0xa28   : > { %v4992_v32 = vpop.f32.mrb[196].mxu0 }
 0xa29   : > { %v5827_v45 = vadd.f32 %v7971_v59, %v4992_v32  ;;  %v4994_v54 = vpop.f32.mrb[197].mxu0 }
 0xa2a   : > { %v4995_v9 = vpop.f32.mrb[198].mxu0 }
 0xa2b   : > { %5229 = vst [vmem:[%s7974_s10 + $0x30] sm:$0xff] %v5827_v45  ;;  %v5828_v26 = vadd.f32 %v7971_v59, %v4995_v9  ;;  %v4997_v24 = vpop.f32.mrb[199].mxu0 }
 0xa2d   : > { %5230 = vst [vmem:[%s7974_s10 + $0x38] sm:$0xff] %v5828_v26  ;;  %5207 = vmatmul.mubr.bf16.gmra.mrb[48].mxu0 %v6930_v23 }
 0xa2e   : > { %5214 = vmatprep.mubr.bf16.mxu0 %v6931_v22 }
 0xa30   : > { %v5000_v56 = vpop.f32.mrb[200].mxu0 }
 0xa31   : > { %v5829_v50 = vadd.f32 %v7971_v59, %v5000_v56  ;;  %v5002_v14 = vpop.f32.mrb[201].mxu0 }
 0xa32   : > { %v5003_v51 = vpop.f32.mrb[202].mxu0 }
 0xa33   : > { %5231 = vst [vmem:[%s7974_s10 + $0x40] sm:$0xff] %v5829_v50  ;;  %v5830_v49 = vadd.f32 %v7971_v59, %v5003_v51  ;;  %v5005_v48 = vpop.f32.mrb[203].mxu0 }
 0xa35   : > { %5232 = vst [vmem:[%s7974_s10 + $0x48] sm:$0xff] %v5830_v49  ;;  %5215 = vmatmul.mubr.bf16.gmra.mrb[52].mxu0 %v6932_v47 }
 0xa38   : > { %v5008_v61 = vpop.f32.mrb[204].mxu0 }
 0xa39   : > { %v5831_v5 = vadd.f32 %v7971_v59, %v5008_v61  ;;  %v5010_v30 = vpop.f32.mrb[205].mxu0 }
 0xa3a   : > { %v5011_v44 = vpop.f32.mrb[206].mxu0 }
 0xa3b   : > { %5233 = vst [vmem:[%s7974_s10 + $0x50] sm:$0xff] %v5831_v5  ;;  %v5832_v43 = vadd.f32 %v7971_v59, %v5011_v44  ;;  %v5013_v42 = vpop.f32.mrb[207].mxu0 }
 0xa3d   : > { %5234 = vst [vmem:[%s7974_s10 + $0x58] sm:$0xff] %v5832_v43 }
 0xa40   : > { %v5016_v41 = vpop.f32.mrb[208].mxu0 }
 0xa41   : > { %v5833_v0 = vadd.f32 %v7971_v59, %v5016_v41  ;;  %v5018_v34 = vpop.f32.mrb[209].mxu0 }
 0xa42   : > { %v5019_v35 = vpop.f32.mrb[210].mxu0 }
 0xa43   : > { %5235 = vst [vmem:[%s7974_s10 + $0x60] sm:$0xff] %v5833_v0  ;;  %v5834_v29 = vadd.f32 %v7971_v59, %v5019_v35  ;;  %v5021_v12 = vpop.f32.mrb[211].mxu0 }
 0xa45   : > { %5236 = vst [vmem:[%s7974_s10 + $0x68] sm:$0xff] %v5834_v29 }
 0xa48   : > { %v5024_v4 = vpop.f32.mrb[212].mxu0 }
 0xa49   : > { %v5835_v3 = vadd.f32 %v7971_v59, %v5024_v4  ;;  %v5026_v2 = vpop.f32.mrb[213].mxu0 }
 0xa4a   : > { %v5027_v1 = vpop.f32.mrb[214].mxu0 }
 0xa4b   : > { %5237 = vst [vmem:[%s7974_s10 + $0x70] sm:$0xff] %v5835_v3  ;;  %v5836_v63 = vadd.f32 %v7971_v59, %v5027_v1  ;;  %v5029_v13 = vpop.f32.mrb[215].mxu0 }
 0xa4d   : > { %5238 = vst [vmem:[%s7974_s10 + $0x78] sm:$0xff] %v5836_v63 }
 0xa50   : > { %v5032_v21 = vpop.f32.mrb[216].mxu0 }
 0xa51   : > { %v5837_v46 = vadd.f32 %v7971_v59, %v5032_v21  ;;  %v5034_v20 = vpop.f32.mrb[217].mxu0 }
 0xa52   : > { %v5035_v52 = vpop.f32.mrb[218].mxu0 }
 0xa53   : > { %5239 = vst [vmem:[%s7974_s10 + $0x80] sm:$0xff] %v5837_v46  ;;  %v5838_v60 = vadd.f32 %v7971_v59, %v5035_v52  ;;  %v5037_v58 = vpop.f32.mrb[219].mxu0 }
 0xa55   : > { %5240 = vst [vmem:[%s7974_s10 + $0x88] sm:$0xff] %v5838_v60 }
 0xa58   : > { %v5040_v18 = vpop.f32.mrb[220].mxu0 }
 0xa59   : > { %v5839_v17 = vadd.f32 %v7971_v59, %v5040_v18  ;;  %v5042_v55 = vpop.f32.mrb[221].mxu0 }
 0xa5a   : > { %v5043_v62 = vpop.f32.mrb[222].mxu0 }
 0xa5b   : > { %5241 = vst [vmem:[%s7974_s10 + $0x90] sm:$0xff] %v5839_v17  ;;  %v5840_v36 = vadd.f32 %v7971_v59, %v5043_v62  ;;  %v5045_v19 = vpop.f32.mrb[223].mxu0 }
 0xa5d   : > { %5242 = vst [vmem:[%s7974_s10 + $0x98] sm:$0xff] %v5840_v36 }
 0xa60   : > { %v5048_v16 = vpop.f32.mrb[224].mxu0 }
 0xa61   : > { %v5841_v15 = vadd.f32 %v7971_v59, %v5048_v16  ;;  %v5050_v27 = vpop.f32.mrb[225].mxu0 }
 0xa62   : > { %v5051_v40 = vpop.f32.mrb[226].mxu0 }
 0xa63   : > { %5243 = vst [vmem:[%s7974_s10 + $0xa0] sm:$0xff] %v5841_v15  ;;  %v5842_v53 = vadd.f32 %v7971_v59, %v5051_v40  ;;  %v5053_v11 = vpop.f32.mrb[227].mxu0 }
 0xa65   : > { %5244 = vst [vmem:[%s7974_s10 + $0xa8] sm:$0xff] %v5842_v53 }
 0xa68   : > { %v5056_v10 = vpop.f32.mrb[228].mxu0 }
 0xa69   : > { %v5843_v8 = vadd.f32 %v7971_v59, %v5056_v10  ;;  %v5058_v7 = vpop.f32.mrb[229].mxu0 }
 0xa6a   : > { %v5059_v28 = vpop.f32.mrb[230].mxu0 }
 0xa6b   : > { %5245 = vst [vmem:[%s7974_s10 + $0xb0] sm:$0xff] %v5843_v8  ;;  %v5844_v6 = vadd.f32 %v7971_v59, %v5059_v28  ;;  %v5061_v38 = vpop.f32.mrb[231].mxu0 }
 0xa6d   : > { %5246 = vst [vmem:[%s7974_s10 + $0xb8] sm:$0xff] %v5844_v6 }
 0xa70   : > { %v5064_v25 = vpop.f32.mrb[232].mxu0 }
 0xa71   : > { %v5845_v31 = vadd.f32 %v7971_v59, %v5064_v25  ;;  %v5066_v57 = vpop.f32.mrb[233].mxu0 }
 0xa72   : > { %v5067_v39 = vpop.f32.mrb[234].mxu0 }
 0xa73   : > { %5247 = vst [vmem:[%s7974_s10 + $0xc0] sm:$0xff] %v5845_v31  ;;  %v5846_v37 = vadd.f32 %v7971_v59, %v5067_v39  ;;  %v5069_v33 = vpop.f32.mrb[235].mxu0 }
 0xa75   : > { %5248 = vst [vmem:[%s7974_s10 + $0xc8] sm:$0xff] %v5846_v37 }
 0xa78   : > { %v5072_v32 = vpop.f32.mrb[236].mxu0 }
 0xa79   : > { %v5847_v45 = vadd.f32 %v7971_v59, %v5072_v32  ;;  %v5074_v54 = vpop.f32.mrb[237].mxu0 }
 0xa7a   : > { %v5075_v9 = vpop.f32.mrb[238].mxu0 }
 0xa7b   : > { %5249 = vst [vmem:[%s7974_s10 + $0xd0] sm:$0xff] %v5847_v45  ;;  %v5848_v26 = vadd.f32 %v7971_v59, %v5075_v9  ;;  %v5077_v24 = vpop.f32.mrb[239].mxu0 }
 0xa7d   : > { %5250 = vst [vmem:[%s7974_s10 + $0xd8] sm:$0xff] %v5848_v26 }
 0xa80   : > { %v5080_v23 = vpop.f32.mrb[240].mxu0 }
 0xa81   : > { %v5849_v22 = vadd.f32 %v7971_v59, %v5080_v23  ;;  %v5082_v56 = vpop.f32.mrb[241].mxu0 }
 0xa82   : > { %v5083_v50 = vpop.f32.mrb[242].mxu0 }
 0xa83   : > { %5251 = vst [vmem:[%s7974_s10 + $0xe0] sm:$0xff] %v5849_v22  ;;  %v5850_v14 = vadd.f32 %v7971_v59, %v5083_v50  ;;  %v5085_v51 = vpop.f32.mrb[243].mxu0 }
 0xa85   : > { %5252 = vst [vmem:[%s7974_s10 + $0xe8] sm:$0xff] %v5850_v14 }
 0xa88   : > { %v5088_v49 = vpop.f32.mrb[244].mxu0 }
 0xa89   : > { %v5851_v48 = vadd.f32 %v7971_v59, %v5088_v49  ;;  %v5090_v47 = vpop.f32.mrb[245].mxu0 }
 0xa8a   : > { %v5091_v61 = vpop.f32.mrb[246].mxu0 }
 0xa8b   : > { %5253 = vst [vmem:[%s7974_s10 + $0xf0] sm:$0xff] %v5851_v48  ;;  %v5852_v5 = vadd.f32 %v7971_v59, %v5091_v61  ;;  %v5093_v30 = vpop.f32.mrb[247].mxu0 }
 0xa8d   : > { %5254 = vst [vmem:[%s7974_s10 + $0xf8] sm:$0xff] %v5852_v5 }
 0xa90   : > { %v5096_v44 = vpop.f32.mrb[248].mxu0 }
 0xa91   : > { %v5853_v43 = vadd.f32 %v7971_v59, %v5096_v44  ;;  %v5098_v42 = vpop.f32.mrb[249].mxu0 }
 0xa92   : > { %v5099_v41 = vpop.f32.mrb[250].mxu0 }
 0xa93   : > { %5255 = vst [vmem:[%s7974_s10 + $0x100] sm:$0xff] %v5853_v43  ;;  %v5854_v0 = vadd.f32 %v7971_v59, %v5099_v41  ;;  %v5101_v34 = vpop.f32.mrb[251].mxu0 }
 0xa95   : > { %5256 = vst [vmem:[%s7974_s10 + $0x108] sm:$0xff] %v5854_v0 }
 0xa98   : > { %v5104_v35 = vpop.f32.mrb[252].mxu0 }
 0xa99   : > { %v5855_v29 = vadd.f32 %v7971_v59, %v5104_v35  ;;  %v5106_v12 = vpop.f32.mrb[253].mxu0 }
 0xa9a   : > { %v5107_v4 = vpop.f32.mrb[254].mxu0 }
 0xa9b   : > { %5257 = vst [vmem:[%s7974_s10 + $0x110] sm:$0xff] %v5855_v29  ;;  %v5856_v3 = vadd.f32 %v7971_v59, %v5107_v4  ;;  %v5109_v2 = vpop.f32.mrb[255].mxu0 }
 0xa9d   : > { %5258 = vst [vmem:[%s7974_s10 + $0x118] sm:$0xff] %v5856_v3 }
 0xaa0   : > { %v5112_v1 = vpop.f32.mrb[0].mxu0 }
 0xaa1   : > { %v5857_v63 = vadd.f32 %v7971_v59, %v5112_v1  ;;  %v5114_v13 = vpop.f32.mrb[1].mxu0 }
 0xaa2   : > { %v5115_v21 = vpop.f32.mrb[2].mxu0 }
 0xaa3   : > { %5259 = vst [vmem:[%s7974_s10 + $0x120] sm:$0xff] %v5857_v63  ;;  %v5858_v46 = vadd.f32 %v7971_v59, %v5115_v21  ;;  %v5117_v20 = vpop.f32.mrb[3].mxu0 }
 0xaa5   : > { %5260 = vst [vmem:[%s7974_s10 + $0x128] sm:$0xff] %v5858_v46 }
 0xaa8   : > { %v5120_v52 = vpop.f32.mrb[4].mxu0 }
 0xaa9   : > { %v5859_v60 = vadd.f32 %v7971_v59, %v5120_v52  ;;  %v5122_v58 = vpop.f32.mrb[5].mxu0 }
 0xaaa   : > { %v5123_v18 = vpop.f32.mrb[6].mxu0 }
 0xaab   : > { %5261 = vst [vmem:[%s7974_s10 + $0x130] sm:$0xff] %v5859_v60  ;;  %v5860_v17 = vadd.f32 %v7971_v59, %v5123_v18  ;;  %v5125_v55 = vpop.f32.mrb[7].mxu0 }
 0xaad   : > { %5262 = vst [vmem:[%s7974_s10 + $0x138] sm:$0xff] %v5860_v17 }
 0xab0   : > { %v5128_v62 = vpop.f32.mrb[8].mxu0 }
 0xab1   : > { %v5861_v36 = vadd.f32 %v7971_v59, %v5128_v62  ;;  %v5130_v19 = vpop.f32.mrb[9].mxu0 }
 0xab2   : > { %v5131_v16 = vpop.f32.mrb[10].mxu0 }
 0xab3   : > { %5263 = vst [vmem:[%s7974_s10 + $0x140] sm:$0xff] %v5861_v36  ;;  %v5862_v15 = vadd.f32 %v7971_v59, %v5131_v16  ;;  %v5133_v27 = vpop.f32.mrb[11].mxu0 }
 0xab5   : > { %5264 = vst [vmem:[%s7974_s10 + $0x148] sm:$0xff] %v5862_v15 }
 0xab8   : > { %v5136_v40 = vpop.f32.mrb[12].mxu0 }
 0xab9   : > { %v5863_v53 = vadd.f32 %v7971_v59, %v5136_v40  ;;  %v5138_v11 = vpop.f32.mrb[13].mxu0 }
 0xaba   : > { %v5139_v10 = vpop.f32.mrb[14].mxu0 }
 0xabb   : > { %5265 = vst [vmem:[%s7974_s10 + $0x150] sm:$0xff] %v5863_v53  ;;  %v5864_v8 = vadd.f32 %v7971_v59, %v5139_v10  ;;  %v5141_v7 = vpop.f32.mrb[15].mxu0 }
 0xabd   : > { %5266 = vst [vmem:[%s7974_s10 + $0x158] sm:$0xff] %v5864_v8 }
 0xac0   : > { %v5144_v28 = vpop.f32.mrb[16].mxu0 }
 0xac1   : > { %v5865_v6 = vadd.f32 %v7971_v59, %v5144_v28  ;;  %v5146_v38 = vpop.f32.mrb[17].mxu0 }
 0xac2   : > { %v5147_v25 = vpop.f32.mrb[18].mxu0 }
 0xac3   : > { %5267 = vst [vmem:[%s7974_s10 + $0x160] sm:$0xff] %v5865_v6  ;;  %v5866_v31 = vadd.f32 %v7971_v59, %v5147_v25  ;;  %v5149_v57 = vpop.f32.mrb[19].mxu0 }
 0xac5   : > { %5268 = vst [vmem:[%s7974_s10 + $0x168] sm:$0xff] %v5866_v31 }
 0xac8   : > { %v5152_v39 = vpop.f32.mrb[20].mxu0 }
 0xac9   : > { %v5867_v37 = vadd.f32 %v7971_v59, %v5152_v39  ;;  %v5154_v33 = vpop.f32.mrb[21].mxu0 }
 0xaca   : > { %v5155_v32 = vpop.f32.mrb[22].mxu0 }
 0xacb   : > { %5269 = vst [vmem:[%s7974_s10 + $0x170] sm:$0xff] %v5867_v37  ;;  %v5868_v45 = vadd.f32 %v7971_v59, %v5155_v32  ;;  %v5157_v54 = vpop.f32.mrb[23].mxu0 }
 0xacd   : > { %5270 = vst [vmem:[%s7974_s10 + $0x178] sm:$0xff] %v5868_v45 }
 0xad0   : > { %v5160_v9 = vpop.f32.mrb[24].mxu0 }
 0xad1   : > { %v5869_v26 = vadd.f32 %v7971_v59, %v5160_v9  ;;  %v5162_v24 = vpop.f32.mrb[25].mxu0 }
 0xad2   : > { %v5163_v23 = vpop.f32.mrb[26].mxu0 }
 0xad3   : > { %5271 = vst [vmem:[%s7974_s10 + $0x180] sm:$0xff] %v5869_v26  ;;  %v5870_v22 = vadd.f32 %v7971_v59, %v5163_v23  ;;  %v5165_v56 = vpop.f32.mrb[27].mxu0 }
 0xad5   : > { %5272 = vst [vmem:[%s7974_s10 + $0x188] sm:$0xff] %v5870_v22 }
 0xad8   : > { %v5168_v50 = vpop.f32.mrb[28].mxu0 }
 0xad9   : > { %v5871_v14 = vadd.f32 %v7971_v59, %v5168_v50  ;;  %v5170_v51 = vpop.f32.mrb[29].mxu0 }
 0xada   : > { %v5171_v49 = vpop.f32.mrb[30].mxu0 }
 0xadb   : > { %5273 = vst [vmem:[%s7974_s10 + $0x190] sm:$0xff] %v5871_v14  ;;  %v5872_v48 = vadd.f32 %v7971_v59, %v5171_v49  ;;  %v5173_v47 = vpop.f32.mrb[31].mxu0 }
 0xadd   : > { %5274 = vst [vmem:[%s7974_s10 + $0x198] sm:$0xff] %v5872_v48 }
 0xae0   : > { %v5176_v61 = vpop.f32.mrb[32].mxu0 }
 0xae1   : > { %v5873_v5 = vadd.f32 %v7971_v59, %v5176_v61  ;;  %v5178_v30 = vpop.f32.mrb[33].mxu0 }
 0xae2   : > { %v5179_v44 = vpop.f32.mrb[34].mxu0 }
 0xae3   : > { %5275 = vst [vmem:[%s7974_s10 + $0x1a0] sm:$0xff] %v5873_v5  ;;  %v5874_v43 = vadd.f32 %v7971_v59, %v5179_v44  ;;  %v5181_v42 = vpop.f32.mrb[35].mxu0 }
 0xae5   : > { %5276 = vst [vmem:[%s7974_s10 + $0x1a8] sm:$0xff] %v5874_v43 }
 0xae8   : > { %v5184_v41 = vpop.f32.mrb[36].mxu0 }
 0xae9   : > { %v5875_v0 = vadd.f32 %v7971_v59, %v5184_v41  ;;  %v5186_v34 = vpop.f32.mrb[37].mxu0 }
 0xaea   : > { %v5187_v35 = vpop.f32.mrb[38].mxu0 }
 0xaeb   : > { %5277 = vst [vmem:[%s7974_s10 + $0x1b0] sm:$0xff] %v5875_v0  ;;  %v5876_v29 = vadd.f32 %v7971_v59, %v5187_v35  ;;  %v5189_v12 = vpop.f32.mrb[39].mxu0 }
 0xaed   : > { %5278 = vst [vmem:[%s7974_s10 + $0x1b8] sm:$0xff] %v5876_v29 }
 0xaf0   : > { %v5192_v4 = vpop.f32.mrb[40].mxu0 }
 0xaf1   : > { %v5877_v3 = vadd.f32 %v7971_v59, %v5192_v4  ;;  %v5194_v2 = vpop.f32.mrb[41].mxu0 }
 0xaf2   : > { %v5195_v1 = vpop.f32.mrb[42].mxu0 }
 0xaf3   : > { %5279 = vst [vmem:[%s7974_s10 + $0x1c0] sm:$0xff] %v5877_v3  ;;  %v5878_v63 = vadd.f32 %v7971_v59, %v5195_v1  ;;  %v5197_v13 = vpop.f32.mrb[43].mxu0 }
 0xaf5   : > { %5280 = vst [vmem:[%s7974_s10 + $0x1c8] sm:$0xff] %v5878_v63 }
 0xaf8   : > { %v5200_v21 = vpop.f32.mrb[44].mxu0 }
 0xaf9   : > { %v5879_v46 = vadd.f32 %v7971_v59, %v5200_v21  ;;  %v5202_v20 = vpop.f32.mrb[45].mxu0 }
 0xafa   : > { %v5203_v52 = vpop.f32.mrb[46].mxu0 }
 0xafb   : > { %5281 = vst [vmem:[%s7974_s10 + $0x1d0] sm:$0xff] %v5879_v46  ;;  %v5880_v60 = vadd.f32 %v7971_v59, %v5203_v52  ;;  %v5205_v58 = vpop.f32.mrb[47].mxu0 }
 0xafd   : > { %5282 = vst [vmem:[%s7974_s10 + $0x1d8] sm:$0xff] %v5880_v60 }
 0xb00   : > { %v5208_v18 = vpop.f32.mrb[48].mxu0 }
 0xb01   : > { %v5881_v17 = vadd.f32 %v7971_v59, %v5208_v18  ;;  %v5210_v55 = vpop.f32.mrb[49].mxu0 }
 0xb02   : > { %v5211_v62 = vpop.f32.mrb[50].mxu0 }
 0xb03   : > { %5283 = vst [vmem:[%s7974_s10 + $0x1e0] sm:$0xff] %v5881_v17  ;;  %v5882_v36 = vadd.f32 %v7971_v59, %v5211_v62  ;;  %v5213_v19 = vpop.f32.mrb[51].mxu0 }
 0xb05   : > { %5284 = vst [vmem:[%s7974_s10 + $0x1e8] sm:$0xff] %v5882_v36 }
 0xb08   : > { %v5216_v16 = vpop.f32.mrb[52].mxu0 }
 0xb09   : > { %v5883_v15 = vadd.f32 %v7971_v59, %v5216_v16  ;;  %v5218_v27 = vpop.f32.mrb[53].mxu0 }
 0xb0a   : > { %v5219_v40 = vpop.f32.mrb[54].mxu0 }
 0xb0b   : > { %5285 = vst [vmem:[%s7974_s10 + $0x1f0] sm:$0xff] %v5883_v15  ;;  %v5884_v53 = vadd.f32 %v7971_v59, %v5219_v40  ;;  %v5221_v11 = vpop.f32.mrb[55].mxu0 }
 0xb0d   : > { %5286 = vst [vmem:[%s7974_s10 + $0x1f8] sm:$0xff] %v5884_v53 }
 0xb0e   : > { %7088 = shalt.err (!%p7085_p13)
}
 0xb0f   : > { %s7089_s25 = scalar_lea.hbm %s8105_s23, 8192  ;;  %s7093_s10 = scalar_lea.hbm %s8187_s21, 16384 }
 0xb10   : > { %p7090_p0 = scmp.ne.s32.totalorder %s8105_s23, %s7089_s25  ;;  %p7094_p1 = scmp.lt.u32.totalorder %s8105_s23, %s8187_s21 }
 0xb11   : > { %p7095_p2 = scmp.lt.u32.totalorder %s7093_s10, %s7089_s25  ;;  %p7097_p6 = scmp.lt.u32.totalorder %s7089_s25, %s8105_s23 }
 0xb12   : > { %p7091_p5 = pnand %p7090_p0, %p7359_p8 }
 0xb13   : > { %p7096_p4 = por %p7095_p2, %p7094_p1 }
 0xb14   : > { %p7092_p11 = pneg %p7091_p5 }
 0xb15   : > { %p7098_p10 = por %p7097_p6, %p7096_p4 }
 0xb17   : > { %p7099_p12 = pnand %p7098_p10, %p7092_p11 }
 0xb19   : > { %7102 = shalt.err (!%p7099_p12)
}
 0xb1a   : > { %s7164_s20 = smov 128   ;;  %s7165_s27 = smov 8  }
 0xb1b   : > { %6287 = dma.vmem_to_hbm [thread:$0]  (%p7359_p8), %s8107_s26, 8192, %s8105_s23, %s5288_s9, %s7164_s20, %s7164_s20, %s7165_s27  }
 0xb1c PF: > { %s8188_s11 = sld [smem:[#allocation16_spill]]  ;;  %s8189_s13 = sld [smem:[#allocation17_spill]] }
 0xb1d   : > { %p8191_p7 = scmp.ge.s32.totalorder %s7149_s30, 2 }
 0xb22   : > { %s5316_s12 = sand.u32 1, %s8188_s11   ;;  %p8190_p3 = scmp.ne.s32.totalorder %s8189_s13, 0 }
 0xb23   : > { %s5317_s24 = scalar_lea.sflag [#allocation4], %s5316_s12 }
 0xb24   : > { %p6307_p9 = pnand %p8191_p7, %p8190_p3 }
 0xb26   : > { %7132 = dma.done.wait (!%p6307_p9), %s5317_s24, 8192  }
 0xb27   : > { %7134 = vsyncadd (!%p6307_p9), %s5317_s24, 4294959104  ;;  %p23_p13 = scmp.ge.s32.totalorder %s7346_s18, 4   ;;  %s8192_s27 = smov %s7141_s28 }
 0xb28   : > { %s8193_s28 = smov %s7145_s29  ;;  %s8194_s29 = smov %s7355_s17 }
 0xb29   : > { %s8195_s30 = smov %s7346_s18  ;;  %25 = sbr.rel (!%p23_p13) target bundleno = 9 (0x9), region = 113 }
 0xb30   :  { %5322 = vsyncpa [#allocation3], 1 }
 0xb31   :  { %5324 = vsyncpa [#allocation3 + $0x1], 1 }
 0xb32   :  { %5325 = vsyncpa [#allocation6], 1 }
 0xb33   :  { %5326 = vsyncpa [#allocation9], 1 }
 0xb34   :  { %5327 = vsyncpa [#allocation4], 1 }
 0xb35   :  { %5329 = vsyncpa [#allocation4 + $0x1], 1 }

</bundles_post_ra>
